<compile_context>
chip_gen: v7x
topology: tpu7x:2x2x1
jax: 0.10.0
libtpu: 0.0.40
codegen_flags: <defaults>
</compile_context>

<pallas_src>
import jax
import jax.numpy as jnp
from jax import lax
from jax.experimental import pallas as pl
from jax.experimental.pallas import tpu as pltpu


# ----------------------------------------------------------------------------
# Single fused kernel: attention path + GF max-pool + MA branch (whole batch, grid=())
# ----------------------------------------------------------------------------
def _net_kernel(xt_ref, xflat_ref, xpad_ref, wk_ref, bk_ref, wgf_ref,
                w1_ref, b1_ref, w2_ref, b2_ref, w3_ref, b3_ref,
                kpa_ref, kpcd_ref, ma_ref):
    B, k, N = kpa_ref.shape
    eps = 1e-5

    # --- KP logits for the WHOLE batch in one MXU op: (k, 3) @ (3, B*N) ---
    # (encoder stand-in weight already has PT_L folded in; see wrapper)
    logits_all = jnp.dot(wk_ref[...], xt_ref[...],
                         preferred_element_type=jnp.float32) + bk_ref[...]     # (k, B*N)

    # --- GF point features for the WHOLE batch in one MXU op: (B*N, 3) @ (3, 1024) ---
    feat_all = jnp.dot(xflat_ref[...], wgf_ref[...],
                       preferred_element_type=jnp.float32)                      # (B*N, 1024)

    # --- per-batch softmax over N, KPCD = KPA @ x, and GF max-pool (B is tiny; unroll) ---
    gf_rows = []
    for b in range(B):
        logits = logits_all[:, b * N:(b + 1) * N]                               # (k, N)
        m = jnp.max(logits, axis=-1, keepdims=True)
        e = jnp.exp(logits - m)
        s = jnp.sum(e, axis=-1, keepdims=True)
        kpa = e * pl.reciprocal(s, approx=True)                                 # softmax (EUP)
        kpa_ref[b] = kpa
        # x padded to 128 lanes -> (k, 128) lane-dense store; wrapper slices [:, :, :3]
        kpcd_ref[b] = jnp.dot(kpa, xpad_ref[b], preferred_element_type=jnp.float32)
        gf_rows.append(jnp.max(feat_all[b * N:(b + 1) * N, :], axis=0, keepdims=True))
    gf = jnp.concatenate(gf_rows, axis=0)                                       # (B, 1024)

    # --- MA PBlock: 2 x [Linear -> BatchNorm1d(training stats) -> ReLU] -> MA_L -> sigmoid ---
    def bn_relu(h):  # BatchNorm1d training mode, default gamma=1, beta=0
        mu = jnp.mean(h, axis=0, keepdims=True)
        var = jnp.mean(jnp.square(h - mu), axis=0, keepdims=True)
        return jnp.maximum((h - mu) * lax.rsqrt(var + eps), 0.0)

    # MA weights arrive in bf16 (half the HBM->VMEM bytes); f32 accumulation on the MXU
    h = jnp.dot(gf.astype(jnp.bfloat16), w1_ref[...],
                preferred_element_type=jnp.float32) + b1_ref[...]
    h = bn_relu(h)
    h = jnp.dot(h.astype(jnp.bfloat16), w2_ref[...],
                preferred_element_type=jnp.float32) + b2_ref[...]
    h = bn_relu(h)
    o = jnp.dot(h.astype(jnp.bfloat16), w3_ref[...],
                preferred_element_type=jnp.float32) + b3_ref[...]
    ma_ref[...] = 0.5 * (jnp.tanh(0.5 * o) + 1.0)   # numerically stable sigmoid


# ----------------------------------------------------------------------------
# Parameters (deterministic synthetic init; shapes from Net.__init__, default branch)
# ----------------------------------------------------------------------------
def init_params(key, k):
    n_pairs = k * (k - 1) // 2
    ks = jax.random.split(key, 12)
    p = {}
    # stand-in encoder weights (see TODO below)
    p["enc_w_kp"] = jax.random.normal(ks[0], (3, k), jnp.float32) * 0.5
    p["enc_w_gf"] = jax.random.normal(ks[1], (3, 1024), jnp.float32) * 0.5
    # PT_L = nn.Linear(k, k)
    p["pt_w"] = jax.random.normal(ks[2], (k, k), jnp.float32) * (1.0 / jnp.sqrt(k))
    p["pt_b"] = jax.random.normal(ks[3], (1, k), jnp.float32) * 0.01
    # MA = PBlock(1024, 512, 256) — weights stored in bf16 (DMA-bound; f32 accumulation)
    p["ma_w1"] = (jax.random.normal(ks[4], (1024, 512), jnp.float32) * 0.03).astype(jnp.bfloat16)
    p["ma_b1"] = jax.random.normal(ks[5], (1, 512), jnp.float32) * 0.01
    p["ma_w2"] = (jax.random.normal(ks[6], (512, 256), jnp.float32) * 0.04).astype(jnp.bfloat16)
    p["ma_b2"] = jax.random.normal(ks[7], (1, 256), jnp.float32) * 0.01
    # MA_L = nn.Linear(256, k*(k-1)//2)
    p["mal_w"] = (jax.random.normal(ks[8], (256, n_pairs), jnp.float32) * 0.06).astype(jnp.bfloat16)
    p["mal_b"] = jax.random.normal(ks[9], (1, n_pairs), jnp.float32) * 0.01
    # MA_EMB parameter (declared in __init__, unused in forward)
    p["ma_emb"] = jax.random.normal(ks[10], (n_pairs,), jnp.float32)
    # DEC: one Head per (i, j) pair, each with emb = randn(200, 3) * 0.002
    p["dec_emb"] = jax.random.normal(ks[11], (n_pairs, 200, 3), jnp.float32) * 0.002
    return p


# ----------------------------------------------------------------------------
# Device-side forward (jitted): layout plumbing + fused Pallas kernel + pair distances
# ----------------------------------------------------------------------------
# TODO(synk): PointNetPP/DGCNN/EQCNN/EQPointNet/SPRIN encoder sources were not provided;
# a deterministic *linear* stand-in produces KP (B,N,k) and GF (B,1024).  Because it is
# linear, PT_L is folded into the encoder weight (KPL = x @ (Wkp @ Wpt) + b) exactly.
@jax.jit
def _device_forward(params, x):
    B, N, _ = x.shape
    k = params["pt_w"].shape[0]
    n_pairs = params["mal_b"].shape[1]

    wkT = (params["enc_w_kp"] @ params["pt_w"]).T            # (k, 3)  folded PT_L weight
    bk = params["pt_b"].reshape(k, 1)                        # (k, 1)

    # Layout plumbing (cheap XLA ops): all batches concatenated on the lane axis for the
    # logits matmul, on the sublane axis for the GF matmul; coordinates padded to 128
    # lanes so the in-kernel KPCD store is lane-dense.
    xt_all = jnp.transpose(x, (2, 0, 1)).reshape(3, B * N)   # (3, B*N)
    x_flat = x.reshape(B * N, 3)                             # (B*N, 3)
    x_pad = jnp.pad(x, ((0, 0), (0, 0), (0, 128 - 3)))       # (B, N, 128)

    n_out = pl.cdiv(n_pairs, 128) * 128                      # lane-dense MA output width
    w3p = jnp.pad(params["mal_w"], ((0, 0), (0, n_out - n_pairs)))
    b3p = jnp.pad(params["mal_b"], ((0, 0), (0, n_out - n_pairs)))

    kpa, kpcd_pad, ma_pad = pl.pallas_call(
        _net_kernel,
        out_shape=(jax.ShapeDtypeStruct((B, k, N), jnp.float32),
                   jax.ShapeDtypeStruct((B, k, 128), jnp.float32),
                   jax.ShapeDtypeStruct((B, n_out), jnp.float32)),
    )(xt_all, x_flat, x_pad, wkT, bk, params["enc_w_gf"],
      params["ma_w1"], params["ma_b1"], params["ma_w2"], params["ma_b2"], w3p, b3p)

    kpcd = kpcd_pad[:, :, :3]
    ma = ma_pad[:, :n_pairs]

    # All pair distances in one op -> a single device->host transfer in the wrapper.
    ii, jj = [], []
    for i in range(k):
        for j in range(i):
            ii.append(i)
            jj.append(j)
    ii = jnp.asarray(ii, jnp.int32)
    jj = jnp.asarray(jj, jnp.int32)
    A = kpcd[:, ii, :]                                       # (B, P, 3)
    Bv = kpcd[:, jj, :]                                      # (B, P, 3)
    dists = jnp.mean(jnp.sqrt(0.001 + jnp.sum(jnp.square(A - Bv), axis=-1)), axis=0)  # (P,)
    return kpa, kpcd, ma, dists


# ----------------------------------------------------------------------------
# Full forward (Head decoder needs host-side counts, as in the original .item() calls)
# ----------------------------------------------------------------------------
def net_forward(params, x, k):
    kpa, kpcd, ma, dists = _device_forward(params, x)
    dists_h = jax.device_get(dists)   # single host sync for all k*(k-1)/2 pair counts

    # TODO(synk): `count` is data-dependent via a host-side int() (as in Head.forward),
    # so the per-pair ragged interpolation below stays in plain (un-jitted) JAX.
    RP, L = [], []
    p = 0
    for i in range(k):
        for j in range(i):
            count = min(200, max(15, int(float(dists_h[p]) / 0.01)))
            A = kpcd[:, i, :]                                            # (B, 3)
            Bv = kpcd[:, j, :]                                           # (B, 3)
            f_interp = jnp.linspace(0.0, 1.0, count)[None, :, None]      # (1, count, 1)
            b_interp = 1.0 - f_interp
            K = A[:, None, :] * f_interp + Bv[:, None, :] * b_interp     # (B, count, 3)
            emb = params["dec_emb"][p]                                   # (200, 3)
            R = emb[:count, :][None, :, :] + K
            RP.append(R.reshape((-1, count, 3)))
            L.append(emb)
            p += 1
    LF = jnp.concatenate(L, axis=1)                                      # (200, 3 * n_pairs)

    return RP, kpcd, kpa, LF, ma


# ----------------------------------------------------------------------------
if __name__ == "__main__":
    B, N, k = 2, 128, 8                 # small shapes consistent with the module
    key = jax.random.PRNGKey(0)
    k_param, k_x = jax.random.split(key)
    params = init_params(k_param, k)
    x = jax.random.normal(k_x, (B, N, 3), jnp.float32)   # input point cloud (B, N, 3)

    RP, KPCD, KPA, LF, MA = net_forward(params, x, k)

    jax.block_until_ready(KPCD)
    jax.block_until_ready(KPA)
    jax.block_until_ready(LF)
    jax.block_until_ready(MA)
    for r in RP:
        jax.block_until_ready(r)

    n_pairs = k * (k - 1) // 2
    assert KPCD.shape == (B, k, 3)
    assert KPA.shape == (B, k, N)
    assert MA.shape == (B, n_pairs)
    assert LF.shape == (200, 3 * n_pairs)
    assert len(RP) == n_pairs

    print("KERNEL_OK")
</pallas_src>

<mosaic_0001>
module attributes {stable_mosaic.version = 11 : i64} {
  func.func @_net_kernel(%arg0: memref<3x256xf32, #tpu.memory_space<vmem>>, %arg1: memref<256x3xf32, #tpu.memory_space<vmem>>, %arg2: memref<2x128x128xf32, #tpu.memory_space<vmem>>, %arg3: memref<8x3xf32, #tpu.memory_space<vmem>>, %arg4: memref<8x1xf32, #tpu.memory_space<vmem>>, %arg5: memref<3x1024xf32, #tpu.memory_space<vmem>>, %arg6: memref<1024x512xbf16, #tpu.memory_space<vmem>>, %arg7: memref<1x512xf32, #tpu.memory_space<vmem>>, %arg8: memref<512x256xbf16, #tpu.memory_space<vmem>>, %arg9: memref<1x256xf32, #tpu.memory_space<vmem>>, %arg10: memref<256x128xbf16, #tpu.memory_space<vmem>>, %arg11: memref<1x128xf32, #tpu.memory_space<vmem>>, %arg12: memref<2x8x128xf32, #tpu.memory_space<vmem>>, %arg13: memref<2x8x128xf32, #tpu.memory_space<vmem>>, %arg14: memref<2x128xf32, #tpu.memory_space<vmem>>) attributes {dimension_semantics = [], scalar_prefetch = 0 : i64, scratch_operands = 0 : i64, tpu.core_type = #tpu.core_type<tc>} {
    %c0 = arith.constant 0 : index
    %c0_0 = arith.constant 0 : index
    %0 = vector.load %arg3[%c0, %c0_0] : memref<8x3xf32, #tpu.memory_space<vmem>>, vector<8x3xf32>
    %c0_1 = arith.constant 0 : index
    %c0_2 = arith.constant 0 : index
    %1 = vector.load %arg0[%c0_1, %c0_2] : memref<3x256xf32, #tpu.memory_space<vmem>>, vector<3x256xf32>
    %cst = arith.constant dense<0.000000e+00> : vector<8x256xf32>
    %2 = tpu.matmul %0, %1, %cst {dimension_numbers = #tpu.dot_dimension_numbers<[1], [0], [0], [1], [0, 0, 1, 1], [], []>} : vector<8x3xf32>, vector<3x256xf32>, vector<8x256xf32> -> vector<8x256xf32>
    %c0_3 = arith.constant 0 : index
    %c0_4 = arith.constant 0 : index
    %3 = vector.load %arg4[%c0_3, %c0_4] : memref<8x1xf32, #tpu.memory_space<vmem>>, vector<8x1xf32>
    %4 = vector.broadcast %3 : vector<8x1xf32> to vector<8x256xf32>
    %5 = arith.addf %2, %4 : vector<8x256xf32>
    %c0_5 = arith.constant 0 : index
    %c0_6 = arith.constant 0 : index
    %6 = vector.load %arg1[%c0_5, %c0_6] : memref<256x3xf32, #tpu.memory_space<vmem>>, vector<256x3xf32>
    %c0_7 = arith.constant 0 : index
    %c0_8 = arith.constant 0 : index
    %7 = vector.load %arg5[%c0_7, %c0_8] : memref<3x1024xf32, #tpu.memory_space<vmem>>, vector<3x1024xf32>
    %cst_9 = arith.constant dense<0.000000e+00> : vector<256x1024xf32>
    %8 = tpu.matmul %6, %7, %cst_9 {dimension_numbers = #tpu.dot_dimension_numbers<[1], [0], [0], [1], [0, 0, 1, 1], [], []>} : vector<256x3xf32>, vector<3x1024xf32>, vector<256x1024xf32> -> vector<256x1024xf32>
    %9 = vector.extract_strided_slice %5 {offsets = [0, 0], sizes = [8, 128], strides = [1, 1]} : vector<8x256xf32> to vector<8x128xf32>
    %cst_10 = arith.constant dense<0xFF800000> : vector<8xf32>
    %10 = vector.multi_reduction <maximumf>, %9, %cst_10 [1] : vector<8x128xf32> to vector<8xf32>
    %11 = vector.shape_cast %10 : vector<8xf32> to vector<8x1xf32>
    %12 = vector.broadcast %11 : vector<8x1xf32> to vector<8x128xf32>
    %13 = arith.subf %9, %12 : vector<8x128xf32>
    %14 = math.exp %13 : vector<8x128xf32>
    %cst_11 = arith.constant dense<0.000000e+00> : vector<8xf32>
    %15 = vector.multi_reduction <add>, %14, %cst_11 [1] : vector<8x128xf32> to vector<8xf32>
    %16 = vector.shape_cast %15 : vector<8xf32> to vector<8x1xf32>
    %17 = tpu.reciprocal %16 {approx = true} : vector<8x1xf32> -> vector<8x1xf32>
    %18 = vector.broadcast %17 : vector<8x1xf32> to vector<8x128xf32>
    %19 = arith.mulf %14, %18 : vector<8x128xf32>
    %c0_12 = arith.constant 0 : index
    %c0_13 = arith.constant 0 : index
    %c0_14 = arith.constant 0 : index
    %20 = vector.load %arg12[%c0_12, %c0_13, %c0_14] : memref<2x8x128xf32, #tpu.memory_space<vmem>>, vector<1x8x128xf32>
    %21 = vector.shape_cast %20 : vector<1x8x128xf32> to vector<8x128xf32>
    %22 = vector.shape_cast %19 : vector<8x128xf32> to vector<1x8x128xf32>
    tpu.vector_store %arg12[%c0_12, %c0_13, %c0_14], %22 {strides = array<i32>} : memref<2x8x128xf32, #tpu.memory_space<vmem>>, vector<1x8x128xf32>,
    %c0_15 = arith.constant 0 : index
    %c0_16 = arith.constant 0 : index
    %c0_17 = arith.constant 0 : index
    %23 = vector.load %arg2[%c0_15, %c0_16, %c0_17] : memref<2x128x128xf32, #tpu.memory_space<vmem>>, vector<1x128x128xf32>
    %24 = vector.shape_cast %23 : vector<1x128x128xf32> to vector<128x128xf32>
    %cst_18 = arith.constant dense<0.000000e+00> : vector<8x128xf32>
    %25 = tpu.matmul %19, %24, %cst_18 {dimension_numbers = #tpu.dot_dimension_numbers<[1], [0], [0], [1], [0, 0, 1, 1], [], []>} : vector<8x128xf32>, vector<128x128xf32>, vector<8x128xf32> -> vector<8x128xf32>
    %c0_19 = arith.constant 0 : index
    %c0_20 = arith.constant 0 : index
    %c0_21 = arith.constant 0 : index
    %26 = vector.load %arg13[%c0_19, %c0_20, %c0_21] : memref<2x8x128xf32, #tpu.memory_space<vmem>>, vector<1x8x128xf32>
    %27 = vector.shape_cast %26 : vector<1x8x128xf32> to vector<8x128xf32>
    %28 = vector.shape_cast %25 : vector<8x128xf32> to vector<1x8x128xf32>
    tpu.vector_store %arg13[%c0_19, %c0_20, %c0_21], %28 {strides = array<i32>} : memref<2x8x128xf32, #tpu.memory_space<vmem>>, vector<1x8x128xf32>,
    %29 = vector.extract_strided_slice %8 {offsets = [0, 0], sizes = [128, 1024], strides = [1, 1]} : vector<256x1024xf32> to vector<128x1024xf32>
    %cst_22 = arith.constant dense<0xFF800000> : vector<1024xf32>
    %30 = vector.multi_reduction <maximumf>, %29, %cst_22 [0] : vector<128x1024xf32> to vector<1024xf32>
    %31 = vector.shape_cast %30 : vector<1024xf32> to vector<1x1024xf32>
    %32 = vector.extract_strided_slice %5 {offsets = [0, 128], sizes = [8, 128], strides = [1, 1]} : vector<8x256xf32> to vector<8x128xf32>
    %cst_23 = arith.constant dense<0xFF800000> : vector<8xf32>
    %33 = vector.multi_reduction <maximumf>, %32, %cst_23 [1] : vector<8x128xf32> to vector<8xf32>
    %34 = vector.shape_cast %33 : vector<8xf32> to vector<8x1xf32>
    %35 = vector.broadcast %34 : vector<8x1xf32> to vector<8x128xf32>
    %36 = arith.subf %32, %35 : vector<8x128xf32>
    %37 = math.exp %36 : vector<8x128xf32>
    %cst_24 = arith.constant dense<0.000000e+00> : vector<8xf32>
    %38 = vector.multi_reduction <add>, %37, %cst_24 [1] : vector<8x128xf32> to vector<8xf32>
    %39 = vector.shape_cast %38 : vector<8xf32> to vector<8x1xf32>
    %40 = tpu.reciprocal %39 {approx = true} : vector<8x1xf32> -> vector<8x1xf32>
    %41 = vector.broadcast %40 : vector<8x1xf32> to vector<8x128xf32>
    %42 = arith.mulf %37, %41 : vector<8x128xf32>
    %c1 = arith.constant 1 : index
    %c0_25 = arith.constant 0 : index
    %c0_26 = arith.constant 0 : index
    %43 = vector.load %arg12[%c1, %c0_25, %c0_26] : memref<2x8x128xf32, #tpu.memory_space<vmem>>, vector<1x8x128xf32>
    %44 = vector.shape_cast %43 : vector<1x8x128xf32> to vector<8x128xf32>
    %45 = vector.shape_cast %42 : vector<8x128xf32> to vector<1x8x128xf32>
    tpu.vector_store %arg12[%c1, %c0_25, %c0_26], %45 {strides = array<i32>} : memref<2x8x128xf32, #tpu.memory_space<vmem>>, vector<1x8x128xf32>,
    %c1_27 = arith.constant 1 : index
    %c0_28 = arith.constant 0 : index
    %c0_29 = arith.constant 0 : index
    %46 = vector.load %arg2[%c1_27, %c0_28, %c0_29] : memref<2x128x128xf32, #tpu.memory_space<vmem>>, vector<1x128x128xf32>
    %47 = vector.shape_cast %46 : vector<1x128x128xf32> to vector<128x128xf32>
    %cst_30 = arith.constant dense<0.000000e+00> : vector<8x128xf32>
    %48 = tpu.matmul %42, %47, %cst_30 {dimension_numbers = #tpu.dot_dimension_numbers<[1], [0], [0], [1], [0, 0, 1, 1], [], []>} : vector<8x128xf32>, vector<128x128xf32>, vector<8x128xf32> -> vector<8x128xf32>
    %c1_31 = arith.constant 1 : index
    %c0_32 = arith.constant 0 : index
    %c0_33 = arith.constant 0 : index
    %49 = vector.load %arg13[%c1_31, %c0_32, %c0_33] : memref<2x8x128xf32, #tpu.memory_space<vmem>>, vector<1x8x128xf32>
    %50 = vector.shape_cast %49 : vector<1x8x128xf32> to vector<8x128xf32>
    %51 = vector.shape_cast %48 : vector<8x128xf32> to vector<1x8x128xf32>
    tpu.vector_store %arg13[%c1_31, %c0_32, %c0_33], %51 {strides = array<i32>} : memref<2x8x128xf32, #tpu.memory_space<vmem>>, vector<1x8x128xf32>,
    %52 = vector.extract_strided_slice %8 {offsets = [128, 0], sizes = [128, 1024], strides = [1, 1]} : vector<256x1024xf32> to vector<128x1024xf32>
    %cst_34 = arith.constant dense<0xFF800000> : vector<1024xf32>
    %53 = vector.multi_reduction <maximumf>, %52, %cst_34 [0] : vector<128x1024xf32> to vector<1024xf32>
    %54 = vector.shape_cast %53 : vector<1024xf32> to vector<1x1024xf32>
    %55 = tpu.concatenate %31, %54 in 0 : vector<1x1024xf32>, vector<1x1024xf32> -> vector<2x1024xf32>
    %56 = arith.truncf %55 : vector<2x1024xf32> to vector<2x1024xbf16>
    %c0_35 = arith.constant 0 : index
    %c0_36 = arith.constant 0 : index
    %57 = vector.load %arg6[%c0_35, %c0_36] : memref<1024x512xbf16, #tpu.memory_space<vmem>>, vector<1024x512xbf16>
    %cst_37 = arith.constant dense<0.000000e+00> : vector<2x512xf32>
    %58 = tpu.matmul %56, %57, %cst_37 {dimension_numbers = #tpu.dot_dimension_numbers<[1], [0], [0], [1], [0, 0, 1, 1], [], []>} : vector<2x1024xbf16>, vector<1024x512xbf16>, vector<2x512xf32> -> vector<2x512xf32>
    %c0_38 = arith.constant 0 : index
    %c0_39 = arith.constant 0 : index
    %59 = vector.load %arg7[%c0_38, %c0_39] : memref<1x512xf32, #tpu.memory_space<vmem>>, vector<1x512xf32>
    %60 = vector.broadcast %59 : vector<1x512xf32> to vector<2x512xf32>
    %61 = arith.addf %58, %60 : vector<2x512xf32>
    %cst_40 = arith.constant dense<0.000000e+00> : vector<512xf32>
    %62 = vector.multi_reduction <add>, %61, %cst_40 [0] : vector<2x512xf32> to vector<512xf32>
    %63 = vector.shape_cast %62 : vector<512xf32> to vector<1x512xf32>
    %cst_41 = arith.constant 2.000000e+00 : f32
    %64 = vector.broadcast %cst_41 : f32 to vector<1x512xf32>
    %65 = arith.divf %63, %64 : vector<1x512xf32>
    %66 = vector.broadcast %65 : vector<1x512xf32> to vector<2x512xf32>
    %67 = arith.subf %61, %66 : vector<2x512xf32>
    %68 = arith.mulf %67, %67 : vector<2x512xf32>
    %cst_42 = arith.constant dense<0.000000e+00> : vector<512xf32>
    %69 = vector.multi_reduction <add>, %68, %cst_42 [0] : vector<2x512xf32> to vector<512xf32>
    %70 = vector.shape_cast %69 : vector<512xf32> to vector<1x512xf32>
    %cst_43 = arith.constant 2.000000e+00 : f32
    %71 = vector.broadcast %cst_43 : f32 to vector<1x512xf32>
    %72 = arith.divf %70, %71 : vector<1x512xf32>
    %73 = vector.broadcast %65 : vector<1x512xf32> to vector<2x512xf32>
    %74 = arith.subf %61, %73 : vector<2x512xf32>
    %cst_44 = arith.constant 9.99999974E-6 : f32
    %75 = vector.broadcast %cst_44 : f32 to vector<1x512xf32>
    %76 = arith.addf %72, %75 : vector<1x512xf32>
    %77 = math.rsqrt %76 : vector<1x512xf32>
    %78 = vector.broadcast %77 : vector<1x512xf32> to vector<2x512xf32>
    %79 = arith.mulf %74, %78 : vector<2x512xf32>
    %cst_45 = arith.constant 0.000000e+00 : f32
    %80 = vector.broadcast %cst_45 : f32 to vector<2x512xf32>
    %81 = arith.maximumf %79, %80 : vector<2x512xf32>
    %82 = arith.truncf %81 : vector<2x512xf32> to vector<2x512xbf16>
    %c0_46 = arith.constant 0 : index
    %c0_47 = arith.constant 0 : index
    %83 = vector.load %arg8[%c0_46, %c0_47] : memref<512x256xbf16, #tpu.memory_space<vmem>>, vector<512x256xbf16>
    %cst_48 = arith.constant dense<0.000000e+00> : vector<2x256xf32>
    %84 = tpu.matmul %82, %83, %cst_48 {dimension_numbers = #tpu.dot_dimension_numbers<[1], [0], [0], [1], [0, 0, 1, 1], [], []>} : vector<2x512xbf16>, vector<512x256xbf16>, vector<2x256xf32> -> vector<2x256xf32>
    %c0_49 = arith.constant 0 : index
    %c0_50 = arith.constant 0 : index
    %85 = vector.load %arg9[%c0_49, %c0_50] : memref<1x256xf32, #tpu.memory_space<vmem>>, vector<1x256xf32>
    %86 = vector.broadcast %85 : vector<1x256xf32> to vector<2x256xf32>
    %87 = arith.addf %84, %86 : vector<2x256xf32>
    %cst_51 = arith.constant dense<0.000000e+00> : vector<256xf32>
    %88 = vector.multi_reduction <add>, %87, %cst_51 [0] : vector<2x256xf32> to vector<256xf32>
    %89 = vector.shape_cast %88 : vector<256xf32> to vector<1x256xf32>
    %cst_52 = arith.constant 2.000000e+00 : f32
    %90 = vector.broadcast %cst_52 : f32 to vector<1x256xf32>
    %91 = arith.divf %89, %90 : vector<1x256xf32>
    %92 = vector.broadcast %91 : vector<1x256xf32> to vector<2x256xf32>
    %93 = arith.subf %87, %92 : vector<2x256xf32>
    %94 = arith.mulf %93, %93 : vector<2x256xf32>
    %cst_53 = arith.constant dense<0.000000e+00> : vector<256xf32>
    %95 = vector.multi_reduction <add>, %94, %cst_53 [0] : vector<2x256xf32> to vector<256xf32>
    %96 = vector.shape_cast %95 : vector<256xf32> to vector<1x256xf32>
    %cst_54 = arith.constant 2.000000e+00 : f32
    %97 = vector.broadcast %cst_54 : f32 to vector<1x256xf32>
    %98 = arith.divf %96, %97 : vector<1x256xf32>
    %99 = vector.broadcast %91 : vector<1x256xf32> to vector<2x256xf32>
    %100 = arith.subf %87, %99 : vector<2x256xf32>
    %cst_55 = arith.constant 9.99999974E-6 : f32
    %101 = vector.broadcast %cst_55 : f32 to vector<1x256xf32>
    %102 = arith.addf %98, %101 : vector<1x256xf32>
    %103 = math.rsqrt %102 : vector<1x256xf32>
    %104 = vector.broadcast %103 : vector<1x256xf32> to vector<2x256xf32>
    %105 = arith.mulf %100, %104 : vector<2x256xf32>
    %cst_56 = arith.constant 0.000000e+00 : f32
    %106 = vector.broadcast %cst_56 : f32 to vector<2x256xf32>
    %107 = arith.maximumf %105, %106 : vector<2x256xf32>
    %108 = arith.truncf %107 : vector<2x256xf32> to vector<2x256xbf16>
    %c0_57 = arith.constant 0 : index
    %c0_58 = arith.constant 0 : index
    %109 = vector.load %arg10[%c0_57, %c0_58] : memref<256x128xbf16, #tpu.memory_space<vmem>>, vector<256x128xbf16>
    %cst_59 = arith.constant dense<0.000000e+00> : vector<2x128xf32>
    %110 = tpu.matmul %108, %109, %cst_59 {dimension_numbers = #tpu.dot_dimension_numbers<[1], [0], [0], [1], [0, 0, 1, 1], [], []>} : vector<2x256xbf16>, vector<256x128xbf16>, vector<2x128xf32> -> vector<2x128xf32>
    %c0_60 = arith.constant 0 : index
    %c0_61 = arith.constant 0 : index
    %111 = vector.load %arg11[%c0_60, %c0_61] : memref<1x128xf32, #tpu.memory_space<vmem>>, vector<1x128xf32>
    %112 = vector.broadcast %111 : vector<1x128xf32> to vector<2x128xf32>
    %113 = arith.addf %110, %112 : vector<2x128xf32>
    %cst_62 = arith.constant 5.000000e-01 : f32
    %114 = vector.broadcast %cst_62 : f32 to vector<2x128xf32>
    %115 = arith.mulf %114, %113 : vector<2x128xf32>
    %116 = math.tanh %115 : vector<2x128xf32>
    %cst_63 = arith.constant 1.000000e+00 : f32
    %117 = vector.broadcast %cst_63 : f32 to vector<2x128xf32>
    %118 = arith.addf %116, %117 : vector<2x128xf32>
    %cst_64 = arith.constant 5.000000e-01 : f32
    %119 = vector.broadcast %cst_64 : f32 to vector<2x128xf32>
    %120 = arith.mulf %119, %118 : vector<2x128xf32>
    %c0_65 = arith.constant 0 : index
    %c0_66 = arith.constant 0 : index
    %121 = vector.load %arg14[%c0_65, %c0_66] : memref<2x128xf32, #tpu.memory_space<vmem>>, vector<2x128xf32>
    tpu.vector_store %arg14[%c0_65, %c0_66], %120 {strides = array<i32>} : memref<2x128xf32, #tpu.memory_space<vmem>>, vector<2x128xf32>,
    return
  }
}

</mosaic_0001>

<bundles_post_ra>
// kernel: _device_forward.1
= control target key start
LH: loop header
LB: loop body
LE: loop exit
PB: predicated region body
PF: predicated region fallthrough
CT: control target
= control target key end

     0   :  { %20 = vsyncpa [#allocation3], 0  ;;  %s7103_s0 = inlined_call_operand.vmem [shape: f32[3,256], index: 0, kind: input, shape index: {}]   ;;  %s7104_s1 = inlined_call_operand.vmem [shape: f32[256,3], index: 1, kind: input, shape index: {}]   ;;  %s7105_s2 = inlined_call_operand.vmem [shape: f32[2,128,128], index: 2, kind: input, shape index: {}]   ;;  %s7106_s3 = inlined_call_operand.vmem [shape: f32[8,3], index: 3, kind: input, shape index: {}]   ;;  %s7107_s4 = inlined_call_operand.vmem [shape: f32[8,1], index: 4, kind: input, shape index: {}]   ;;  %s7108_s5 = inlined_call_operand.vmem [shape: f32[3,1024], index: 5, kind: input, shape index: {}]   ;;  %s7109_s6 = inlined_call_operand.hbm [shape: bf16[1024,512], index: 6, kind: input, shape index: {}]   ;;  %s7110_s7 = inlined_call_operand.vmem [shape: f32[1,512], index: 7, kind: input, shape index: {}]   ;;  %s7111_s8 = inlined_call_operand.vmem [shape: bf16[512,256], index: 8, kind: input, shape index: {}]   ;;  %s7112_s9 = inlined_call_operand.vmem [shape: f32[1,256], index: 9, kind: input, shape index: {}]   ;;  %s7113_s10 = inlined_call_operand.vmem [shape: bf16[256,128], index: 10, kind: input, shape index: {}]   ;;  %s7114_s11 = inlined_call_operand.vmem [shape: f32[1,128], index: 11, kind: input, shape index: {}]   ;;  %s7115_s12 = inlined_call_operand.hbm [shape: f32[2,8,128], index: 12, kind: output, shape index: {0}]   ;;  %s7116_s13 = inlined_call_operand.vmem [shape: f32[2,8,128], index: 13, kind: output, shape index: {1}]   ;;  %s7117_s14 = inlined_call_operand.hbm [shape: f32[2,128], index: 14, kind: output, shape index: {2}]  }
   0x1   :  { %21 = vsyncpa [#allocation4], 0 }
   0x2   :  { %22 = vsyncpa [#allocation7], 0  ;;  %s5918_s29 = smov [#allocation2]   ;;  %s5846_s17 = scalar_lea.hbm %s7109_s6, 32768 }
   0x3   :  { %s40_s30 = sshll.u32 %s5918_s29, 4  ;;  %p5847_p0 = scmp.ne.s32.totalorder %s7109_s6, %s5846_s17  ;;  %s41_s30 = int_to_ptr.vmem [resolvable:$true] %s40_s30 }
   0x4   :  { %p5850_p1 = scmp.lt.u32.totalorder %s5846_s17, %s7109_s6 }
   0x6   :  { %p5852_p2 = pnand %p5850_p1, %p5847_p0 }
   0x8   :  { %5855 = shalt.err (!%p5852_p2)
}
   0x9   :  { %s5856_s22 = scalar_lea.vmem %s41_s30, 32768  ;;  %p5861_p4 = scmp.lt.s32.totalorder %s41_s30, %s41_s30 }
   0xa   :  { %p5857_p3 = scmp.ne.s32.totalorder %s41_s30, %s5856_s22  ;;  %p5862_p5 = scmp.lt.s32.totalorder %s5856_s22, %s5856_s22 }
   0xc   :  { %p5863_p6 = por %p5862_p5, %p5861_p4 }
   0xe   :  { %p5864_p7 = pnand %p5863_p6, %p5857_p3 }
  0x10   :  { %5867 = shalt.err (!%p5864_p7)
}
  0x11   :  { %s5919_s23 = smov 256   ;;  %s5920_s24 = smov 16  }
  0x12   :  { %46 = dma.hbm_to_vmem [thread:$0]  %s7109_s6, 32768, %s41_s30, [#allocation3], %s5919_s23, %s5919_s23, %s5920_s24  }
  0x13   :  { %5912 = dma.done.wait [#allocation3], 32768  }
  0x14   :  { %5913 = vsyncadd [#allocation3], 4294934528  ;;  %v5921_v0 = vmov 0.0   ;;  %v5922_v1 = vmov 0   ;;  %v62_v2 = vld [vmem:[%s7103_s0] sm:$0x77] }
  0x15   :  { %144 = vmatprep.mubr.f32.mxu0 %v5921_v0  ;;  %371 = vmatprep.mubr.f32.mxu1 %v5921_v0  ;;  %vm75_vm0 = vcmask 1042432   ;;  %v183_v3 = vld [vmem:[%s7108_s5] sm:$0x77]  ;;  %v70_v4 = vcombine.high %v62_v2, %v62_v2  ;;  %vm71_vm1 = vcmask 23552   ;;  %v152_v8 = vld [vmem:[%s7104_s1 + $0x8] sm:$0xff]  ;;  %v153_v12 = vld [vmem:[%s7104_s1 + $0x10] sm:$0xff] }
  0x16   :  { %5316 = vset.pattern.permute.xlu0 %v5922_v1  ;;  %v191_v5 = vcombine.high %v183_v3, %v183_v3  ;;  %v61_v6 = vld [vmem:[%s7106_s3] sm:$0xff]  ;;  %v184_v9 = vld [vmem:[%s7108_s5 + $0x8] sm:$0x77]  ;;  %v154_v13 = vld [vmem:[%s7104_s1 + $0x18] sm:$0xff]  ;;  %vm1868_vm2 = vcmask 1040384   ;;  %vm5924_vm3 = vmmov 0  }
  0x17   :  { %v151_v7 = vld [vmem:[%s7104_s1] sm:$0xff]  ;;  %4604 = vmatprep.subr.msk.mxu0 %vm75_vm0, %v70_v4  ;;  %v192_v10 = vcombine.high %v184_v9, %v184_v9  ;;  %v185_v14 = vld [vmem:[%s7108_s5 + $0x10] sm:$0x77]  ;;  %v6077_v17 = vld [vmem:[%s7104_s1 + $0x28] sm:$0xff]  ;;  %vm3771_vm4 = vcmask 1041408  }
  0x18   :  { %4607 = vmatprep.subr.msk.mxu1 %vm75_vm0, %v191_v5  ;;  %4605 = vmatpush1.msk.msra.mxu0 %vm75_vm0, %v62_v2  ;;  %v63_v11 = vld [vmem:[%s7107_s4] sm:$0xff]  ;;  %v193_v15 = vcombine.high %v185_v14, %v185_v14  ;;  %v6086_v18 = vld [vmem:[%s7104_s1 + $0x30] sm:$0xff]  ;;  %v6096_v19 = vld [vmem:[%s7104_s1 + $0x38] sm:$0xff] }
  0x19   :  { %4608 = vmatpush1.msk.msra.mxu1 %vm75_vm0, %v183_v3  ;;  %4606 = vmatmul.mubr.msk.f32.vlgmr.msra.gmra.mrb[0].mxu0 %vm71_vm1, %v61_v6  ;;  %v155_v16 = vld [vmem:[%s7104_s1 + $0x20] sm:$0xff]  ;;  %v6118_v21 = vld [vmem:[%s7104_s1 + $0x48] sm:$0xff]  ;;  %v6129_v22 = vld [vmem:[%s7104_s1 + $0x50] sm:$0xff] }
  0x1a   :  { %4609 = vmatmul.mubr.msk.f32.vlgmr.msra.gmra.mrb[0].mxu1 %vm71_vm1, %v151_v7  ;;  %628 = vmatprep.mubr.f32.mxu0 %v5921_v0  ;;  %v6107_v20 = vld [vmem:[%s7104_s1 + $0x40] sm:$0xff]  ;;  %v6140_v23 = vld [vmem:[%s7104_s1 + $0x58] sm:$0xff]  ;;  %v6162_v25 = vld [vmem:[%s7104_s1 + $0x68] sm:$0xff] }
  0x1b   :  { %377 = vmatprep.mubr.f32.mxu1 %v5921_v0  ;;  %4641 = vmatprep.subr.msk.mxu0 %vm75_vm0, %v192_v10  ;;  %v6151_v24 = vld [vmem:[%s7104_s1 + $0x60] sm:$0xff]  ;;  %v6173_v26 = vld [vmem:[%s7104_s1 + $0x70] sm:$0xff]  ;;  %v6184_v27 = vld [vmem:[%s7104_s1 + $0x78] sm:$0xff] }
  0x1c   :  { %4642 = vmatpush1.msk.msra.mxu0 %vm75_vm0, %v184_v9  ;;  %66 = vperm.xlu0 %5316, %v63_v11   ;;  %v186_v28 = vld [vmem:[%s7108_s5 + $0x18] sm:$0x77]  ;;  %v6198_v29 = vld [vmem:[%s7104_s1 + $0x80] sm:$0xff]  ;;  %v6210_v31 = vld [vmem:[%s7104_s1 + $0x88] sm:$0xff] }
  0x1d   :  { %4643 = vmatmul.mubr.msk.f32.vlgmr.msra.gmra.mrb[2].mxu0 %vm71_vm1, %v151_v7  ;;  %4675 = vmatprep.subr.msk.mxu1 %vm75_vm0, %v193_v15  ;;  %v194_v30 = vcombine.high %v186_v28, %v186_v28  ;;  %v6222_v32 = vld [vmem:[%s7104_s1 + $0x90] sm:$0xff]  ;;  %v6233_v33 = vld [vmem:[%s7104_s1 + $0x98] sm:$0xff]  ;;  %v6244_v34 = vld [vmem:[%s7104_s1 + $0xa0] sm:$0xff] }
  0x1e   :  { %4610 = vmatmul.mubr.msk.f32.gmra.mrb[2].mxu1 %vm71_vm1, %v152_v8  ;;  %634 = vmatprep.mubr.f32.mxu0 %v5921_v0  ;;  %v6255_v35 = vld [vmem:[%s7104_s1 + $0xa8] sm:$0xff]  ;;  %v6266_v36 = vld [vmem:[%s7104_s1 + $0xb0] sm:$0xff]  ;;  %v6277_v37 = vld [vmem:[%s7104_s1 + $0xb8] sm:$0xff] }
  0x1f   :  { %383 = vmatprep.mubr.f32.mxu1 %v5921_v0  ;;  %4676 = vmatpush1.msk.msra.mxu1 %vm75_vm0, %v185_v14  ;;  %v6288_v38 = vld [vmem:[%s7104_s1 + $0xc0] sm:$0xff]  ;;  %v6299_v39 = vld [vmem:[%s7104_s1 + $0xc8] sm:$0xff]  ;;  %v6310_v40 = vld [vmem:[%s7104_s1 + $0xd0] sm:$0xff] }
  0x20   :  { %4709 = vmatprep.subr.msk.mxu0 %vm75_vm0, %v194_v30  ;;  %v6321_v41 = vld [vmem:[%s7104_s1 + $0xd8] sm:$0xff]  ;;  %v6332_v42 = vld [vmem:[%s7104_s1 + $0xe0] sm:$0xff]  ;;  %v6343_v43 = vld [vmem:[%s7104_s1 + $0xe8] sm:$0xff] }
  0x21   :  { %4644 = vmatmul.mubr.msk.f32.gmra.mrb[4].mxu0 %vm71_vm1, %v152_v8  ;;  %v6354_v44 = vld [vmem:[%s7104_s1 + $0xf0] sm:$0xff]  ;;  %v6365_v45 = vld [vmem:[%s7104_s1 + $0xf8] sm:$0xff]  ;;  %v5840_v49 = vld [vmem:[%s7104_s1] sm:$0xff] }
  0x22   :  { %4611 = vmatmul.mubr.msk.f32.gmra.mrb[4].mxu1 %vm71_vm1, %v153_v12  ;;  %640 = vmatprep.mubr.f32.mxu0 %v5921_v0  ;;  %v5324_v46 = vld [vmem:[#allocation2 + $0x4] ss:$16 sps:$4 sm:$0xff]   ;;  %v5322_v47 = vld [vmem:[#allocation2] ss:$16 sps:$4 sm:$0xff]   ;;  %v5841_v51 = vld [vmem:[%s7104_s1 + $0x8] sm:$0xff] }
  0x23   :  { %389 = vmatprep.mubr.f32.mxu1 %v5921_v0  ;;  %4710 = vmatpush1.msk.msra.mxu0 %vm75_vm0, %v186_v28  ;;  %v5327_v48 = vld [vmem:[#allocation2 + $0x24] ss:$16 sps:$4 sm:$0xff]   ;;  %v5325_v50 = vld [vmem:[#allocation2 + $0x20] ss:$16 sps:$4 sm:$0xff]   ;;  %v5843_v55 = vld [vmem:[%s7104_s1 + $0x18] sm:$0xff] }
  0x24   :  { %3443 = vmatprep.subr.bf16.mxu1 %v5324_v46  ;;  %v5328_v52 = vld [vmem:[#allocation2 + $0x40] ss:$16 sps:$4 sm:$0xff]   ;;  %v5330_v53 = vld [vmem:[#allocation2 + $0x44] ss:$16 sps:$4 sm:$0xff]   ;;  %v5845_v59 = vld [vmem:[%s7104_s1 + $0x28] sm:$0xff] }
  0x25   :  { %4645 = vmatmul.mubr.msk.f32.gmra.mrb[6].mxu0 %vm71_vm1, %v153_v12  ;;  %v5842_v54 = vld [vmem:[%s7104_s1 + $0x10] sm:$0xff]  ;;  %v5844_v58 = vld [vmem:[%s7104_s1 + $0x20] sm:$0xff] }
  0x26   :  { %4612 = vmatmul.mubr.msk.f32.gmra.mrb[6].mxu1 %vm71_vm1, %v154_v13  ;;  %646 = vmatprep.mubr.f32.mxu0 %v5921_v0  ;;  %v5331_v56 = vld [vmem:[#allocation2 + $0x60] ss:$16 sps:$4 sm:$0xff]   ;;  %v5333_v57 = vld [vmem:[#allocation2 + $0x64] ss:$16 sps:$4 sm:$0xff]  }
  0x27   :  { %395 = vmatprep.mubr.f32.mxu1 %v5921_v0  ;;  %v5334_v60 = vld [vmem:[#allocation2 + $0x80] ss:$16 sps:$4 sm:$0xff]   ;;  %v5336_v61 = vld [vmem:[#allocation2 + $0x84] ss:$16 sps:$4 sm:$0xff]  }
  0x28   :  { %v5339_v62 = vld [vmem:[#allocation2 + $0xa4] ss:$16 sps:$4 sm:$0xff]   ;;  %v5337_v63 = vld [vmem:[#allocation2 + $0xa0] ss:$16 sps:$4 sm:$0xff]  }
  0x29   :  { %4646 = vmatmul.mubr.msk.f32.gmra.mrb[8].mxu0 %vm71_vm1, %v154_v13  ;;  %v5340_v1 = vld [vmem:[#allocation2 + $0xc0] ss:$16 sps:$4 sm:$0xff]   ;;  %v5342_v2 = vld [vmem:[#allocation2 + $0xc4] ss:$16 sps:$4 sm:$0xff]  }
  0x2a   :  { %4613 = vmatmul.mubr.msk.f32.gmra.mrb[8].mxu1 %vm71_vm1, %v155_v16  ;;  %652 = vmatprep.mubr.f32.mxu0 %v5921_v0  ;;  %v5343_v3 = vld [vmem:[#allocation2 + $0xe0] ss:$16 sps:$4 sm:$0xff]   ;;  %v5345_v4 = vld [vmem:[#allocation2 + $0xe4] ss:$16 sps:$4 sm:$0xff]  }
  0x2b   :  { %401 = vmatprep.mubr.f32.mxu1 %v5921_v0  ;;  %v5346_v5 = vld [vmem:[#allocation2 + $0x100] ss:$16 sps:$4 sm:$0xff]   ;;  %v5348_v6 = vld [vmem:[#allocation2 + $0x104] ss:$16 sps:$4 sm:$0xff]  }
  0x2c   :  { %v5349_v7 = vld [vmem:[#allocation2 + $0x120] ss:$16 sps:$4 sm:$0xff]   ;;  %v5351_v8 = vld [vmem:[#allocation2 + $0x124] ss:$16 sps:$4 sm:$0xff]  }
  0x2d   :  { %4647 = vmatmul.mubr.msk.f32.gmra.mrb[10].mxu0 %vm71_vm1, %v155_v16  ;;  %v5352_v9 = vld [vmem:[#allocation2 + $0x140] ss:$16 sps:$4 sm:$0xff]   ;;  %v5354_v10 = vld [vmem:[#allocation2 + $0x144] ss:$16 sps:$4 sm:$0xff]  }
  0x2e   :  { %4614 = vmatmul.mubr.msk.f32.gmra.mrb[10].mxu1 %vm71_vm1, %v6077_v17  ;;  %658 = vmatprep.mubr.f32.mxu0 %v5921_v0  ;;  %v5357_v11 = vld [vmem:[#allocation2 + $0x164] ss:$16 sps:$4 sm:$0xff]   ;;  %v5355_v12 = vld [vmem:[#allocation2 + $0x160] ss:$16 sps:$4 sm:$0xff]  }
  0x2f   :  { %407 = vmatprep.mubr.f32.mxu1 %v5921_v0  ;;  %v5360_v13 = vld [vmem:[#allocation2 + $0x184] ss:$16 sps:$4 sm:$0xff]   ;;  %v5358_v15 = vld [vmem:[#allocation2 + $0x180] ss:$16 sps:$4 sm:$0xff]  }
  0x30   :  { %v5364_v30 = vld [vmem:[#allocation2 + $0x1c0] ss:$16 sps:$4 sm:$0xff]   ;;  %v5369_v46 = vld [vmem:[#allocation2 + $0x1e4] ss:$16 sps:$4 sm:$0xff]  }
  0x31   :  { %4648 = vmatmul.mubr.msk.f32.gmra.mrb[12].mxu0 %vm71_vm1, %v6077_v17 }
  0x32   :  { %4615 = vmatmul.mubr.msk.f32.gmra.mrb[12].mxu1 %vm71_vm1, %v6086_v18  ;;  %664 = vmatprep.mubr.f32.mxu0 %v5921_v0 }
  0x33   :  { %413 = vmatprep.mubr.f32.mxu1 %v5921_v0 }
  0x35   :  { %4649 = vmatmul.mubr.msk.f32.gmra.mrb[14].mxu0 %vm71_vm1, %v6086_v18 }
  0x36   :  { %4616 = vmatmul.mubr.msk.f32.gmra.mrb[14].mxu1 %vm71_vm1, %v6096_v19  ;;  %670 = vmatprep.mubr.f32.mxu0 %v5921_v0 }
  0x37   :  { %419 = vmatprep.mubr.f32.mxu1 %v5921_v0 }
  0x39   :  { %4650 = vmatmul.mubr.msk.f32.gmra.mrb[16].mxu0 %vm71_vm1, %v6096_v19 }
  0x3a   :  { %4617 = vmatmul.mubr.msk.f32.gmra.mrb[16].mxu1 %vm71_vm1, %v6107_v20  ;;  %676 = vmatprep.mubr.f32.mxu0 %v5921_v0 }
  0x3b   :  { %425 = vmatprep.mubr.f32.mxu1 %v5921_v0 }
  0x3d   :  { %4651 = vmatmul.mubr.msk.f32.gmra.mrb[18].mxu0 %vm71_vm1, %v6107_v20 }
  0x3e   :  { %4618 = vmatmul.mubr.msk.f32.gmra.mrb[18].mxu1 %vm71_vm1, %v6118_v21  ;;  %682 = vmatprep.mubr.f32.mxu0 %v5921_v0 }
  0x3f   :  { %431 = vmatprep.mubr.f32.mxu1 %v5921_v0 }
  0x41   :  { %4652 = vmatmul.mubr.msk.f32.gmra.mrb[20].mxu0 %vm71_vm1, %v6118_v21 }
  0x42   :  { %4619 = vmatmul.mubr.msk.f32.gmra.mrb[20].mxu1 %vm71_vm1, %v6129_v22  ;;  %688 = vmatprep.mubr.f32.mxu0 %v5921_v0 }
  0x43   :  { %437 = vmatprep.mubr.f32.mxu1 %v5921_v0 }
  0x45   :  { %4653 = vmatmul.mubr.msk.f32.gmra.mrb[22].mxu0 %vm71_vm1, %v6129_v22 }
  0x46   :  { %4620 = vmatmul.mubr.msk.f32.gmra.mrb[22].mxu1 %vm71_vm1, %v6140_v23  ;;  %694 = vmatprep.mubr.f32.mxu0 %v5921_v0 }
  0x47   :  { %443 = vmatprep.mubr.f32.mxu1 %v5921_v0 }
  0x49   :  { %4654 = vmatmul.mubr.msk.f32.gmra.mrb[24].mxu0 %vm71_vm1, %v6140_v23 }
  0x4a   :  { %4621 = vmatmul.mubr.msk.f32.gmra.mrb[24].mxu1 %vm71_vm1, %v6151_v24  ;;  %700 = vmatprep.mubr.f32.mxu0 %v5921_v0 }
  0x4b   :  { %449 = vmatprep.mubr.f32.mxu1 %v5921_v0 }
  0x4d   :  { %4655 = vmatmul.mubr.msk.f32.gmra.mrb[26].mxu0 %vm71_vm1, %v6151_v24 }
  0x4e   :  { %4622 = vmatmul.mubr.msk.f32.gmra.mrb[26].mxu1 %vm71_vm1, %v6162_v25  ;;  %706 = vmatprep.mubr.f32.mxu0 %v5921_v0 }
  0x4f   :  { %455 = vmatprep.mubr.f32.mxu1 %v5921_v0 }
  0x51   :  { %4656 = vmatmul.mubr.msk.f32.gmra.mrb[28].mxu0 %vm71_vm1, %v6162_v25 }
  0x52   :  { %4623 = vmatmul.mubr.msk.f32.gmra.mrb[28].mxu1 %vm71_vm1, %v6173_v26  ;;  %712 = vmatprep.mubr.f32.mxu0 %v5921_v0 }
  0x53   :  { %461 = vmatprep.mubr.f32.mxu1 %v5921_v0 }
  0x55   :  { %4657 = vmatmul.mubr.msk.f32.gmra.mrb[30].mxu0 %vm71_vm1, %v6173_v26 }
  0x56   :  { %4624 = vmatmul.mubr.msk.f32.gmra.mrb[30].mxu1 %vm71_vm1, %v6184_v27  ;;  %718 = vmatprep.mubr.f32.mxu0 %v5921_v0 }
  0x57   :  { %467 = vmatprep.mubr.f32.mxu1 %v5921_v0 }
  0x59   :  { %4658 = vmatmul.mubr.msk.f32.gmra.mrb[32].mxu0 %vm71_vm1, %v6184_v27 }
  0x5a   :  { %4625 = vmatmul.mubr.msk.f32.gmra.mrb[32].mxu1 %vm71_vm1, %v6198_v29  ;;  %724 = vmatprep.mubr.f32.mxu0 %v5921_v0 }
  0x5b   :  { %473 = vmatprep.mubr.f32.mxu1 %v5921_v0 }
  0x5d   :  { %4659 = vmatmul.mubr.msk.f32.gmra.mrb[34].mxu0 %vm71_vm1, %v6198_v29 }
  0x5e   :  { %4626 = vmatmul.mubr.msk.f32.gmra.mrb[34].mxu1 %vm71_vm1, %v6210_v31  ;;  %730 = vmatprep.mubr.f32.mxu0 %v5921_v0 }
  0x5f   :  { %479 = vmatprep.mubr.f32.mxu1 %v5921_v0 }
  0x61   :  { %4660 = vmatmul.mubr.msk.f32.gmra.mrb[36].mxu0 %vm71_vm1, %v6210_v31 }
  0x62   :  { %4627 = vmatmul.mubr.msk.f32.gmra.mrb[36].mxu1 %vm71_vm1, %v6222_v32  ;;  %736 = vmatprep.mubr.f32.mxu0 %v5921_v0 }
  0x63   :  { %485 = vmatprep.mubr.f32.mxu1 %v5921_v0 }
  0x65   :  { %4661 = vmatmul.mubr.msk.f32.gmra.mrb[38].mxu0 %vm71_vm1, %v6222_v32 }
  0x66   :  { %4628 = vmatmul.mubr.msk.f32.gmra.mrb[38].mxu1 %vm71_vm1, %v6233_v33  ;;  %742 = vmatprep.mubr.f32.mxu0 %v5921_v0 }
  0x67   :  { %491 = vmatprep.mubr.f32.mxu1 %v5921_v0 }
  0x69   :  { %4662 = vmatmul.mubr.msk.f32.gmra.mrb[40].mxu0 %vm71_vm1, %v6233_v33 }
  0x6a   :  { %4629 = vmatmul.mubr.msk.f32.gmra.mrb[40].mxu1 %vm71_vm1, %v6244_v34  ;;  %748 = vmatprep.mubr.f32.mxu0 %v5921_v0 }
  0x6b   :  { %497 = vmatprep.mubr.f32.mxu1 %v5921_v0 }
  0x6d   :  { %4663 = vmatmul.mubr.msk.f32.gmra.mrb[42].mxu0 %vm71_vm1, %v6244_v34 }
  0x6e   :  { %4630 = vmatmul.mubr.msk.f32.gmra.mrb[42].mxu1 %vm71_vm1, %v6255_v35  ;;  %754 = vmatprep.mubr.f32.mxu0 %v5921_v0 }
  0x6f   :  { %503 = vmatprep.mubr.f32.mxu1 %v5921_v0 }
  0x71   :  { %4664 = vmatmul.mubr.msk.f32.gmra.mrb[44].mxu0 %vm71_vm1, %v6255_v35 }
  0x72   :  { %4631 = vmatmul.mubr.msk.f32.gmra.mrb[44].mxu1 %vm71_vm1, %v6266_v36  ;;  %760 = vmatprep.mubr.f32.mxu0 %v5921_v0 }
  0x73   :  { %509 = vmatprep.mubr.f32.mxu1 %v5921_v0 }
  0x75   :  { %4665 = vmatmul.mubr.msk.f32.gmra.mrb[46].mxu0 %vm71_vm1, %v6266_v36 }
  0x76   :  { %4632 = vmatmul.mubr.msk.f32.gmra.mrb[46].mxu1 %vm71_vm1, %v6277_v37  ;;  %766 = vmatprep.mubr.f32.mxu0 %v5921_v0 }
  0x77   :  { %515 = vmatprep.mubr.f32.mxu1 %v5921_v0 }
  0x79   :  { %4666 = vmatmul.mubr.msk.f32.gmra.mrb[48].mxu0 %vm71_vm1, %v6277_v37 }
  0x7a   :  { %4633 = vmatmul.mubr.msk.f32.gmra.mrb[48].mxu1 %vm71_vm1, %v6288_v38  ;;  %772 = vmatprep.mubr.f32.mxu0 %v5921_v0 }
  0x7b   :  { %521 = vmatprep.mubr.f32.mxu1 %v5921_v0 }
  0x7d   :  { %4667 = vmatmul.mubr.msk.f32.gmra.mrb[50].mxu0 %vm71_vm1, %v6288_v38 }
  0x7e   :  { %4634 = vmatmul.mubr.msk.f32.gmra.mrb[50].mxu1 %vm71_vm1, %v6299_v39  ;;  %778 = vmatprep.mubr.f32.mxu0 %v5921_v0 }
  0x7f   :  { %527 = vmatprep.mubr.f32.mxu1 %v5921_v0 }
  0x81   :  { %4668 = vmatmul.mubr.msk.f32.gmra.mrb[52].mxu0 %vm71_vm1, %v6299_v39 }
  0x82   :  { %4635 = vmatmul.mubr.msk.f32.gmra.mrb[52].mxu1 %vm71_vm1, %v6310_v40  ;;  %784 = vmatprep.mubr.f32.mxu0 %v5921_v0 }
  0x83   :  { %533 = vmatprep.mubr.f32.mxu1 %v5921_v0 }
  0x85   :  { %4669 = vmatmul.mubr.msk.f32.gmra.mrb[54].mxu0 %vm71_vm1, %v6310_v40 }
  0x86   :  { %4636 = vmatmul.mubr.msk.f32.gmra.mrb[54].mxu1 %vm71_vm1, %v6321_v41  ;;  %790 = vmatprep.mubr.f32.mxu0 %v5921_v0 }
  0x87   :  { %539 = vmatprep.mubr.f32.mxu1 %v5921_v0 }
  0x89   :  { %4670 = vmatmul.mubr.msk.f32.gmra.mrb[56].mxu0 %vm71_vm1, %v6321_v41 }
  0x8a   :  { %4637 = vmatmul.mubr.msk.f32.gmra.mrb[56].mxu1 %vm71_vm1, %v6332_v42  ;;  %796 = vmatprep.mubr.f32.mxu0 %v5921_v0 }
  0x8b   :  { %545 = vmatprep.mubr.f32.mxu1 %v5921_v0 }
  0x8d   :  { %4671 = vmatmul.mubr.msk.f32.gmra.mrb[58].mxu0 %vm71_vm1, %v6332_v42 }
  0x8e   :  { %4638 = vmatmul.mubr.msk.f32.gmra.mrb[58].mxu1 %vm71_vm1, %v6343_v43  ;;  %802 = vmatprep.mubr.f32.mxu0 %v5921_v0 }
  0x8f   :  { %551 = vmatprep.mubr.f32.mxu1 %v5921_v0 }
  0x91   :  { %4672 = vmatmul.mubr.msk.f32.gmra.mrb[60].mxu0 %vm71_vm1, %v6343_v43 }
  0x92   :  { %4639 = vmatmul.mubr.msk.f32.gmra.mrb[60].mxu1 %vm71_vm1, %v6354_v44  ;;  %808 = vmatprep.mubr.f32.mxu0 %v5921_v0 }
  0x93   :  { %557 = vmatprep.mubr.f32.mxu1 %v5921_v0 }
  0x95   :  { %4673 = vmatmul.mubr.msk.f32.gmra.mrb[62].mxu0 %vm71_vm1, %v6354_v44 }
  0x96   :  { %4640 = vmatmul.mubr.msk.f32.gmra.mrb[62].mxu1 %vm71_vm1, %v6365_v45  ;;  %814 = vmatprep.mubr.f32.mxu0 %v5921_v0 }
  0x97   :  { %885 = vmatprep.mubr.f32.mxu1 %v5921_v0 }
  0x99   :  { %4674 = vmatmul.mubr.msk.f32.gmra.mrb[64].mxu0 %vm71_vm1, %v6365_v45 }
  0x9a   :  { %4677 = vmatmul.mubr.msk.f32.vlgmr.msra.gmra.mrb[64].mxu1 %vm71_vm1, %v5840_v49  ;;  %1142 = vmatprep.mubr.f32.mxu0 %v5921_v0 }
  0x9b   :  { %891 = vmatprep.mubr.f32.mxu1 %v5921_v0  ;;  %3444 = vmatpush1.bf16.msra.mxu1 %v5322_v47  ;;  %v67_v14 = vpop.permute.xlu0 %66 }
  0x9c   :  { %3445 = vmatprep.subr.bf16.mxu1 %v5327_v48 }
  0x9d   :  { %4711 = vmatmul.mubr.msk.f32.vlgmr.msra.gmra.mrb[66].mxu0 %vm71_vm1, %v5840_v49  ;;  %v5367_v49 = vld [vmem:[#allocation2 + $0x1e0] ss:$16 sps:$4 sm:$0xff]  }
  0x9e   :  { %4678 = vmatmul.mubr.msk.f32.gmra.mrb[66].mxu1 %vm71_vm1, %v5841_v51  ;;  %1148 = vmatprep.mubr.f32.mxu0 %v5921_v0 }
  0x9f   :  { %897 = vmatprep.mubr.f32.mxu1 %v5921_v0  ;;  %3446 = vmatpush1.bf16.msra.mxu1 %v5325_v50 }
  0xa0   :  { %3447 = vmatprep.subr.bf16.mxu1 %v5330_v53 }
  0xa1   :  { %4712 = vmatmul.mubr.msk.f32.gmra.mrb[68].mxu0 %vm71_vm1, %v5841_v51 }
  0xa2   :  { %4679 = vmatmul.mubr.msk.f32.gmra.mrb[68].mxu1 %vm71_vm1, %v5842_v54  ;;  %1154 = vmatprep.mubr.f32.mxu0 %v5921_v0 }
  0xa3   :  { %903 = vmatprep.mubr.f32.mxu1 %v5921_v0  ;;  %3448 = vmatpush1.bf16.msra.mxu1 %v5328_v52 }
  0xa4   :  { %3449 = vmatprep.subr.bf16.mxu1 %v5333_v57 }
  0xa5   :  { %4713 = vmatmul.mubr.msk.f32.gmra.mrb[70].mxu0 %vm71_vm1, %v5842_v54 }
  0xa6   :  { %4680 = vmatmul.mubr.msk.f32.gmra.mrb[70].mxu1 %vm71_vm1, %v5843_v55  ;;  %1160 = vmatprep.mubr.f32.mxu0 %v5921_v0 }
  0xa7   :  { %909 = vmatprep.mubr.f32.mxu1 %v5921_v0  ;;  %3450 = vmatpush1.bf16.msra.mxu1 %v5331_v56 }
  0xa8   :  { %3451 = vmatprep.subr.bf16.mxu1 %v5336_v61 }
  0xa9   :  { %4714 = vmatmul.mubr.msk.f32.gmra.mrb[72].mxu0 %vm71_vm1, %v5843_v55  ;;  %v5372_v55 = vld [vmem:[#allocation2 + $0x204] ss:$16 sps:$4 sm:$0xff]  }
  0xaa   :  { %4681 = vmatmul.mubr.msk.f32.gmra.mrb[72].mxu1 %vm71_vm1, %v5844_v58  ;;  %1166 = vmatprep.mubr.f32.mxu0 %v5921_v0 }
  0xab   :  { %915 = vmatprep.mubr.f32.mxu1 %v5921_v0  ;;  %3452 = vmatpush1.bf16.msra.mxu1 %v5334_v60 }
  0xac   :  { %3453 = vmatprep.subr.bf16.mxu1 %v5339_v62 }
  0xad   :  { %4715 = vmatmul.mubr.msk.f32.gmra.mrb[74].mxu0 %vm71_vm1, %v5844_v58 }
  0xae   :  { %4682 = vmatmul.mubr.msk.f32.gmra.mrb[74].mxu1 %vm71_vm1, %v6077_v17  ;;  %1172 = vmatprep.mubr.f32.mxu0 %v5921_v0 }
  0xaf   :  { %921 = vmatprep.mubr.f32.mxu1 %v5921_v0  ;;  %3454 = vmatpush1.bf16.msra.mxu1 %v5337_v63 }
  0xb0   :  { %3455 = vmatprep.subr.bf16.mxu1 %v5342_v2 }
  0xb1   :  { %4716 = vmatmul.mubr.msk.f32.gmra.mrb[76].mxu0 %vm71_vm1, %v5845_v59 }
  0xb2   :  { %4683 = vmatmul.mubr.msk.f32.gmra.mrb[76].mxu1 %vm71_vm1, %v6086_v18  ;;  %1178 = vmatprep.mubr.f32.mxu0 %v5921_v0 }
  0xb3   :  { %927 = vmatprep.mubr.f32.mxu1 %v5921_v0  ;;  %3456 = vmatpush1.bf16.msra.mxu1 %v5340_v1 }
  0xb4   :  { %3457 = vmatprep.subr.bf16.mxu1 %v5345_v4 }
  0xb5   :  { %4717 = vmatmul.mubr.msk.f32.gmra.mrb[78].mxu0 %vm71_vm1, %v6086_v18 }
  0xb6   :  { %4684 = vmatmul.mubr.msk.f32.gmra.mrb[78].mxu1 %vm71_vm1, %v6096_v19  ;;  %1184 = vmatprep.mubr.f32.mxu0 %v5921_v0 }
  0xb7   :  { %933 = vmatprep.mubr.f32.mxu1 %v5921_v0  ;;  %3458 = vmatpush1.bf16.msra.mxu1 %v5343_v3 }
  0xb8   :  { %3459 = vmatprep.subr.bf16.mxu1 %v5348_v6 }
  0xb9   :  { %4718 = vmatmul.mubr.msk.f32.gmra.mrb[80].mxu0 %vm71_vm1, %v6096_v19 }
  0xba   :  { %4685 = vmatmul.mubr.msk.f32.gmra.mrb[80].mxu1 %vm71_vm1, %v6107_v20  ;;  %1190 = vmatprep.mubr.f32.mxu0 %v5921_v0 }
  0xbb   :  { %939 = vmatprep.mubr.f32.mxu1 %v5921_v0  ;;  %3460 = vmatpush1.bf16.msra.mxu1 %v5346_v5 }
  0xbc   :  { %3461 = vmatprep.subr.bf16.mxu1 %v5351_v8 }
  0xbd   :  { %4719 = vmatmul.mubr.msk.f32.gmra.mrb[82].mxu0 %vm71_vm1, %v6107_v20 }
  0xbe   :  { %4686 = vmatmul.mubr.msk.f32.gmra.mrb[82].mxu1 %vm71_vm1, %v6118_v21  ;;  %1196 = vmatprep.mubr.f32.mxu0 %v5921_v0 }
  0xbf   :  { %945 = vmatprep.mubr.f32.mxu1 %v5921_v0  ;;  %3462 = vmatpush1.bf16.msra.mxu1 %v5349_v7 }
  0xc0   :  { %3463 = vmatprep.subr.bf16.mxu1 %v5354_v10 }
  0xc1   :  { %4720 = vmatmul.mubr.msk.f32.gmra.mrb[84].mxu0 %vm71_vm1, %v6118_v21  ;;  %v5363_v21 = vld [vmem:[#allocation2 + $0x1a4] ss:$16 sps:$4 sm:$0xff]  }
  0xc2   :  { %4687 = vmatmul.mubr.msk.f32.gmra.mrb[84].mxu1 %vm71_vm1, %v6129_v22  ;;  %1202 = vmatprep.mubr.f32.mxu0 %v5921_v0 }
  0xc3   :  { %951 = vmatprep.mubr.f32.mxu1 %v5921_v0  ;;  %3464 = vmatpush1.bf16.msra.mxu1 %v5352_v9 }
  0xc4   :  { %3465 = vmatprep.subr.bf16.mxu1 %v5357_v11 }
  0xc5   :  { %4721 = vmatmul.mubr.msk.f32.gmra.mrb[86].mxu0 %vm71_vm1, %v6129_v22 }
  0xc6   :  { %4688 = vmatmul.mubr.msk.f32.gmra.mrb[86].mxu1 %vm71_vm1, %v6140_v23  ;;  %1208 = vmatprep.mubr.f32.mxu0 %v5921_v0 }
  0xc7   :  { %957 = vmatprep.mubr.f32.mxu1 %v5921_v0  ;;  %3466 = vmatpush1.bf16.msra.mxu1 %v5355_v12 }
  0xc8   :  { %3467 = vmatprep.subr.bf16.mxu1 %v5360_v13 }
  0xc9   :  { %4722 = vmatmul.mubr.msk.f32.gmra.mrb[88].mxu0 %vm71_vm1, %v6140_v23  ;;  %v5361_v23 = vld [vmem:[#allocation2 + $0x1a0] ss:$16 sps:$4 sm:$0xff]  }
  0xca   :  { %4689 = vmatmul.mubr.msk.f32.gmra.mrb[88].mxu1 %vm71_vm1, %v6151_v24  ;;  %1214 = vmatprep.mubr.f32.mxu0 %v5921_v0 }
  0xcb   :  { %963 = vmatprep.mubr.f32.mxu1 %v5921_v0  ;;  %3468 = vmatpush1.bf16.msra.mxu1 %v5358_v15 }
  0xcc   :  { %3469 = vmatprep.subr.bf16.mxu1 %v5363_v21 }
  0xcd   :  { %4723 = vmatmul.mubr.msk.f32.gmra.mrb[90].mxu0 %vm71_vm1, %v6151_v24 }
  0xce   :  { %4690 = vmatmul.mubr.msk.f32.gmra.mrb[90].mxu1 %vm71_vm1, %v6162_v25  ;;  %1220 = vmatprep.mubr.f32.mxu0 %v5921_v0 }
  0xcf   :  { %969 = vmatprep.mubr.f32.mxu1 %v5921_v0  ;;  %3470 = vmatpush1.bf16.msra.mxu1 %v5361_v23 }
  0xd1   :  { %4724 = vmatmul.mubr.msk.f32.gmra.mrb[92].mxu0 %vm71_vm1, %v6162_v25 }
  0xd2   :  { %4691 = vmatmul.mubr.msk.f32.gmra.mrb[92].mxu1 %vm71_vm1, %v6173_v26  ;;  %1226 = vmatprep.mubr.f32.mxu0 %v5921_v0 }
  0xd3   :  { %975 = vmatprep.mubr.f32.mxu1 %v5921_v0 }
  0xd5   :  { %4725 = vmatmul.mubr.msk.f32.gmra.mrb[94].mxu0 %vm71_vm1, %v6173_v26 }
  0xd6   :  { %4692 = vmatmul.mubr.msk.f32.gmra.mrb[94].mxu1 %vm71_vm1, %v6184_v27  ;;  %1232 = vmatprep.mubr.f32.mxu0 %v5921_v0 }
  0xd7   :  { %981 = vmatprep.mubr.f32.mxu1 %v5921_v0 }
  0xd9   :  { %4726 = vmatmul.mubr.msk.f32.gmra.mrb[96].mxu0 %vm71_vm1, %v6184_v27  ;;  %v5366_v27 = vld [vmem:[#allocation2 + $0x1c4] ss:$16 sps:$4 sm:$0xff]  }
  0xda   :  { %4693 = vmatmul.mubr.msk.f32.gmra.mrb[96].mxu1 %vm71_vm1, %v6198_v29  ;;  %1238 = vmatprep.mubr.f32.mxu0 %v5921_v0 }
  0xdb   :  { %987 = vmatprep.mubr.f32.mxu1 %v5921_v0  ;;  %3471 = vmatprep.subr.bf16.mxu1 %v5366_v27 }
  0xdc   :  { %3472 = vmatpush1.bf16.msra.mxu1 %v5364_v30 }
  0xdd   :  { %4727 = vmatmul.mubr.msk.f32.gmra.mrb[98].mxu0 %vm71_vm1, %v6198_v29  ;;  %3473 = vmatprep.subr.bf16.mxu1 %v5369_v46 }
  0xde   :  { %4694 = vmatmul.mubr.msk.f32.gmra.mrb[98].mxu1 %vm71_vm1, %v6210_v31  ;;  %1244 = vmatprep.mubr.f32.mxu0 %v5921_v0 }
  0xdf   :  { %993 = vmatprep.mubr.f32.mxu1 %v5921_v0 }
  0xe0   :  { %3474 = vmatpush1.bf16.msra.mxu1 %v5367_v49 }
  0xe1   :  { %4728 = vmatmul.mubr.msk.f32.gmra.mrb[100].mxu0 %vm71_vm1, %v6210_v31  ;;  %3484 = vmatprep.subr.bf16.mxu1 %v5372_v55 }
  0xe2   :  { %4695 = vmatmul.mubr.msk.f32.gmra.mrb[100].mxu1 %vm71_vm1, %v6222_v32  ;;  %1250 = vmatprep.mubr.f32.mxu0 %v5921_v0 }
  0xe3   :  { %999 = vmatprep.mubr.f32.mxu1 %v5921_v0 }
  0xe5   :  { %4729 = vmatmul.mubr.msk.f32.gmra.mrb[102].mxu0 %vm71_vm1, %v6222_v32 }
  0xe6   :  { %4696 = vmatmul.mubr.msk.f32.gmra.mrb[102].mxu1 %vm71_vm1, %v6233_v33  ;;  %1256 = vmatprep.mubr.f32.mxu0 %v5921_v0 }
  0xe7   :  { %1005 = vmatprep.mubr.f32.mxu1 %v5921_v0 }
  0xe9   :  { %4730 = vmatmul.mubr.msk.f32.gmra.mrb[104].mxu0 %vm71_vm1, %v6233_v33 }
  0xea   :  { %4697 = vmatmul.mubr.msk.f32.gmra.mrb[104].mxu1 %vm71_vm1, %v6244_v34  ;;  %1262 = vmatprep.mubr.f32.mxu0 %v5921_v0 }
  0xeb   :  { %1011 = vmatprep.mubr.f32.mxu1 %v5921_v0 }
  0xec   :  { %v146_v16 = vpop.f32.mrb[0].mxu0 }
  0xed   :  { %v373_v17 = vpop.f32.mrb[0].mxu1  ;;  %v6513_v18 = vadd.f32 %v146_v16, %v67_v14  ;;  %v148_v19 = vpop.f32.mrb[1].mxu0  ;;  %4731 = vmatmul.mubr.msk.f32.gmra.mrb[106].mxu0 %vm71_vm1, %v6244_v34 }
  0xee   :  { %4698 = vmatmul.mubr.msk.f32.gmra.mrb[106].mxu1 %vm71_vm1, %v6255_v35  ;;  %v375_v20 = vpop.f32.mrb[1].mxu1  ;;  %v6517_v22 = vadd.f32 %v148_v19, %v67_v14  ;;  %1268 = vmatprep.mubr.f32.mxu0 %v5921_v0 }
  0xef   :  { %1017 = vmatprep.mubr.f32.mxu1 %v5921_v0  ;;  %1335 = vmax.xlane.f32.xlu0 %v6513_v18 }
  0xf0   :  { %1600 = vmax.xlane.f32.xlu1 %v6517_v22  ;;  %v630_v29 = vpop.f32.mrb[2].mxu0 }
  0xf1   :  { %v379_v24 = vpop.f32.mrb[2].mxu1  ;;  %4732 = vmatmul.mubr.msk.f32.gmra.mrb[108].mxu0 %vm71_vm1, %v6255_v35  ;;  %v632_v31 = vpop.f32.mrb[3].mxu0 }
  0xf2   :  { %4699 = vmatmul.mubr.msk.f32.gmra.mrb[108].mxu1 %vm71_vm1, %v6266_v36  ;;  %v1432_v25 = vmax.f32 %v373_v17, %v379_v24  ;;  %v381_v26 = vpop.f32.mrb[3].mxu1  ;;  %1274 = vmatprep.mubr.f32.mxu0 %v5921_v0 }
  0xf3   :  { %1023 = vmatprep.mubr.f32.mxu1 %v5921_v0  ;;  %v1453_v28 = vmax.f32 %v375_v20, %v381_v26 }
  0xf4   :  { %v636_v48 = vpop.f32.mrb[4].mxu0 }
  0xf5   :  { %v385_v32 = vpop.f32.mrb[4].mxu1  ;;  %4733 = vmatmul.mubr.msk.f32.gmra.mrb[110].mxu0 %vm71_vm1, %v6266_v36  ;;  %v638_v35 = vpop.f32.mrb[5].mxu0  ;;  %v1474_v51 = vmax.f32 %v630_v29, %v636_v48 }
  0xf6   :  { %4700 = vmatmul.mubr.msk.f32.gmra.mrb[110].mxu1 %vm71_vm1, %v6277_v37  ;;  %v1433_v33 = vmax.f32 %v1432_v25, %v385_v32  ;;  %v387_v34 = vpop.f32.mrb[5].mxu1  ;;  %1280 = vmatprep.mubr.f32.mxu0 %v5921_v0  ;;  %v1495_v52 = vmax.f32 %v632_v31, %v638_v35 }
  0xf7   :  { %1029 = vmatprep.mubr.f32.mxu1 %v5921_v0  ;;  %v1454_v47 = vmax.f32 %v1453_v28, %v387_v34 }
  0xf8   :  { %v642_v57 = vpop.f32.mrb[6].mxu0 }
  0xf9   :  { %v391_v50 = vpop.f32.mrb[6].mxu1  ;;  %4734 = vmatmul.mubr.msk.f32.gmra.mrb[112].mxu0 %vm71_vm1, %v6277_v37  ;;  %v1475_v36 = vmax.f32 %v1474_v51, %v642_v57  ;;  %v644_v58 = vpop.f32.mrb[7].mxu0 }
  0xfa   :  { %4701 = vmatmul.mubr.msk.f32.gmra.mrb[112].mxu1 %vm71_vm1, %v6288_v38  ;;  %v1434_v53 = vmax.f32 %v1433_v33, %v391_v50  ;;  %v393_v54 = vpop.f32.mrb[7].mxu1  ;;  %1286 = vmatprep.mubr.f32.mxu0 %v5921_v0  ;;  %v1496_v60 = vmax.f32 %v1495_v52, %v644_v58 }
  0xfb   :  { %1035 = vmatprep.mubr.f32.mxu1 %v5921_v0  ;;  %v1455_v56 = vmax.f32 %v1454_v47, %v393_v54 }
  0xfc   :  { %v648_v1 = vpop.f32.mrb[8].mxu0 }
  0xfd   :  { %v397_v59 = vpop.f32.mrb[8].mxu1  ;;  %4735 = vmatmul.mubr.msk.f32.gmra.mrb[114].mxu0 %vm71_vm1, %v6288_v38  ;;  %v1476_v37 = vmax.f32 %v1475_v36, %v648_v1  ;;  %v650_v2 = vpop.f32.mrb[9].mxu0 }
  0xfe   :  { %4702 = vmatmul.mubr.msk.f32.gmra.mrb[114].mxu1 %vm71_vm1, %v6299_v39  ;;  %v1435_v61 = vmax.f32 %v1434_v53, %v397_v59  ;;  %v399_v62 = vpop.f32.mrb[9].mxu1  ;;  %1292 = vmatprep.mubr.f32.mxu0 %v5921_v0  ;;  %v1497_v4 = vmax.f32 %v1496_v60, %v650_v2 }
  0xff   :  { %1041 = vmatprep.mubr.f32.mxu1 %v5921_v0  ;;  %v1456_v63 = vmax.f32 %v1455_v56, %v399_v62 }
 0x100   :  { %v654_v8 = vpop.f32.mrb[10].mxu0 }
 0x101   :  { %v403_v3 = vpop.f32.mrb[10].mxu1  ;;  %4736 = vmatmul.mubr.msk.f32.gmra.mrb[116].mxu0 %vm71_vm1, %v6299_v39  ;;  %v1477_v9 = vmax.f32 %v1476_v37, %v654_v8  ;;  %v656_v38 = vpop.f32.mrb[11].mxu0 }
 0x102   :  { %4703 = vmatmul.mubr.msk.f32.gmra.mrb[116].mxu1 %vm71_vm1, %v6310_v40  ;;  %v1436_v5 = vmax.f32 %v1435_v61, %v403_v3  ;;  %v405_v6 = vpop.f32.mrb[11].mxu1  ;;  %1298 = vmatprep.mubr.f32.mxu0 %v5921_v0  ;;  %v1498_v11 = vmax.f32 %v1497_v4, %v656_v38 }
 0x103   :  { %1047 = vmatprep.mubr.f32.mxu1 %v5921_v0  ;;  %v1457_v7 = vmax.f32 %v1456_v63, %v405_v6 }
 0x104   :  { %v660_v15 = vpop.f32.mrb[12].mxu0 }
 0x105   :  { %v409_v10 = vpop.f32.mrb[12].mxu1  ;;  %4737 = vmatmul.mubr.msk.f32.gmra.mrb[118].mxu0 %vm71_vm1, %v6310_v40  ;;  %v1478_v16 = vmax.f32 %v1477_v9, %v660_v15  ;;  %v662_v39 = vpop.f32.mrb[13].mxu0 }
 0x106   :  { %4704 = vmatmul.mubr.msk.f32.gmra.mrb[118].mxu1 %vm71_vm1, %v6321_v41  ;;  %v1437_v12 = vmax.f32 %v1436_v5, %v409_v10  ;;  %v411_v13 = vpop.f32.mrb[13].mxu1  ;;  %1304 = vmatprep.mubr.f32.mxu0 %v5921_v0  ;;  %v1499_v19 = vmax.f32 %v1498_v11, %v662_v39  ;;  %v1345_v39 = vld [vmem:[%s7105_s2] sm:$0xff] }
 0x107   :  { %1053 = vmatprep.mubr.f32.mxu1 %v5921_v0  ;;  %v1458_v14 = vmax.f32 %v1457_v7, %v411_v13 }
 0x108   :  { %v666_v24 = vpop.f32.mrb[14].mxu0 }
 0x109   :  { %v415_v17 = vpop.f32.mrb[14].mxu1  ;;  %4738 = vmatmul.mubr.msk.f32.gmra.mrb[120].mxu0 %vm71_vm1, %v6321_v41  ;;  %v1479_v25 = vmax.f32 %v1478_v16, %v666_v24  ;;  %v668_v40 = vpop.f32.mrb[15].mxu0 }
 0x10a   :  { %4705 = vmatmul.mubr.msk.f32.gmra.mrb[120].mxu1 %vm71_vm1, %v6332_v42  ;;  %v1438_v20 = vmax.f32 %v1437_v12, %v415_v17  ;;  %v417_v21 = vpop.f32.mrb[15].mxu1  ;;  %1310 = vmatprep.mubr.f32.mxu0 %v5921_v0  ;;  %v1500_v27 = vmax.f32 %v1499_v19, %v668_v40  ;;  %v1346_v17 = vld [vmem:[%s7105_s2 + $0x8] sm:$0xff] }
 0x10b   :  { %1059 = vmatprep.mubr.f32.mxu1 %v5921_v0  ;;  %v1459_v23 = vmax.f32 %v1458_v14, %v417_v21  ;;  %v5923_v21 = vmov 0.0|0.0  }
 0x10c   :  { %v672_v31 = vpop.f32.mrb[16].mxu0  ;;  %5223 = vmatprep.subr.bf16.mxu0 %v5923_v21 }
 0x10d   :  { %v421_v26 = vpop.f32.mrb[16].mxu1  ;;  %4739 = vmatmul.mubr.msk.f32.gmra.mrb[122].mxu0 %vm71_vm1, %v6332_v42  ;;  %v1480_v32 = vmax.f32 %v1479_v25, %v672_v31  ;;  %v674_v41 = vpop.f32.mrb[17].mxu0 }
 0x10e   :  { %4706 = vmatmul.mubr.msk.f32.gmra.mrb[122].mxu1 %vm71_vm1, %v6343_v43  ;;  %v1439_v28 = vmax.f32 %v1438_v20, %v421_v26  ;;  %v423_v29 = vpop.f32.mrb[17].mxu1  ;;  %1316 = vmatprep.mubr.f32.mxu0 %v5921_v0  ;;  %v1501_v34 = vmax.f32 %v1500_v27, %v674_v41 }
 0x10f   :  { %1065 = vmatprep.mubr.f32.mxu1 %v5921_v0  ;;  %v1460_v30 = vmax.f32 %v1459_v23, %v423_v29  ;;  %v5224_v23 = vpack.c.bf16 %v1346_v17, %v1345_v39 }
 0x110   :  { %v678_v49 = vpop.f32.mrb[18].mxu0 }
 0x111   :  { %v427_v33 = vpop.f32.mrb[18].mxu1  ;;  %4740 = vmatmul.mubr.msk.f32.gmra.mrb[124].mxu0 %vm71_vm1, %v6343_v43  ;;  %v1481_v35 = vmax.f32 %v1480_v32, %v678_v49  ;;  %v680_v42 = vpop.f32.mrb[19].mxu0 }
 0x112   :  { %4707 = vmatmul.mubr.msk.f32.gmra.mrb[124].mxu1 %vm71_vm1, %v6354_v44  ;;  %v1440_v46 = vmax.f32 %v1439_v28, %v427_v33  ;;  %v429_v47 = vpop.f32.mrb[19].mxu1  ;;  %1322 = vmatprep.mubr.f32.mxu0 %v5921_v0  ;;  %v1502_v51 = vmax.f32 %v1501_v34, %v680_v42 }
 0x113   :  { %1071 = vmatprep.mubr.f32.mxu1 %v5921_v0  ;;  %v1461_v48 = vmax.f32 %v1460_v30, %v429_v47  ;;  %5225 = vmatpush3.bf16.msra.mxu0 %v5224_v23 }
 0x114   :  { %v684_v55 = vpop.f32.mrb[20].mxu0  ;;  %5226 = vmatprep.subr.bf16.mxu0 %v5923_v21 }
 0x115   :  { %v433_v50 = vpop.f32.mrb[20].mxu1  ;;  %4741 = vmatmul.mubr.msk.f32.gmra.mrb[126].mxu0 %vm71_vm1, %v6354_v44  ;;  %v1482_v56 = vmax.f32 %v1481_v35, %v684_v55  ;;  %v686_v57 = vpop.f32.mrb[21].mxu0 }
 0x116   :  { %4708 = vmatmul.mubr.msk.f32.gmra.mrb[126].mxu1 %vm71_vm1, %v6365_v45  ;;  %v1441_v52 = vmax.f32 %v1440_v46, %v433_v50  ;;  %v435_v53 = vpop.f32.mrb[21].mxu1  ;;  %1328 = vmatprep.mubr.f32.mxu0 %v5921_v0  ;;  %v1503_v43 = vmax.f32 %v1502_v51, %v686_v57  ;;  %v1347_v57 = vld [vmem:[%s7105_s2 + $0x10] sm:$0xff] }
 0x117   :  { %v1462_v54 = vmax.f32 %v1461_v48, %v435_v53 }
 0x118   :  { %v690_v61 = vpop.f32.mrb[22].mxu0 }
 0x119   :  { %v439_v36 = vpop.f32.mrb[22].mxu1  ;;  %4742 = vmatmul.mubr.msk.f32.gmra.mrb[128].mxu0 %vm71_vm1, %v6365_v45  ;;  %v1483_v62 = vmax.f32 %v1482_v56, %v690_v61  ;;  %v692_v63 = vpop.f32.mrb[23].mxu0 }
 0x11a   :  { %v1442_v58 = vmax.f32 %v1441_v52, %v439_v36  ;;  %v441_v59 = vpop.f32.mrb[23].mxu1  ;;  %v1504_v37 = vmax.f32 %v1503_v43, %v692_v63  ;;  %v1348_v36 = vld [vmem:[%s7105_s2 + $0x18] sm:$0xff]  ;;  %5185 = vmatprep.mubr.msk.f32.mxu0 %vm5924_vm3, %v5921_v0 }
 0x11b   :  { %v1463_v60 = vmax.f32 %v1462_v54, %v441_v59  ;;  %v5227_v59 = vpack.c.bf16 %v1348_v36, %v1347_v57 }
 0x11c   :  { %v696_v4 = vpop.f32.mrb[24].mxu0 }
 0x11d   :  { %v445_v1 = vpop.f32.mrb[24].mxu1  ;;  %v1484_v5 = vmax.f32 %v1483_v62, %v696_v4  ;;  %v698_v6 = vpop.f32.mrb[25].mxu0  ;;  %5228 = vmatpush3.bf16.msra.mxu0 %v5227_v59 }
 0x11e   :  { %v1443_v2 = vmax.f32 %v1442_v58, %v445_v1  ;;  %v447_v3 = vpop.f32.mrb[25].mxu1  ;;  %v1505_v8 = vmax.f32 %v1504_v37, %v698_v6  ;;  %5229 = vmatprep.subr.bf16.mxu0 %v5923_v21 }
 0x11f   :  { %v1464_v44 = vmax.f32 %v1463_v60, %v447_v3 }
 0x120   :  { %v702_v11 = vpop.f32.mrb[26].mxu0 }
 0x121   :  { %v451_v7 = vpop.f32.mrb[26].mxu1  ;;  %v1485_v12 = vmax.f32 %v1484_v5, %v702_v11  ;;  %v704_v13 = vpop.f32.mrb[27].mxu0 }
 0x122   :  { %v1444_v9 = vmax.f32 %v1443_v2, %v451_v7  ;;  %v453_v38 = vpop.f32.mrb[27].mxu1  ;;  %v1506_v45 = vmax.f32 %v1505_v8, %v704_v13 }
 0x123   :  { %v1465_v10 = vmax.f32 %v1464_v44, %v453_v38 }
 0x124   :  { %v708_v20 = vpop.f32.mrb[28].mxu0 }
 0x125   :  { %v457_v14 = vpop.f32.mrb[28].mxu1  ;;  %v1486_v24 = vmax.f32 %v1485_v12, %v708_v20  ;;  %v710_v25 = vpop.f32.mrb[29].mxu0 }
 0x126   :  { %v1445_v15 = vmax.f32 %v1444_v9, %v457_v14  ;;  %v459_v16 = vpop.f32.mrb[29].mxu1  ;;  %v1507_v26 = vmax.f32 %v1506_v45, %v710_v25  ;;  %v1349_v25 = vld [vmem:[%s7105_s2 + $0x20] sm:$0xff] }
 0x127   :  { %v1466_v19 = vmax.f32 %v1465_v10, %v459_v16 }
 0x128   :  { %v714_v30 = vpop.f32.mrb[30].mxu0 }
 0x129   :  { %v463_v40 = vpop.f32.mrb[30].mxu1  ;;  %v1487_v31 = vmax.f32 %v1486_v24, %v714_v30  ;;  %v716_v32 = vpop.f32.mrb[31].mxu0 }
 0x12a   :  { %v6593_v27 = vmax.f32 %v1445_v15, %v463_v40  ;;  %v465_v28 = vpop.f32.mrb[31].mxu1  ;;  %v1508_v33 = vmax.f32 %v1507_v26, %v716_v32  ;;  %v1350_v40 = vld [vmem:[%s7105_s2 + $0x28] sm:$0xff] }
 0x12b   :  { %v6596_v29 = vmax.f32 %v1466_v19, %v465_v28  ;;  %v5230_v30 = vpack.c.bf16 %v1350_v40, %v1349_v25 }
 0x12c   :  { %v720_v46 = vpop.f32.mrb[32].mxu0  ;;  %v1447_v25 = vrot.slane %v6593_v27, 4 }
 0x12d   :  { %v469_v41 = vpop.f32.mrb[32].mxu1  ;;  %v6598_v47 = vmax.f32 %v1487_v31, %v720_v46  ;;  %v722_v48 = vpop.f32.mrb[33].mxu0  ;;  %5231 = vmatpush3.bf16.msra.mxu0 %v5230_v30 }
 0x12e   :  { %v471_v34 = vpop.f32.mrb[33].mxu1  ;;  %v6600_v35 = vmax.f32 %v1508_v33, %v722_v48  ;;  %5232 = vmatprep.subr.bf16.mxu0 %v5923_v21 }
 0x130   :  { %v726_v52 = vpop.f32.mrb[34].mxu0 }
 0x131   :  { %v475_v49 = vpop.f32.mrb[34].mxu1  ;;  %v728_v53 = vpop.f32.mrb[35].mxu0 }
 0x132   :  { %v1700_v42 = vmax.f32 %v469_v41, %v475_v49  ;;  %v477_v50 = vpop.f32.mrb[35].mxu1 }
 0x133   :  { %v1721_v51 = vmax.f32 %v471_v34, %v477_v50 }
 0x134   :  { %v732_v58 = vpop.f32.mrb[36].mxu0 }
 0x135   :  { %v481_v54 = vpop.f32.mrb[36].mxu1  ;;  %v1742_v60 = vmax.f32 %v726_v52, %v732_v58  ;;  %v734_v61 = vpop.f32.mrb[37].mxu0 }
 0x136   :  { %v1701_v55 = vmax.f32 %v1700_v42, %v481_v54  ;;  %v483_v56 = vpop.f32.mrb[37].mxu1  ;;  %v1763_v63 = vmax.f32 %v728_v53, %v734_v61 }
 0x137   :  { %v1722_v43 = vmax.f32 %v1721_v51, %v483_v56 }
 0x138   :  { %v738_v3 = vpop.f32.mrb[38].mxu0 }
 0x139   :  { %v487_v62 = vpop.f32.mrb[38].mxu1  ;;  %v1743_v44 = vmax.f32 %v1742_v60, %v738_v3  ;;  %v740_v4 = vpop.f32.mrb[39].mxu0 }
 0x13a   :  { %v1702_v1 = vmax.f32 %v1701_v55, %v487_v62  ;;  %v489_v37 = vpop.f32.mrb[39].mxu1  ;;  %v1764_v6 = vmax.f32 %v1763_v63, %v740_v4  ;;  %v1351_v4 = vld [vmem:[%s7105_s2 + $0x30] sm:$0xff] }
 0x13b   :  { %v1723_v2 = vmax.f32 %v1722_v43, %v489_v37 }
 0x13c   :  { %v744_v38 = vpop.f32.mrb[40].mxu0 }
 0x13d   :  { %v493_v5 = vpop.f32.mrb[40].mxu1  ;;  %v1744_v10 = vmax.f32 %v1743_v44, %v744_v38  ;;  %v746_v11 = vpop.f32.mrb[41].mxu0 }
 0x13e   :  { %v1703_v7 = vmax.f32 %v1702_v1, %v493_v5  ;;  %v495_v8 = vpop.f32.mrb[41].mxu1  ;;  %v1765_v13 = vmax.f32 %v1764_v6, %v746_v11  ;;  %v1352_v5 = vld [vmem:[%s7105_s2 + $0x38] sm:$0xff] }
 0x13f   :  { %v1724_v9 = vmax.f32 %v1723_v2, %v495_v8  ;;  %v5233_v8 = vpack.c.bf16 %v1352_v5, %v1351_v4 }
 0x140   :  { %v750_v16 = vpop.f32.mrb[42].mxu0 }
 0x141   :  { %v499_v12 = vpop.f32.mrb[42].mxu1  ;;  %v1745_v39 = vmax.f32 %v1744_v10, %v750_v16  ;;  %v752_v17 = vpop.f32.mrb[43].mxu0  ;;  %5234 = vmatpush3.bf16.msra.mxu0 %v5233_v8 }
 0x142   :  { %v1704_v14 = vmax.f32 %v1703_v7, %v499_v12  ;;  %v501_v45 = vpop.f32.mrb[43].mxu1  ;;  %v1766_v20 = vmax.f32 %v1765_v13, %v752_v17  ;;  %5235 = vmatprep.subr.bf16.mxu0 %v5923_v21 }
 0x143   :  { %v1725_v15 = vmax.f32 %v1724_v9, %v501_v45 }
 0x144   :  { %v756_v28 = vpop.f32.mrb[44].mxu0 }
 0x145   :  { %v505_v19 = vpop.f32.mrb[44].mxu1  ;;  %v1746_v31 = vmax.f32 %v1745_v39, %v756_v28  ;;  %v758_v32 = vpop.f32.mrb[45].mxu0  ;;  %v1468_v28 = vrot.slane %v6596_v29, 4 }
 0x146   :  { %v1705_v23 = vmax.f32 %v1704_v14, %v505_v19  ;;  %v507_v24 = vpop.f32.mrb[45].mxu1  ;;  %v1767_v33 = vmax.f32 %v1766_v20, %v758_v32 }
 0x147   :  { %v1726_v26 = vmax.f32 %v1725_v15, %v507_v24 }
 0x148   :  { %v762_v49 = vpop.f32.mrb[46].mxu0 }
 0x149   :  { %v511_v41 = vpop.f32.mrb[46].mxu1  ;;  %v1747_v42 = vmax.f32 %v1746_v31, %v762_v49  ;;  %v764_v50 = vpop.f32.mrb[47].mxu0 }
 0x14a   :  { %v1706_v34 = vmax.f32 %v1705_v23, %v511_v41  ;;  %v513_v46 = vpop.f32.mrb[47].mxu1  ;;  %v1768_v52 = vmax.f32 %v1767_v33, %v764_v50 }
 0x14b   :  { %v1727_v48 = vmax.f32 %v1726_v26, %v513_v46  ;;  %v1448_v46 = vmax.f32 %v6593_v27, %v1447_v25  ;;  %v1354_v27 = vld [vmem:[%s7105_s2 + $0x48] sm:$0xff] }
 0x14c   :  { %v768_v56 = vpop.f32.mrb[48].mxu0 }
 0x14d   :  { %v517_v51 = vpop.f32.mrb[48].mxu1  ;;  %v1748_v57 = vmax.f32 %v1747_v42, %v768_v56  ;;  %v770_v36 = vpop.f32.mrb[49].mxu0  ;;  %v1469_v42 = vmax.f32 %v6596_v29, %v1468_v28  ;;  %v1510_v56 = vrot.slane %v6600_v35, 4 }
 0x14e   :  { %v1707_v53 = vmax.f32 %v1706_v34, %v517_v51  ;;  %v519_v54 = vpop.f32.mrb[49].mxu1  ;;  %v1769_v58 = vmax.f32 %v1768_v52, %v770_v36  ;;  %v1353_v36 = vld [vmem:[%s7105_s2 + $0x40] sm:$0xff] }
 0x14f   :  { %v1728_v55 = vmax.f32 %v1727_v48, %v519_v54  ;;  %v1489_v54 = vrot.slane %v6598_v47, 4 }
 0x150   :  { %v774_v62 = vpop.f32.mrb[50].mxu0 }
 0x151   :  { %v523_v43 = vpop.f32.mrb[50].mxu1  ;;  %v1749_v63 = vmax.f32 %v1748_v57, %v774_v62  ;;  %v776_v1 = vpop.f32.mrb[51].mxu0 }
 0x152   :  { %v1708_v59 = vmax.f32 %v1707_v53, %v523_v43  ;;  %v525_v60 = vpop.f32.mrb[51].mxu1  ;;  %v1770_v2 = vmax.f32 %v1769_v58, %v776_v1  ;;  %v1449_v43 = vrot.slane %v1448_v46, 2 }
 0x153   :  { %v1729_v61 = vmax.f32 %v1728_v55, %v525_v60  ;;  %v1470_v60 = vrot.slane %v1469_v42, 2 }
 0x154   :  { %v780_v7 = vpop.f32.mrb[52].mxu0  ;;  %v1450_v4 = vmax.f32 %v1448_v46, %v1449_v43 }
 0x155   :  { %v529_v37 = vpop.f32.mrb[52].mxu1  ;;  %v1750_v9 = vmax.f32 %v1749_v63, %v780_v7  ;;  %v782_v38 = vpop.f32.mrb[53].mxu0  ;;  %v1471_v8 = vmax.f32 %v1469_v42, %v1470_v60  ;;  %v1356_v60 = vld [vmem:[%s7105_s2 + $0x58] sm:$0xff] }
 0x156   :  { %v1709_v3 = vmax.f32 %v1708_v59, %v529_v37  ;;  %v531_v44 = vpop.f32.mrb[53].mxu1  ;;  %v1771_v11 = vmax.f32 %v1770_v2, %v782_v38  ;;  %v5236_v59 = vpack.c.bf16 %v1354_v27, %v1353_v36  ;;  %v1490_v37 = vmax.f32 %v6598_v47, %v1489_v54 }
 0x157   :  { %v1730_v6 = vmax.f32 %v1729_v61, %v531_v44 }
 0x158   :  { %v786_v45 = vpop.f32.mrb[54].mxu0  ;;  %5237 = vmatpush3.bf16.msra.mxu0 %v5236_v59  ;;  %v1355_v59 = vld [vmem:[%s7105_s2 + $0x50] sm:$0xff] }
 0x159   :  { %v535_v10 = vpop.f32.mrb[54].mxu1  ;;  %v1751_v15 = vmax.f32 %v1750_v9, %v786_v45  ;;  %v788_v16 = vpop.f32.mrb[55].mxu0  ;;  %5238 = vmatprep.subr.bf16.mxu0 %v5923_v21 }
 0x15a   :  { %v1710_v12 = vmax.f32 %v1709_v3, %v535_v10  ;;  %v537_v13 = vpop.f32.mrb[55].mxu1  ;;  %v1772_v17 = vmax.f32 %v1771_v11, %v788_v16  ;;  %v1511_v3 = vmax.f32 %v6600_v35, %v1510_v56 }
 0x15b   :  { %v1731_v14 = vmax.f32 %v1730_v6, %v537_v13 }
 0x15c   :  { %v792_v24 = vpop.f32.mrb[56].mxu0  ;;  %v1512_v47 = vrot.slane %v1511_v3, 2 }
 0x15d   :  { %v541_v39 = vpop.f32.mrb[56].mxu1  ;;  %v1752_v40 = vmax.f32 %v1751_v15, %v792_v24  ;;  %v794_v26 = vpop.f32.mrb[57].mxu0  ;;  %v1451_v15 = vrot.slane %v1450_v4, 1 }
 0x15e   :  { %v1711_v19 = vmax.f32 %v1710_v12, %v541_v39  ;;  %v543_v20 = vpop.f32.mrb[57].mxu1  ;;  %v1773_v31 = vmax.f32 %v1772_v17, %v794_v26  ;;  %v1491_v12 = vrot.slane %v1490_v37, 2  ;;  %v1472_v17 = vrot.slane %v1471_v8, 1 }
 0x15f   :  { %v1732_v23 = vmax.f32 %v1731_v14, %v543_v20 }
 0x160   :  { %v798_v34 = vpop.f32.mrb[58].mxu0  ;;  %v1492_v25 = vmax.f32 %v1490_v37, %v1491_v12  ;;  %v1473_v42 = vmax.f32 %v1471_v8, %v1472_v17  ;;  %v5239_v37 = vpack.c.bf16 %v1356_v60, %v1355_v59  ;;  %v1358_v59 = vld [vmem:[%s7105_s2 + $0x68] sm:$0xff]  ;;  %v5384_v60 = vld [vmem:[#allocation2 + $0x284] ss:$16 sps:$4 sm:$0xff]  }
 0x161   :  { %v547_v30 = vpop.f32.mrb[58].mxu1  ;;  %v1753_v48 = vmax.f32 %v1752_v40, %v798_v34  ;;  %v800_v49 = vpop.f32.mrb[59].mxu0  ;;  %v1452_v34 = vmax.f32 %v1450_v4, %v1451_v15 }
 0x162   :  { %v1712_v32 = vmax.f32 %v1711_v19, %v547_v30  ;;  %v549_v41 = vpop.f32.mrb[59].mxu1  ;;  %v1774_v51 = vmax.f32 %v1773_v31, %v800_v49  ;;  %v1513_v31 = vmax.f32 %v1511_v3, %v1512_v47  ;;  %v1493_v54 = vrot.slane %v1492_v25, 1  ;;  %5240 = vmatpush3.bf16.msra.mxu0 %v5239_v37 }
 0x163   :  { %v1733_v33 = vmax.f32 %v1732_v23, %v549_v41  ;;  %5241 = vmatprep.subr.bf16.mxu0 %v5923_v21 }
 0x164   :  { %v804_v57 = vpop.f32.mrb[60].mxu0  ;;  %v1514_v27 = vrot.slane %v1513_v31, 1  ;;  %v1494_v8 = vmax.f32 %v1492_v25, %v1493_v54 }
 0x165   :  { %v553_v50 = vpop.f32.mrb[60].mxu1  ;;  %v1754_v29 = vmax.f32 %v1753_v48, %v804_v57  ;;  %v806_v58 = vpop.f32.mrb[61].mxu0 }
 0x166   :  { %v1713_v52 = vmax.f32 %v1712_v32, %v553_v50  ;;  %v555_v53 = vpop.f32.mrb[61].mxu1  ;;  %v1775_v62 = vmax.f32 %v1774_v51, %v806_v58  ;;  %v1515_v12 = vmax.f32 %v1513_v31, %v1514_v27  ;;  %v5379_v27 = vld [vmem:[#allocation2 + $0x260] ss:$16 sps:$4 sm:$0xff]  }
 0x167   :  { %v1734_v55 = vmax.f32 %v1733_v33, %v555_v53 }
 0x168   :  { %v810_v44 = vpop.f32.mrb[62].mxu0 }
 0x169   :  { %v559_v61 = vpop.f32.mrb[62].mxu1  ;;  %v1755_v6 = vmax.f32 %v1754_v29, %v810_v44  ;;  %v812_v7 = vpop.f32.mrb[63].mxu0 }
 0x16a   :  { %v1714_v63 = vmax.f32 %v1713_v52, %v559_v61  ;;  %v561_v1 = vpop.f32.mrb[63].mxu1  ;;  %v1776_v38 = vmax.f32 %v1775_v62, %v812_v7  ;;  %v5370_v7 = vld [vmem:[#allocation2 + $0x200] ss:$16 sps:$4 sm:$0xff]  }
 0x16b   :  { %v1735_v2 = vmax.f32 %v1734_v55, %v561_v1 }
 0x16c   :  { %v1715_v5 = vrot.slane %v1714_v63, 4  ;;  %v816_v45 = vpop.f32.mrb[64].mxu0 }
 0x16d   :  { %v1736_v9 = vrot.slane %v1735_v2, 4  ;;  %v887_v10 = vpop.f32.mrb[64].mxu1  ;;  %v1756_v35 = vmax.f32 %v1755_v6, %v816_v45  ;;  %v818_v39 = vpop.f32.mrb[65].mxu0 }
 0x16e   :  { %v1716_v11 = vmax.f32 %v1714_v63, %v1715_v5  ;;  %v889_v13 = vpop.f32.mrb[65].mxu1  ;;  %v1777_v20 = vmax.f32 %v1776_v38, %v818_v39 }
 0x16f   :  { %v1737_v14 = vmax.f32 %v1735_v2, %v1736_v9  ;;  %v1757_v40 = vrot.slane %v1756_v35, 4 }
 0x170   :  { %v1717_v16 = vrot.slane %v1716_v11, 2  ;;  %v1778_v32 = vrot.slane %v1777_v20, 4  ;;  %v1144_v33 = vpop.f32.mrb[66].mxu0 }
 0x171   :  { %v1738_v19 = vrot.slane %v1737_v14, 2  ;;  %v893_v23 = vpop.f32.mrb[66].mxu1  ;;  %v1758_v48 = vmax.f32 %v1756_v35, %v1757_v40  ;;  %v1146_v49 = vpop.f32.mrb[67].mxu0 }
 0x172   :  { %v1718_v24 = vmax.f32 %v1716_v11, %v1717_v16  ;;  %v1516_v26 = vmax.f32 %v887_v10, %v893_v23  ;;  %v895_v28 = vpop.f32.mrb[67].mxu1  ;;  %v1779_v51 = vmax.f32 %v1777_v20, %v1778_v32  ;;  %v5375_v11 = vld [vmem:[#allocation2 + $0x224] ss:$16 sps:$4 sm:$0xff]  }
 0x173   :  { %v1739_v30 = vmax.f32 %v1737_v14, %v1738_v19  ;;  %v1537_v41 = vmax.f32 %v889_v13, %v895_v28  ;;  %v1759_v55 = vrot.slane %v1758_v48, 2 }
 0x174   :  { %v1719_v46 = vrot.slane %v1718_v24, 1  ;;  %v1780_v43 = vrot.slane %v1779_v51, 2  ;;  %v1150_v58 = vpop.f32.mrb[68].mxu0 }
 0x175   :  { %v1740_v50 = vrot.slane %v1739_v30, 1  ;;  %v899_v52 = vpop.f32.mrb[68].mxu1  ;;  %v1760_v62 = vmax.f32 %v1758_v48, %v1759_v55  ;;  %v1558_v63 = vmax.f32 %v1144_v33, %v1150_v58  ;;  %v1152_v1 = vpop.f32.mrb[69].mxu0  ;;  %v1357_v58 = vld [vmem:[%s7105_s2 + $0x60] sm:$0xff] }
 0x176   :  { %v1720_v53 = vmax.f32 %v1718_v24, %v1719_v46  ;;  %v1517_v56 = vmax.f32 %v1516_v26, %v899_v52  ;;  %v901_v57 = vpop.f32.mrb[69].mxu1  ;;  %v1781_v44 = vmax.f32 %v1779_v51, %v1780_v43  ;;  %v1579_v5 = vmax.f32 %v1146_v49, %v1152_v1  ;;  %v5373_v24 = vld [vmem:[#allocation2 + $0x220] ss:$16 sps:$4 sm:$0xff]  }
 0x177   :  { %v1741_v36 = vmax.f32 %v1739_v30, %v1740_v50  ;;  %v1538_v29 = vmax.f32 %v1537_v41, %v901_v57  ;;  %v1761_v9 = vrot.slane %v1760_v62, 1  ;;  %v5378_v30 = vld [vmem:[#allocation2 + $0x244] ss:$16 sps:$4 sm:$0xff]   ;;  %v5376_v50 = vld [vmem:[#allocation2 + $0x240] ss:$16 sps:$4 sm:$0xff]  }
 0x178   :  { %v1869_v61 = vsel %vm1868_vm2, %v1452_v34, %v1720_v53  ;;  %v1782_v13 = vrot.slane %v1781_v44, 1  ;;  %v1156_v47 = vpop.f32.mrb[70].mxu0 }
 0x179   :  { %v6645_v2 = vpack.c.bf16 %v1869_v61, %v1869_v61  ;;  %v1870_v3 = vsel %vm1868_vm2, %v1473_v42, %v1741_v36  ;;  %v905_v4 = vpop.f32.mrb[70].mxu1  ;;  %v1762_v45 = vmax.f32 %v1760_v62, %v1761_v9  ;;  %v1559_v15 = vmax.f32 %v1558_v63, %v1156_v47  ;;  %v1158_v16 = vpop.f32.mrb[71].mxu0  ;;  %v5385_v47 = vld [vmem:[#allocation2 + $0x2a0] ss:$16 sps:$4 sm:$0xff]  }
 0x17a   :  { %v6648_v6 = vpack.c.bf16 %v1870_v3, %v1870_v3  ;;  %v1518_v38 = vmax.f32 %v1517_v56, %v905_v4  ;;  %v907_v10 = vpop.f32.mrb[71].mxu1  ;;  %v1783_v39 = vmax.f32 %v1781_v44, %v1782_v13  ;;  %v1580_v19 = vmax.f32 %v1579_v5, %v1158_v16  ;;  %v5382_v4 = vld [vmem:[#allocation2 + $0x280] ss:$16 sps:$4 sm:$0xff]   ;;  %v5390_v16 = vld [vmem:[#allocation2 + $0x2c4] ss:$16 sps:$4 sm:$0xff]  }
 0x17b   :  { %v1539_v14 = vmax.f32 %v1538_v29, %v907_v10  ;;  %v6655_v26 = vsel %vm1868_vm2, %v1494_v8, %v1762_v45  ;;  %v5242_v63 = vpack.c.bf16 %v1358_v59, %v1357_v58  ;;  %v5387_v8 = vld [vmem:[#allocation2 + $0x2a4] ss:$16 sps:$4 sm:$0xff]  }
 0x17c   :  { %3475 = vmatprep.mubr.bf16.mxu1 %v6648_v6  ;;  %v1336_v35 = vpop.xlane.xlu0 %1335  ;;  %v1872_v32 = vsel %vm1868_vm2, %v1515_v12, %v1783_v39  ;;  %v1162_v41 = vpop.f32.mrb[72].mxu0  ;;  %v5399_v58 = vld [vmem:[#allocation2 + $0x324] ss:$16 sps:$4 sm:$0xff]  }
 0x17d   :  { %3476 = vmatmul.mubr.bf16.vlgmr.msra.gmra.mrb[128].mxu1 %v6645_v2  ;;  %v911_v17 = vpop.f32.mrb[72].mxu1  ;;  %v1337_v20 = vsub.f32 %v6513_v18, %v1336_v35  ;;  %v1601_v23 = vpop.xlane.xlu1 %1600  ;;  %v6659_v34 = vpack.c.bf16 %v1872_v32, %v1872_v32  ;;  %v1560_v46 = vmax.f32 %v1559_v15, %v1162_v41  ;;  %5243 = vmatpush3.bf16.msra.mxu0 %v5242_v63 }
 0x17e   :  { %3485 = vmatpush1.bf16.msra.mxu1 %v5370_v7  ;;  %v1519_v25 = vmax.f32 %v1518_v38, %v911_v17  ;;  %v913_v40 = vpop.f32.mrb[73].mxu1  ;;  %v1602_v28 = vsub.f32 %v6517_v22, %v1601_v23  ;;  %v1164_v18 = vpop.f32.mrb[73].mxu0  ;;  %v5381_v22 = vld [vmem:[#allocation2 + $0x264] ss:$16 sps:$4 sm:$0xff]   ;;  %5244 = vmatprep.subr.bf16.mxu0 %v5923_v21 }
 0x17f   :  { %3486 = vmatprep.subr.bf16.mxu1 %v5375_v11  ;;  %v1540_v31 = vmax.f32 %v1539_v14, %v913_v40  ;;  %v1338_v33 = vmul.f32 1.442695, %v1337_v20  ;;  %v1581_v49 = vmax.f32 %v1580_v19, %v1164_v18  ;;  %3516 = vmatprep.mubr.bf16.mxu1 %v6659_v34 }
 0x180   :  { %v1603_v42 = vmul.f32 1.442695, %v1602_v28  ;;  %v1168_v54 = vpop.f32.mrb[74].mxu0 }
 0x181   :  { %v917_v48 = vpop.f32.mrb[74].mxu1  ;;  %5818 = vpow2.f32 %v1338_v33  ;;  %v1561_v55 = vmax.f32 %v1560_v46, %v1168_v54  ;;  %v1170_v56 = vpop.f32.mrb[75].mxu0 }
 0x182   :  { %3487 = vmatpush1.bf16.msra.mxu1 %v5373_v24  ;;  %v1520_v51 = vmax.f32 %v1519_v25, %v917_v48  ;;  %v919_v52 = vpop.f32.mrb[75].mxu1  ;;  %v1582_v36 = vmax.f32 %v1581_v49, %v1170_v56  ;;  %5820 = vpow2.f32 %v1603_v42  ;;  %v5388_v25 = vld [vmem:[#allocation2 + $0x2c0] ss:$16 sps:$4 sm:$0xff]  }
 0x183   :  { %3488 = vmatprep.subr.bf16.mxu1 %v5378_v30  ;;  %v1541_v53 = vmax.f32 %v1540_v31, %v919_v52  ;;  %v5393_v30 = vld [vmem:[#allocation2 + $0x2e4] ss:$16 sps:$4 sm:$0xff]   ;;  %v5391_v48 = vld [vmem:[#allocation2 + $0x2e0] ss:$16 sps:$4 sm:$0xff]  }
 0x184   :  { %v1174_v62 = vpop.f32.mrb[76].mxu0  ;;  %v5396_v52 = vld [vmem:[#allocation2 + $0x304] ss:$16 sps:$4 sm:$0xff]  }
 0x185   :  { %v923_v57 = vpop.f32.mrb[76].mxu1  ;;  %v1562_v1 = vmax.f32 %v1561_v55, %v1174_v62  ;;  %v1176_v37 = vpop.f32.mrb[77].mxu0 }
 0x186   :  { %3489 = vmatpush1.bf16.msra.mxu1 %v5376_v50  ;;  %v1521_v43 = vmax.f32 %v1520_v51, %v923_v57  ;;  %v925_v29 = vpop.f32.mrb[77].mxu1  ;;  %v1583_v44 = vmax.f32 %v1582_v36, %v1176_v37  ;;  %v1359_v50 = vld [vmem:[%s7105_s2 + $0x70] sm:$0xff]  ;;  %v1360_v51 = vld [vmem:[%s7105_s2 + $0x78] sm:$0xff] }
 0x187   :  { %3490 = vmatprep.subr.bf16.mxu1 %v5381_v22  ;;  %v1542_v61 = vmax.f32 %v1541_v53, %v925_v29  ;;  %v5245_v54 = vpack.c.bf16 %v1360_v51, %v1359_v50  ;;  %v5397_v37 = vld [vmem:[#allocation2 + $0x320] ss:$16 sps:$4 sm:$0xff]  }
 0x188   :  { %v1180_v38 = vpop.f32.mrb[78].mxu0 }
 0x189   :  { %v929_v3 = vpop.f32.mrb[78].mxu1  ;;  %v1563_v11 = vmax.f32 %v1562_v1, %v1180_v38  ;;  %v1182_v12 = vpop.f32.mrb[79].mxu0  ;;  %5246 = vmatpush3.bf16.msra.mxu0 %v5245_v54 }
 0x18a   :  { %3491 = vmatpush1.bf16.msra.mxu1 %v5379_v27  ;;  %v1522_v5 = vmax.f32 %v1521_v43, %v929_v3  ;;  %v931_v7 = vpop.f32.mrb[79].mxu1  ;;  %v1584_v14 = vmax.f32 %v1583_v44, %v1182_v12  ;;  %v5394_v27 = vld [vmem:[#allocation2 + $0x300] ss:$16 sps:$4 sm:$0xff]   ;;  %5247 = vmatprep.subr.bf16.mxu0 %v5923_v21 }
 0x18b   :  { %3492 = vmatprep.subr.bf16.mxu1 %v5384_v60  ;;  %v1543_v9 = vmax.f32 %v1542_v61, %v931_v7  ;;  %v6669_v10 = vpop.eup %5818  ;;  %v5400_v12 = vld [vmem:[#allocation2 + $0x340] ss:$16 sps:$4 sm:$0xff]  }
 0x18c   :  { %1340 = vadd.xlane.f32.xlu1 %v6669_v10  ;;  %v1186_v39 = vpop.f32.mrb[80].mxu0  ;;  %v6672_v17 = vpop.eup %5820 }
 0x18d   :  { %v935_v13 = vpop.f32.mrb[80].mxu1  ;;  %v1564_v19 = vmax.f32 %v1563_v11, %v1186_v39  ;;  %v1188_v20 = vpop.f32.mrb[81].mxu0 }
 0x18e   :  { %3493 = vmatpush1.bf16.msra.mxu1 %v5382_v4  ;;  %v1523_v45 = vmax.f32 %v1522_v5, %v935_v13  ;;  %v937_v15 = vpop.f32.mrb[81].mxu1  ;;  %v1585_v24 = vmax.f32 %v1584_v14, %v1188_v20  ;;  %v5402_v4 = vld [vmem:[#allocation2 + $0x344] ss:$16 sps:$4 sm:$0xff]   ;;  %v5403_v20 = vld [vmem:[#allocation2 + $0x360] ss:$16 sps:$4 sm:$0xff]  }
 0x18f   :  { %3494 = vmatprep.subr.bf16.mxu1 %v5387_v8  ;;  %v1544_v35 = vmax.f32 %v1543_v9, %v937_v15 }
 0x190   :  { %1605 = vadd.xlane.f32.xlu1 %v6672_v17  ;;  %v1192_v32 = vpop.f32.mrb[82].mxu0 }
 0x191   :  { %v941_v23 = vpop.f32.mrb[82].mxu1  ;;  %v1565_v41 = vmax.f32 %v1564_v19, %v1192_v32  ;;  %v1194_v33 = vpop.f32.mrb[83].mxu0 }
 0x192   :  { %3495 = vmatpush1.bf16.msra.mxu1 %v5385_v47  ;;  %v1524_v40 = vmax.f32 %v1523_v45, %v941_v23  ;;  %v943_v28 = vpop.f32.mrb[83].mxu1  ;;  %v1586_v18 = vmax.f32 %v1585_v24, %v1194_v33  ;;  %v5405_v47 = vld [vmem:[#allocation2 + $0x364] ss:$16 sps:$4 sm:$0xff]   ;;  %v5406_v33 = vld [vmem:[#allocation2 + $0x380] ss:$16 sps:$4 sm:$0xff]  }
 0x193   :  { %3496 = vmatprep.subr.bf16.mxu1 %v5390_v16  ;;  %v1545_v31 = vmax.f32 %v1544_v35, %v943_v28 }
 0x194   :  { %v1198_v53 = vpop.f32.mrb[84].mxu0 }
 0x195   :  { %v947_v46 = vpop.f32.mrb[84].mxu1  ;;  %v1566_v55 = vmax.f32 %v1565_v41, %v1198_v53  ;;  %v1200_v56 = vpop.f32.mrb[85].mxu0  ;;  %v5409_v53 = vld [vmem:[#allocation2 + $0x3a0] ss:$16 sps:$4 sm:$0xff]  }
 0x196   :  { %3497 = vmatpush1.bf16.msra.mxu1 %v5388_v25  ;;  %v1525_v49 = vmax.f32 %v1524_v40, %v947_v46  ;;  %v949_v42 = vpop.f32.mrb[85].mxu1  ;;  %v1587_v36 = vmax.f32 %v1586_v18, %v1200_v56  ;;  %v5408_v25 = vld [vmem:[#allocation2 + $0x384] ss:$16 sps:$4 sm:$0xff]  }
 0x197   :  { %3498 = vmatprep.subr.bf16.mxu1 %v5393_v30  ;;  %v1546_v22 = vmax.f32 %v1545_v31, %v949_v42 }
 0x198   :  { %v1204_v60 = vpop.f32.mrb[86].mxu0 }
 0x199   :  { %v953_v57 = vpop.f32.mrb[86].mxu1  ;;  %v1567_v61 = vmax.f32 %v1566_v55, %v1204_v60  ;;  %v1206_v62 = vpop.f32.mrb[87].mxu0  ;;  %v5414_v55 = vld [vmem:[#allocation2 + $0x3c4] ss:$16 sps:$4 sm:$0xff]  }
 0x19a   :  { %3499 = vmatpush1.bf16.msra.mxu1 %v5391_v48  ;;  %v1526_v43 = vmax.f32 %v1525_v49, %v953_v57  ;;  %v955_v29 = vpop.f32.mrb[87].mxu1  ;;  %v1588_v1 = vmax.f32 %v1587_v36, %v1206_v62  ;;  %v5411_v48 = vld [vmem:[#allocation2 + $0x3a4] ss:$16 sps:$4 sm:$0xff]  }
 0x19b   :  { %3500 = vmatprep.subr.bf16.mxu1 %v5396_v52  ;;  %v1547_v59 = vmax.f32 %v1546_v22, %v955_v29  ;;  %v5412_v29 = vld [vmem:[#allocation2 + $0x3c0] ss:$16 sps:$4 sm:$0xff]   ;;  %v5417_v60 = vld [vmem:[#allocation2 + $0x3e4] ss:$16 sps:$4 sm:$0xff]  }
 0x19c   :  { %v1210_v7 = vpop.f32.mrb[88].mxu0 }
 0x19d   :  { %v959_v63 = vpop.f32.mrb[88].mxu1  ;;  %v1568_v8 = vmax.f32 %v1567_v61, %v1210_v7  ;;  %v1212_v9 = vpop.f32.mrb[89].mxu0 }
 0x19e   :  { %3501 = vmatpush1.bf16.msra.mxu1 %v5394_v27  ;;  %v1527_v3 = vmax.f32 %v1526_v43, %v959_v63  ;;  %v961_v44 = vpop.f32.mrb[89].mxu1  ;;  %v1589_v11 = vmax.f32 %v1588_v1, %v1212_v9 }
 0x19f   :  { %3502 = vmatprep.subr.bf16.mxu1 %v5399_v58  ;;  %v1548_v5 = vmax.f32 %v1547_v59, %v961_v44 }
 0x1a0   :  { %v1216_v15 = vpop.f32.mrb[90].mxu0 }
 0x1a1   :  { %v965_v38 = vpop.f32.mrb[90].mxu1  ;;  %v1569_v16 = vmax.f32 %v1568_v8, %v1216_v15  ;;  %v1218_v35 = vpop.f32.mrb[91].mxu0 }
 0x1a2   :  { %3503 = vmatpush1.bf16.msra.mxu1 %v5397_v37  ;;  %v1528_v13 = vmax.f32 %v1527_v3, %v965_v38  ;;  %v967_v14 = vpop.f32.mrb[91].mxu1  ;;  %v1590_v19 = vmax.f32 %v1589_v11, %v1218_v35  ;;  %v5415_v37 = vld [vmem:[#allocation2 + $0x3e0] ss:$16 sps:$4 sm:$0xff]   ;;  %v6694_v38 = vpack.c.bf16 %v6655_v26, %v6655_v26 }
 0x1a3   :  { %3504 = vmatprep.subr.bf16.mxu1 %v5402_v4  ;;  %v1549_v45 = vmax.f32 %v1548_v5, %v967_v14  ;;  %v5420_v4 = vld [vmem:[#allocation2 + $0x404] ss:$16 sps:$4 sm:$0xff]  }
 0x1a4   :  { %v1222_v28 = vpop.f32.mrb[92].mxu0 }
 0x1a5   :  { %v971_v39 = vpop.f32.mrb[92].mxu1  ;;  %v1570_v30 = vmax.f32 %v1569_v16, %v1222_v28  ;;  %v1224_v31 = vpop.f32.mrb[93].mxu0 }
 0x1a6   :  { %3505 = vmatpush1.bf16.msra.mxu1 %v5400_v12  ;;  %v1529_v23 = vmax.f32 %v1528_v13, %v971_v39  ;;  %v973_v24 = vpop.f32.mrb[93].mxu1  ;;  %v1591_v41 = vmax.f32 %v1590_v19, %v1224_v31  ;;  %v5418_v13 = vld [vmem:[#allocation2 + $0x400] ss:$16 sps:$4 sm:$0xff]  }
 0x1a7   :  { %3506 = vmatprep.subr.bf16.mxu1 %v5405_v47  ;;  %v1550_v40 = vmax.f32 %v1549_v45, %v973_v24  ;;  %v5423_v45 = vld [vmem:[#allocation2 + $0x424] ss:$16 sps:$4 sm:$0xff]  }
 0x1a8   :  { %v1228_v42 = vpop.f32.mrb[94].mxu0 }
 0x1a9   :  { %v977_v32 = vpop.f32.mrb[94].mxu1  ;;  %v1571_v50 = vmax.f32 %v1570_v30, %v1228_v42  ;;  %v1230_v51 = vpop.f32.mrb[95].mxu0  ;;  %v5429_v42 = vld [vmem:[#allocation2 + $0x464] ss:$16 sps:$4 sm:$0xff]  }
 0x1aa   :  { %3507 = vmatpush1.bf16.msra.mxu1 %v5403_v20  ;;  %v6684_v46 = vmax.f32 %v1529_v23, %v977_v32  ;;  %v979_v18 = vpop.f32.mrb[95].mxu1  ;;  %v1592_v22 = vmax.f32 %v1591_v41, %v1230_v51  ;;  %v5421_v23 = vld [vmem:[#allocation2 + $0x420] ss:$16 sps:$4 sm:$0xff]  }
 0x1ab   :  { %3508 = vmatprep.subr.bf16.mxu1 %v5408_v25  ;;  %v6686_v49 = vmax.f32 %v1550_v40, %v979_v18  ;;  %v5426_v25 = vld [vmem:[#allocation2 + $0x444] ss:$16 sps:$4 sm:$0xff]  }
 0x1ac   :  { %v1234_v56 = vpop.f32.mrb[96].mxu0 }
 0x1ad   :  { %v983_v52 = vpop.f32.mrb[96].mxu1  ;;  %v6688_v57 = vmax.f32 %v1571_v50, %v1234_v56  ;;  %v1236_v36 = vpop.f32.mrb[97].mxu0 }
 0x1ae   :  { %3509 = vmatpush1.bf16.msra.mxu1 %v5406_v33  ;;  %v985_v54 = vpop.f32.mrb[97].mxu1  ;;  %v6690_v43 = vmax.f32 %v1592_v22, %v1236_v36  ;;  %v5424_v33 = vld [vmem:[#allocation2 + $0x440] ss:$16 sps:$4 sm:$0xff]  }
 0x1af   :  { %3510 = vmatprep.subr.bf16.mxu1 %v5411_v48 }
 0x1b0   :  { %v1240_v62 = vpop.f32.mrb[98].mxu0 }
 0x1b1   :  { %v989_v27 = vpop.f32.mrb[98].mxu1  ;;  %v1242_v63 = vpop.f32.mrb[99].mxu0 }
 0x1b2   :  { %3511 = vmatpush1.bf16.msra.mxu1 %v5409_v53  ;;  %v1784_v58 = vmax.f32 %v983_v52, %v989_v27  ;;  %v991_v59 = vpop.f32.mrb[99].mxu1  ;;  %v5432_v27 = vld [vmem:[#allocation2 + $0x484] ss:$16 sps:$4 sm:$0xff]  }
 0x1b3   :  { %3512 = vmatprep.subr.bf16.mxu1 %v5414_v55  ;;  %v1805_v61 = vmax.f32 %v985_v54, %v991_v59  ;;  %v5427_v55 = vld [vmem:[#allocation2 + $0x460] ss:$16 sps:$4 sm:$0xff]  }
 0x1b4   :  { %v1246_v7 = vpop.f32.mrb[100].mxu0 }
 0x1b5   :  { %v995_v1 = vpop.f32.mrb[100].mxu1  ;;  %v1826_v8 = vmax.f32 %v1240_v62, %v1246_v7  ;;  %v1248_v9 = vpop.f32.mrb[101].mxu0 }
 0x1b6   :  { %3513 = vmatpush1.bf16.msra.mxu1 %v5412_v29  ;;  %v1785_v3 = vmax.f32 %v1784_v58, %v995_v1  ;;  %v997_v44 = vpop.f32.mrb[101].mxu1  ;;  %v1847_v12 = vmax.f32 %v1242_v63, %v1248_v9  ;;  %v5430_v63 = vld [vmem:[#allocation2 + $0x480] ss:$16 sps:$4 sm:$0xff]  }
 0x1b7   :  { %3514 = vmatprep.subr.bf16.mxu1 %v5417_v60  ;;  %v1806_v5 = vmax.f32 %v1805_v61, %v997_v44 }
 0x1b8   :  { %v1252_v16 = vpop.f32.mrb[102].mxu0 }
 0x1b9   :  { %v1001_v11 = vpop.f32.mrb[102].mxu1  ;;  %v1827_v35 = vmax.f32 %v1826_v8, %v1252_v16  ;;  %v1254_v39 = vpop.f32.mrb[103].mxu0 }
 0x1ba   :  { %3515 = vmatpush1.bf16.msra.mxu1 %v5415_v37  ;;  %v1786_v14 = vmax.f32 %v1785_v3, %v1001_v11  ;;  %v1003_v47 = vpop.f32.mrb[103].mxu1  ;;  %v1848_v20 = vmax.f32 %v1847_v12, %v1254_v39  ;;  %v5435_v3 = vld [vmem:[#allocation2 + $0x4a4] ss:$16 sps:$4 sm:$0xff]   ;;  %v5433_v11 = vld [vmem:[#allocation2 + $0x4a0] ss:$16 sps:$4 sm:$0xff]  }
 0x1bb   :  { %3525 = vmatprep.subr.bf16.mxu1 %v5420_v4  ;;  %v1807_v15 = vmax.f32 %v1806_v5, %v1003_v47 }
 0x1bc   :  { %v1258_v28 = vpop.f32.mrb[104].mxu0 }
 0x1bd   :  { %3517 = vmatmul.mubr.bf16.vlgmr.msra.gmra.mrb[128].mxu1 %v6694_v38  ;;  %v1007_v19 = vpop.f32.mrb[104].mxu1  ;;  %v1828_v30 = vmax.f32 %v1827_v35, %v1258_v28  ;;  %v1260_v31 = vpop.f32.mrb[105].mxu0 }
 0x1be   :  { %3526 = vmatpush1.bf16.msra.mxu1 %v5418_v13  ;;  %v1787_v26 = vmax.f32 %v1786_v14, %v1007_v19  ;;  %v1009_v24 = vpop.f32.mrb[105].mxu1  ;;  %v1849_v41 = vmax.f32 %v1848_v20, %v1260_v31  ;;  %v5438_v14 = vld [vmem:[#allocation2 + $0x4c4] ss:$16 sps:$4 sm:$0xff]   ;;  %v5436_v19 = vld [vmem:[#allocation2 + $0x4c0] ss:$16 sps:$4 sm:$0xff]  }
 0x1bf   :  { %3527 = vmatprep.subr.bf16.mxu1 %v5423_v45  ;;  %v1808_v40 = vmax.f32 %v1807_v15, %v1009_v24 }
 0x1c0   :  { %v1264_v51 = vpop.f32.mrb[106].mxu0 }
 0x1c1   :  { %v1013_v32 = vpop.f32.mrb[106].mxu1  ;;  %v1829_v52 = vmax.f32 %v1828_v30, %v1264_v51  ;;  %v1266_v22 = vpop.f32.mrb[107].mxu0 }
 0x1c2   :  { %3528 = vmatpush1.bf16.msra.mxu1 %v5421_v23  ;;  %v1788_v18 = vmax.f32 %v1787_v26, %v1013_v32  ;;  %v1015_v48 = vpop.f32.mrb[107].mxu1  ;;  %v1850_v54 = vmax.f32 %v1849_v41, %v1266_v22  ;;  %v5441_v26 = vld [vmem:[#allocation2 + $0x4e4] ss:$16 sps:$4 sm:$0xff]   ;;  %v5439_v32 = vld [vmem:[#allocation2 + $0x4e0] ss:$16 sps:$4 sm:$0xff]  }
 0x1c3   :  { %3529 = vmatprep.subr.bf16.mxu1 %v5426_v25  ;;  %v1809_v50 = vmax.f32 %v1808_v40, %v1015_v48 }
 0x1c4   :  { %v1270_v58 = vpop.f32.mrb[108].mxu0 }
 0x1c5   :  { %v1019_v53 = vpop.f32.mrb[108].mxu1  ;;  %v1830_v59 = vmax.f32 %v1829_v52, %v1270_v58  ;;  %v1272_v60 = vpop.f32.mrb[109].mxu0 }
 0x1c6   :  { %3530 = vmatpush1.bf16.msra.mxu1 %v5424_v33  ;;  %v1789_v56 = vmax.f32 %v1788_v18, %v1019_v53  ;;  %v1021_v36 = vpop.f32.mrb[109].mxu1  ;;  %v1851_v62 = vmax.f32 %v1850_v54, %v1272_v60  ;;  %v5444_v18 = vld [vmem:[#allocation2 + $0x504] ss:$16 sps:$4 sm:$0xff]   ;;  %v5442_v53 = vld [vmem:[#allocation2 + $0x500] ss:$16 sps:$4 sm:$0xff]  }
 0x1c7   :  { %3531 = vmatprep.subr.bf16.mxu1 %v5429_v42  ;;  %v1810_v29 = vmax.f32 %v1809_v50, %v1021_v36 }
 0x1c8   :  { %v1276_v4 = vpop.f32.mrb[110].mxu0 }
 0x1c9   :  { %v1025_v61 = vpop.f32.mrb[110].mxu1  ;;  %v1831_v5 = vmax.f32 %v1830_v59, %v1276_v4  ;;  %v1278_v7 = vpop.f32.mrb[111].mxu0 }
 0x1ca   :  { %3532 = vmatpush1.bf16.msra.mxu1 %v5427_v55  ;;  %v1790_v1 = vmax.f32 %v1789_v56, %v1025_v61  ;;  %v1027_v37 = vpop.f32.mrb[111].mxu1  ;;  %v1852_v9 = vmax.f32 %v1851_v62, %v1278_v7  ;;  %v5447_v56 = vld [vmem:[#allocation2 + $0x524] ss:$16 sps:$4 sm:$0xff]   ;;  %v5445_v61 = vld [vmem:[#allocation2 + $0x520] ss:$16 sps:$4 sm:$0xff]   ;;  %v1552_v7 = vrot.slane %v6686_v49, 4 }
 0x1cb   :  { %3533 = vmatprep.subr.bf16.mxu1 %v5432_v27  ;;  %v1811_v44 = vmax.f32 %v1810_v29, %v1027_v37  ;;  %v5450_v37 = vld [vmem:[#allocation2 + $0x544] ss:$16 sps:$4 sm:$0xff]  }
 0x1cc   :  { %v1282_v45 = vpop.f32.mrb[112].mxu0 }
 0x1cd   :  { %v1031_v8 = vpop.f32.mrb[112].mxu1  ;;  %v1832_v15 = vmax.f32 %v1831_v5, %v1282_v45  ;;  %v1284_v16 = vpop.f32.mrb[113].mxu0 }
 0x1ce   :  { %3534 = vmatpush1.bf16.msra.mxu1 %v5430_v63  ;;  %v1791_v12 = vmax.f32 %v1790_v1, %v1031_v8  ;;  %v1033_v13 = vpop.f32.mrb[113].mxu1  ;;  %v1853_v39 = vmax.f32 %v1852_v9, %v1284_v16 }
 0x1cf   :  { %3535 = vmatprep.subr.bf16.mxu1 %v5435_v3  ;;  %v1812_v47 = vmax.f32 %v1811_v44, %v1033_v13  ;;  %v1531_v44 = vrot.slane %v6684_v46, 4 }
 0x1d0   :  { %v1288_v25 = vpop.f32.mrb[114].mxu0 }
 0x1d1   :  { %v1037_v35 = vpop.f32.mrb[114].mxu1  ;;  %v1833_v40 = vmax.f32 %v1832_v15, %v1288_v25  ;;  %v1290_v28 = vpop.f32.mrb[115].mxu0  ;;  %v1532_v15 = vmax.f32 %v6684_v46, %v1531_v44  ;;  %v1573_v25 = vrot.slane %v6688_v57, 4 }
 0x1d2   :  { %3536 = vmatpush1.bf16.msra.mxu1 %v5433_v11  ;;  %v1792_v20 = vmax.f32 %v1791_v12, %v1037_v35  ;;  %v1039_v23 = vpop.f32.mrb[115].mxu1  ;;  %v1854_v31 = vmax.f32 %v1853_v39, %v1290_v28  ;;  %v5448_v11 = vld [vmem:[#allocation2 + $0x540] ss:$16 sps:$4 sm:$0xff]   ;;  %v1553_v39 = vmax.f32 %v6686_v49, %v1552_v7  ;;  %v5456_v28 = vld [vmem:[#allocation2 + $0x584] ss:$16 sps:$4 sm:$0xff]  }
 0x1d3   :  { %3537 = vmatprep.subr.bf16.mxu1 %v5438_v14  ;;  %v1813_v24 = vmax.f32 %v1812_v47, %v1039_v23  ;;  %v5453_v47 = vld [vmem:[#allocation2 + $0x564] ss:$16 sps:$4 sm:$0xff]  }
 0x1d4   :  { %v1294_v42 = vpop.f32.mrb[116].mxu0 }
 0x1d5   :  { %v1043_v30 = vpop.f32.mrb[116].mxu1  ;;  %v1834_v50 = vmax.f32 %v1833_v40, %v1294_v42  ;;  %v1296_v51 = vpop.f32.mrb[117].mxu0 }
 0x1d6   :  { %3538 = vmatpush1.bf16.msra.mxu1 %v5436_v19  ;;  %v1793_v41 = vmax.f32 %v1792_v20, %v1043_v30  ;;  %v1045_v33 = vpop.f32.mrb[117].mxu1  ;;  %v1855_v22 = vmax.f32 %v1854_v31, %v1296_v51  ;;  %v1594_v30 = vrot.slane %v6690_v43, 4  ;;  %v1574_v51 = vmax.f32 %v6688_v57, %v1573_v25  ;;  %v5462_v57 = vld [vmem:[#allocation2 + $0x5c4] ss:$16 sps:$4 sm:$0xff]  }
 0x1d7   :  { %3539 = vmatprep.subr.bf16.mxu1 %v5441_v26  ;;  %v1814_v48 = vmax.f32 %v1813_v24, %v1045_v33  ;;  %v5451_v24 = vld [vmem:[#allocation2 + $0x560] ss:$16 sps:$4 sm:$0xff]   ;;  %v1554_v33 = vrot.slane %v1553_v39, 2 }
 0x1d8   :  { %v1300_v27 = vpop.f32.mrb[118].mxu0 }
 0x1d9   :  { %v1049_v52 = vpop.f32.mrb[118].mxu1  ;;  %v1835_v29 = vmax.f32 %v1834_v50, %v1300_v27  ;;  %v1302_v58 = vpop.f32.mrb[119].mxu0  ;;  %v5454_v50 = vld [vmem:[#allocation2 + $0x580] ss:$16 sps:$4 sm:$0xff]  }
 0x1da   :  { %3540 = vmatpush1.bf16.msra.mxu1 %v5439_v32  ;;  %v1794_v54 = vmax.f32 %v1793_v41, %v1049_v52  ;;  %v1051_v55 = vpop.f32.mrb[119].mxu1  ;;  %v1856_v60 = vmax.f32 %v1855_v22, %v1302_v58  ;;  %v1533_v32 = vrot.slane %v1532_v15, 2  ;;  %v5459_v22 = vld [vmem:[#allocation2 + $0x5a4] ss:$16 sps:$4 sm:$0xff]  }
 0x1db   :  { %3541 = vmatprep.subr.bf16.mxu1 %v5444_v18  ;;  %v1815_v36 = vmax.f32 %v1814_v48, %v1051_v55 }
 0x1dc   :  { %v1306_v3 = vpop.f32.mrb[120].mxu0  ;;  %v1534_v55 = vmax.f32 %v1532_v15, %v1533_v32 }
 0x1dd   :  { %v1055_v59 = vpop.f32.mrb[120].mxu1  ;;  %v1836_v4 = vmax.f32 %v1835_v29, %v1306_v3  ;;  %v1308_v5 = vpop.f32.mrb[121].mxu0  ;;  %v1555_v29 = vmax.f32 %v1553_v39, %v1554_v33 }
 0x1de   :  { %3542 = vmatpush1.bf16.msra.mxu1 %v5442_v53  ;;  %v1795_v62 = vmax.f32 %v1794_v54, %v1055_v59  ;;  %v1057_v63 = vpop.f32.mrb[121].mxu1  ;;  %v1857_v9 = vmax.f32 %v1856_v60, %v1308_v5  ;;  %v1595_v53 = vmax.f32 %v6690_v43, %v1594_v30  ;;  %v1535_v3 = vrot.slane %v1534_v55, 1  ;;  %v5468_v30 = vld [vmem:[#allocation2 + $0x604] ss:$16 sps:$4 sm:$0xff]  }
 0x1df   :  { %3543 = vmatprep.subr.bf16.mxu1 %v5447_v56  ;;  %v1816_v1 = vmax.f32 %v1815_v36, %v1057_v63  ;;  %v1556_v5 = vrot.slane %v1555_v29, 1 }
 0x1e0   :  { %v1312_v45 = vpop.f32.mrb[122].mxu0 }
 0x1e1   :  { %v1061_v8 = vpop.f32.mrb[122].mxu1  ;;  %v1837_v16 = vmax.f32 %v1836_v4, %v1312_v45  ;;  %v1314_v35 = vpop.f32.mrb[123].mxu0 }
 0x1e2   :  { %3544 = vmatpush1.bf16.msra.mxu1 %v5445_v61  ;;  %v1796_v12 = vmax.f32 %v1795_v62, %v1061_v8  ;;  %v1063_v13 = vpop.f32.mrb[123].mxu1  ;;  %v1858_v20 = vmax.f32 %v1857_v9, %v1314_v35  ;;  %v5457_v61 = vld [vmem:[#allocation2 + $0x5a0] ss:$16 sps:$4 sm:$0xff]   ;;  %v1575_v62 = vrot.slane %v1574_v51, 2 }
 0x1e3   :  { %3545 = vmatprep.subr.bf16.mxu1 %v5450_v37  ;;  %v1817_v14 = vmax.f32 %v1816_v1, %v1063_v13  ;;  %v1596_v1 = vrot.slane %v1595_v53, 2 }
 0x1e4   :  { %v1318_v31 = vpop.f32.mrb[124].mxu0 }
 0x1e5   :  { %v1067_v19 = vpop.f32.mrb[124].mxu1  ;;  %v1838_v46 = vmax.f32 %v1837_v16, %v1318_v31  ;;  %v1320_v41 = vpop.f32.mrb[125].mxu0  ;;  %v1597_v45 = vmax.f32 %v1595_v53, %v1596_v1  ;;  %v1536_v16 = vmax.f32 %v1534_v55, %v1535_v3  ;;  %v5481_v1 = vld [vmem:[#allocation2 + $0x6a0] ss:$16 sps:$4 sm:$0xff]  }
 0x1e6   :  { %3546 = vmatpush1.bf16.msra.mxu1 %v5448_v11  ;;  %v1797_v23 = vmax.f32 %v1796_v12, %v1067_v19  ;;  %v1069_v26 = vpop.f32.mrb[125].mxu1  ;;  %v1859_v49 = vmax.f32 %v1858_v20, %v1320_v41  ;;  %v5460_v11 = vld [vmem:[#allocation2 + $0x5c0] ss:$16 sps:$4 sm:$0xff]   ;;  %v1576_v12 = vmax.f32 %v1574_v51, %v1575_v62  ;;  %v1557_v19 = vmax.f32 %v1555_v29, %v1556_v5  ;;  %v5480_v62 = vld [vmem:[#allocation2 + $0x684] ss:$16 sps:$4 sm:$0xff]  }
 0x1e7   :  { %v1818_v40 = vmax.f32 %v1817_v14, %v1069_v26  ;;  %3547 = vmatprep.subr.bf16.mxu1 %v5453_v47  ;;  %v5465_v47 = vld [vmem:[#allocation2 + $0x5e4] ss:$16 sps:$4 sm:$0xff]   ;;  %v1598_v31 = vrot.slane %v1597_v45, 1  ;;  %v5484_v3 = vld [vmem:[#allocation2 + $0x6c0] ss:$16 sps:$4 sm:$0xff]  }
 0x1e8   :  { %v1324_v54 = vpop.f32.mrb[126].mxu0  ;;  %v1577_v25 = vrot.slane %v1576_v12, 1 }
 0x1e9   :  { %v1073_v18 = vpop.f32.mrb[126].mxu1  ;;  %v1839_v36 = vmax.f32 %v1838_v46, %v1324_v54  ;;  %v1326_v27 = vpop.f32.mrb[127].mxu0 }
 0x1ea   :  { %v1798_v48 = vmax.f32 %v1797_v23, %v1073_v18  ;;  %3548 = vmatpush1.bf16.msra.mxu1 %v5451_v24  ;;  %v1075_v42 = vpop.f32.mrb[127].mxu1  ;;  %v1860_v59 = vmax.f32 %v1859_v49, %v1326_v27  ;;  %v5463_v24 = vld [vmem:[#allocation2 + $0x5e0] ss:$16 sps:$4 sm:$0xff]   ;;  %v5474_v27 = vld [vmem:[#allocation2 + $0x644] ss:$16 sps:$4 sm:$0xff]  }
 0x1eb   :  { %v1819_v52 = vmax.f32 %v1818_v40, %v1075_v42  ;;  %3549 = vmatprep.subr.bf16.mxu1 %v5456_v28  ;;  %v5466_v42 = vld [vmem:[#allocation2 + $0x600] ss:$16 sps:$4 sm:$0xff]  }
 0x1ec   :  { %v1799_v56 = vrot.slane %v1798_v48, 4  ;;  %v1330_v37 = vpop.f32.mrb[128].mxu0 }
 0x1ed   :  { %v1820_v58 = vrot.slane %v1819_v52, 4  ;;  %v1840_v43 = vmax.f32 %v1839_v36, %v1330_v37  ;;  %v1332_v4 = vpop.f32.mrb[129].mxu0  ;;  %v5486_v37 = vld [vmem:[#allocation2 + $0x6c4] ss:$16 sps:$4 sm:$0xff]  }
 0x1ee   :  { %v1800_v60 = vmax.f32 %v1798_v48, %v1799_v56  ;;  %3550 = vmatpush1.bf16.msra.mxu1 %v5454_v50  ;;  %v1861_v8 = vmax.f32 %v1860_v59, %v1332_v4  ;;  %v1578_v50 = vmax.f32 %v1576_v12, %v1577_v25  ;;  %v5469_v56 = vld [vmem:[#allocation2 + $0x620] ss:$16 sps:$4 sm:$0xff]   ;;  %v5492_v4 = vld [vmem:[#allocation2 + $0x704] ss:$16 sps:$4 sm:$0xff]  }
 0x1ef   :  { %v1821_v63 = vmax.f32 %v1819_v52, %v1820_v58  ;;  %3551 = vmatprep.subr.bf16.mxu1 %v5459_v22  ;;  %v1841_v13 = vrot.slane %v1840_v43, 4  ;;  %v5471_v52 = vld [vmem:[#allocation2 + $0x624] ss:$16 sps:$4 sm:$0xff]   ;;  %v1599_v22 = vmax.f32 %v1597_v45, %v1598_v31  ;;  %v5472_v59 = vld [vmem:[#allocation2 + $0x640] ss:$16 sps:$4 sm:$0xff]  }
 0x1f0   :  { %v1801_v44 = vrot.slane %v1800_v60, 2  ;;  %v1862_v15 = vrot.slane %v1861_v8, 4  ;;  %v5498_v12 = vld [vmem:[#allocation2 + $0x744] ss:$16 sps:$4 sm:$0xff]  }
 0x1f1   :  { %v1822_v7 = vrot.slane %v1821_v63, 2  ;;  %v1842_v39 = vmax.f32 %v1840_v43, %v1841_v13  ;;  %v5487_v43 = vld [vmem:[#allocation2 + $0x6e0] ss:$16 sps:$4 sm:$0xff]   ;;  %v5501_v45 = vld [vmem:[#allocation2 + $0x764] ss:$16 sps:$4 sm:$0xff]  }
 0x1f2   :  { %v1802_v9 = vmax.f32 %v1800_v60, %v1801_v44  ;;  %3552 = vmatpush1.bf16.msra.mxu1 %v5457_v61  ;;  %v1863_v23 = vmax.f32 %v1861_v8, %v1862_v15  ;;  %v5477_v60 = vld [vmem:[#allocation2 + $0x664] ss:$16 sps:$4 sm:$0xff]   ;;  %v5475_v61 = vld [vmem:[#allocation2 + $0x660] ss:$16 sps:$4 sm:$0xff]  }
 0x1f3   :  { %v1823_v14 = vmax.f32 %v1821_v63, %v1822_v7  ;;  %3553 = vmatprep.subr.bf16.mxu1 %v5462_v57  ;;  %v1843_v40 = vrot.slane %v1842_v39, 2  ;;  %v5478_v63 = vld [vmem:[#allocation2 + $0x680] ss:$16 sps:$4 sm:$0xff]   ;;  %v5483_v57 = vld [vmem:[#allocation2 + $0x6a4] ss:$16 sps:$4 sm:$0xff]  }
 0x1f4   :  { %v1803_v35 = vrot.slane %v1802_v9, 1  ;;  %v1864_v32 = vrot.slane %v1863_v23, 2  ;;  %v5489_v44 = vld [vmem:[#allocation2 + $0x6e4] ss:$16 sps:$4 sm:$0xff]   ;;  %v5490_v7 = vld [vmem:[#allocation2 + $0x700] ss:$16 sps:$4 sm:$0xff]  }
 0x1f5   :  { %v1824_v20 = vrot.slane %v1823_v14, 1  ;;  %v1844_v41 = vmax.f32 %v1842_v39, %v1843_v40  ;;  %v5495_v8 = vld [vmem:[#allocation2 + $0x724] ss:$16 sps:$4 sm:$0xff]   ;;  %v5496_v13 = vld [vmem:[#allocation2 + $0x740] ss:$16 sps:$4 sm:$0xff]   ;;  %v4748_v40 = vld [vmem:[%s7105_s2 + $0xa8] sm:$0xff] }
 0x1f6   :  { %v1804_v26 = vmax.f32 %v1802_v9, %v1803_v35  ;;  %3554 = vmatpush1.bf16.msra.mxu1 %v5460_v11  ;;  %v1865_v49 = vmax.f32 %v1863_v23, %v1864_v32  ;;  %v5493_v11 = vld [vmem:[#allocation2 + $0x720] ss:$16 sps:$4 sm:$0xff]   ;;  %v5504_v23 = vld [vmem:[#allocation2 + $0x784] ss:$16 sps:$4 sm:$0xff]  }
 0x1f7   :  { %v1825_v28 = vmax.f32 %v1823_v14, %v1824_v20  ;;  %3555 = vmatprep.subr.bf16.mxu1 %v5465_v47  ;;  %v1845_v51 = vrot.slane %v1844_v41, 1  ;;  %v4743_v14 = vld [vmem:[%s7105_s2 + $0x80] sm:$0xff]  ;;  %v4744_v47 = vld [vmem:[%s7105_s2 + $0x88] sm:$0xff]  ;;  %v4746_v20 = vld [vmem:[%s7105_s2 + $0x98] sm:$0xff] }
 0x1f8   :  { %v1873_v46 = vsel %vm1868_vm2, %v1536_v16, %v1804_v26  ;;  %v1866_v53 = vrot.slane %v1865_v49, 1  ;;  %v5248_v16 = vpack.c.bf16 %v4744_v47, %v4743_v14  ;;  %v5499_v39 = vld [vmem:[#allocation2 + $0x760] ss:$16 sps:$4 sm:$0xff]   ;;  %v5541_v14 = vld [vmem:[#allocation2 + $0x128] ss:$16 sps:$4 sm:$0xff]  }
 0x1f9   :  { %v1874_v33 = vsel %vm1868_vm2, %v1557_v19, %v1825_v28  ;;  %v6707_v18 = vpack.c.bf16 %v1873_v46, %v1873_v46  ;;  %v1846_v54 = vmax.f32 %v1844_v41, %v1845_v51  ;;  %v4745_v19 = vld [vmem:[%s7105_s2 + $0x90] sm:$0xff]  ;;  %v4747_v25 = vld [vmem:[%s7105_s2 + $0xa0] sm:$0xff]  ;;  %v4750_v46 = vld [vmem:[%s7105_s2 + $0xb8] sm:$0xff] }
 0x1fa   :  { %3556 = vmatpush1.bf16.msra.mxu1 %v5463_v24  ;;  %v6709_v48 = vpack.c.bf16 %v1874_v33, %v1874_v33  ;;  %v1867_v55 = vmax.f32 %v1865_v49, %v1866_v53  ;;  %v5251_v24 = vpack.c.bf16 %v4746_v20, %v4745_v19  ;;  %v5254_v31 = vpack.c.bf16 %v4748_v40, %v4747_v25  ;;  %v4749_v32 = vld [vmem:[%s7105_s2 + $0xb0] sm:$0xff]  ;;  %v4751_v49 = vld [vmem:[%s7105_s2 + $0xc0] sm:$0xff]  ;;  %v4754_v53 = vld [vmem:[%s7105_s2 + $0xd8] sm:$0xff] }
 0x1fb   :  { %3566 = vmatprep.subr.bf16.mxu1 %v5468_v30  ;;  %v6714_v36 = vsel %vm1868_vm2, %v1578_v50, %v1846_v54  ;;  %v5507_v30 = vld [vmem:[#allocation2 + $0x7a4] ss:$16 sps:$4 sm:$0xff]   ;;  %v5508_v33 = vld [vmem:[#allocation2 + $0x7c0] ss:$16 sps:$4 sm:$0xff]   ;;  %v5546_v47 = vld [vmem:[#allocation2 + $0x14c] ss:$16 sps:$4 sm:$0xff]  }
 0x1fc   :  { %3557 = vmatprep.mubr.bf16.mxu1 %v6709_v48  ;;  %v1876_v29 = vsel %vm1868_vm2, %v1599_v22, %v1867_v55  ;;  %v5510_v41 = vld [vmem:[#allocation2 + $0x7c4] ss:$16 sps:$4 sm:$0xff]   ;;  %v6766_v55 = vpack.c.bf16 %v6714_v36, %v6714_v36  ;;  %v5555_v19 = vld [vmem:[#allocation2 + $0x1ac] ss:$16 sps:$4 sm:$0xff]   ;;  %v5553_v20 = vld [vmem:[#allocation2 + $0x1a8] ss:$16 sps:$4 sm:$0xff]  }
 0x1fd   :  { %3558 = vmatmul.mubr.bf16.vlgmr.msra.gmra.mrb[128].mxu1 %v6707_v18  ;;  %v6717_v58 = vpack.c.bf16 %v1876_v29, %v1876_v29  ;;  %v5513_v50 = vld [vmem:[#allocation2 + $0x7e4] ss:$16 sps:$4 sm:$0xff]   ;;  %v5564_v25 = vld [vmem:[#allocation2 + $0x20c] ss:$16 sps:$4 sm:$0xff]   ;;  %v5562_v40 = vld [vmem:[#allocation2 + $0x208] ss:$16 sps:$4 sm:$0xff]  }
 0x1fe   :  { %3567 = vmatpush1.bf16.msra.mxu1 %v5466_v42  ;;  %v4752_v42 = vld [vmem:[%s7105_s2 + $0xc8] sm:$0xff]  ;;  %v4753_v22 = vld [vmem:[%s7105_s2 + $0xd0] sm:$0xff] }
 0x1ff   :  { %3568 = vmatprep.subr.bf16.mxu1 %v5471_v52  ;;  %3598 = vmatprep.mubr.bf16.mxu1 %v6717_v58  ;;  %v5260_v51 = vpack.c.bf16 %v4752_v42, %v4751_v49  ;;  %v5511_v52 = vld [vmem:[#allocation2 + $0x7e0] ss:$16 sps:$4 sm:$0xff]   ;;  %v5263_v54 = vpack.c.bf16 %v4754_v53, %v4753_v22  ;;  %v5576_v42 = vld [vmem:[#allocation2 + $0x28c] ss:$16 sps:$4 sm:$0xff]  }
 0x200   :  { %v4757_v36 = vld [vmem:[%s7105_s2 + $0xf0] sm:$0xff]  ;;  %v5673_v49 = vld [vmem:[%s7111_s8 + $0x20] ss:$8 sps:$4 sm:$0xff]   ;;  %v5579_v22 = vld [vmem:[#allocation2 + $0x2ac] ss:$16 sps:$4 sm:$0xff]  }
 0x201   :  { %v5687_v53 = vld [vmem:[%s7111_s8 + $0x44] ss:$8 sps:$4 sm:$0xff]  }
 0x202   :  { %3569 = vmatpush1.bf16.msra.mxu1 %v5469_v56  ;;  %v4755_v56 = vld [vmem:[%s7105_s2 + $0xe0] sm:$0xff] }
 0x203   :  { %3570 = vmatprep.subr.bf16.mxu1 %v5474_v27  ;;  %v4756_v27 = vld [vmem:[%s7105_s2 + $0xe8] sm:$0xff] }
 0x204   :  { %v5266_v29 = vpack.c.bf16 %v4756_v27, %v4755_v56  ;;  %v5685_v56 = vld [vmem:[%s7111_s8 + $0x40] ss:$8 sps:$4 sm:$0xff]   ;;  %v5582_v27 = vld [vmem:[#allocation2 + $0x2cc] ss:$16 sps:$4 sm:$0xff]  }
 0x206   :  { %3571 = vmatpush1.bf16.msra.mxu1 %v5472_v59  ;;  %v4758_v59 = vld [vmem:[%s7105_s2 + $0xf8] sm:$0xff] }
 0x207   :  { %3572 = vmatprep.subr.bf16.mxu1 %v5477_v60  ;;  %v5269_v60 = vpack.c.bf16 %v4758_v59, %v4757_v36  ;;  %v5580_v36 = vld [vmem:[#allocation2 + $0x2c8] ss:$16 sps:$4 sm:$0xff]  }
 0x208   :  { %v5691_v59 = vld [vmem:[%s7111_s8 + $0x50] ss:$8 sps:$4 sm:$0xff]  }
 0x20a   :  { %3573 = vmatpush1.bf16.msra.mxu1 %v5475_v61  ;;  %v5516_v61 = vld [vmem:[#allocation2 + $0xc] ss:$16 sps:$4 sm:$0xff]  }
 0x20b   :  { %3574 = vmatprep.subr.bf16.mxu1 %v5480_v62  ;;  %v5514_v62 = vld [vmem:[#allocation2 + $0x8] ss:$16 sps:$4 sm:$0xff]  }
 0x20e   :  { %3575 = vmatpush1.bf16.msra.mxu1 %v5478_v63  ;;  %v5519_v63 = vld [vmem:[#allocation2 + $0x2c] ss:$16 sps:$4 sm:$0xff]  }
 0x20f   :  { %3576 = vmatprep.subr.bf16.mxu1 %v5483_v57  ;;  %v5517_v57 = vld [vmem:[#allocation2 + $0x28] ss:$16 sps:$4 sm:$0xff]  }
 0x212   :  { %3577 = vmatpush1.bf16.msra.mxu1 %v5481_v1  ;;  %v5522_v1 = vld [vmem:[#allocation2 + $0x4c] ss:$16 sps:$4 sm:$0xff]  }
 0x213   :  { %3578 = vmatprep.subr.bf16.mxu1 %v5486_v37  ;;  %v5520_v37 = vld [vmem:[#allocation2 + $0x48] ss:$16 sps:$4 sm:$0xff]  }
 0x216   :  { %3579 = vmatpush1.bf16.msra.mxu1 %v5484_v3  ;;  %v5525_v3 = vld [vmem:[#allocation2 + $0x6c] ss:$16 sps:$4 sm:$0xff]  }
 0x217   :  { %3580 = vmatprep.subr.bf16.mxu1 %v5489_v44  ;;  %v5523_v44 = vld [vmem:[#allocation2 + $0x68] ss:$16 sps:$4 sm:$0xff]  }
 0x219   :  { %v1341_v5 = vpop.xlane.xlu1 %1340 }
 0x21a   :  { %3581 = vmatpush1.bf16.msra.mxu1 %v5487_v43  ;;  %5822 = vrcp.f32 %v1341_v5  ;;  %v5526_v43 = vld [vmem:[#allocation2 + $0x88] ss:$16 sps:$4 sm:$0xff]  }
 0x21b   :  { %3582 = vmatprep.subr.bf16.mxu1 %v5492_v4  ;;  %v5531_v4 = vld [vmem:[#allocation2 + $0xac] ss:$16 sps:$4 sm:$0xff]   ;;  %v5529_v5 = vld [vmem:[#allocation2 + $0xa8] ss:$16 sps:$4 sm:$0xff]  }
 0x21d   :  { %v1606_v9 = vpop.xlane.xlu1 %1605 }
 0x21e   :  { %3583 = vmatpush1.bf16.msra.mxu1 %v5490_v7  ;;  %5824 = vrcp.f32 %v1606_v9  ;;  %v5534_v7 = vld [vmem:[#allocation2 + $0xcc] ss:$16 sps:$4 sm:$0xff]   ;;  %v5535_v9 = vld [vmem:[#allocation2 + $0xe8] ss:$16 sps:$4 sm:$0xff]  }
 0x21f   :  { %3584 = vmatprep.subr.bf16.mxu1 %v5495_v8  ;;  %v5537_v8 = vld [vmem:[#allocation2 + $0xec] ss:$16 sps:$4 sm:$0xff]  }
 0x222   :  { %3585 = vmatpush1.bf16.msra.mxu1 %v5493_v11  ;;  %v5540_v11 = vld [vmem:[#allocation2 + $0x10c] ss:$16 sps:$4 sm:$0xff]  }
 0x223   :  { %3586 = vmatprep.subr.bf16.mxu1 %v5498_v12  ;;  %v5538_v12 = vld [vmem:[#allocation2 + $0x108] ss:$16 sps:$4 sm:$0xff]  }
 0x224   :  { %v5823_v15 = vpop.eup %5822 }
 0x225   :  { %v1343_v35 = vmul.f32 %v5823_v15, %v6669_v10  ;;  %v5502_v10 = vld [vmem:[#allocation2 + $0x780] ss:$16 sps:$4 sm:$0xff]   ;;  %v5549_v15 = vld [vmem:[#allocation2 + $0x16c] ss:$16 sps:$4 sm:$0xff]  }
 0x226   :  { %3587 = vmatpush1.bf16.msra.mxu1 %v5496_v13  ;;  %v5543_v13 = vld [vmem:[#allocation2 + $0x12c] ss:$16 sps:$4 sm:$0xff]  }
 0x227   :  { %3588 = vmatprep.subr.bf16.mxu1 %v5501_v45  ;;  %1344 = vst [vmem:[#allocation5] sm:$0xff] %v1343_v35  ;;  %5186 = vmatmul.mubr.f32.vlgmr.msra.gmra.mrb[130].mxu0 %v1343_v35  ;;  %v5544_v45 = vld [vmem:[#allocation2 + $0x148] ss:$16 sps:$4 sm:$0xff]   ;;  %v5552_v35 = vld [vmem:[#allocation2 + $0x18c] ss:$16 sps:$4 sm:$0xff]  }
 0x228   :  { %v5825_v26 = vpop.eup %5824  ;;  %5249 = vmatpush3.bf16.msra.mxu0 %v5248_v16  ;;  %5220 = vmatprep.mubr.msk.f32.mxu0 %vm5924_vm3, %v5921_v0  ;;  %v5505_v0 = vld [vmem:[#allocation2 + $0x7a0] ss:$16 sps:$4 sm:$0xff]   ;;  %v5547_v16 = vld [vmem:[#allocation2 + $0x168] ss:$16 sps:$4 sm:$0xff]  }
 0x229   :  { %5250 = vmatprep.subr.bf16.mxu0 %v5923_v21  ;;  %v1608_v28 = vmul.f32 %v5825_v26, %v6672_v17  ;;  %v5257_v17 = vpack.c.bf16 %v4750_v46, %v4749_v32  ;;  %v5556_v26 = vld [vmem:[#allocation2 + $0x1c8] ss:$16 sps:$4 sm:$0xff]   ;;  %v5570_v32 = vld [vmem:[#allocation2 + $0x24c] ss:$16 sps:$4 sm:$0xff]  }
 0x22a   :  { %3589 = vmatpush1.bf16.msra.mxu1 %v5499_v39  ;;  %v5550_v39 = vld [vmem:[#allocation2 + $0x188] ss:$16 sps:$4 sm:$0xff]  }
 0x22b   :  { %3590 = vmatprep.subr.bf16.mxu1 %v5504_v23  ;;  %1610 = vst [vmem:[#allocation5 + $0x8] sm:$0xff] %v1608_v28  ;;  %v5558_v23 = vld [vmem:[#allocation2 + $0x1cc] ss:$16 sps:$4 sm:$0xff]   ;;  %v5568_v46 = vld [vmem:[#allocation2 + $0x248] ss:$16 sps:$4 sm:$0xff]  }
 0x22c   :  { %5252 = vmatpush3.bf16.msra.mxu0 %v5251_v24  ;;  %v5561_v24 = vld [vmem:[#allocation2 + $0x1ec] ss:$16 sps:$4 sm:$0xff]  }
 0x22d   :  { %5253 = vmatprep.subr.bf16.mxu0 %v5923_v21 }
 0x22e   :  { %3591 = vmatpush1.bf16.msra.mxu1 %v5502_v10  ;;  %v5559_v10 = vld [vmem:[#allocation2 + $0x1e8] ss:$16 sps:$4 sm:$0xff]  }
 0x22f   :  { %3592 = vmatprep.subr.bf16.mxu1 %v5507_v30  ;;  %v5663_v30 = vld [vmem:[%s7111_s8 + $0x4] ss:$8 sps:$4 sm:$0xff]  }
 0x230   :  { %5255 = vmatpush3.bf16.msra.mxu0 %v5254_v31  ;;  %v5565_v31 = vld [vmem:[#allocation2 + $0x228] ss:$16 sps:$4 sm:$0xff]  }
 0x231   :  { %5256 = vmatprep.subr.bf16.mxu0 %v5923_v21 }
 0x232   :  { %3593 = vmatpush1.bf16.msra.mxu1 %v5505_v0  ;;  %v5661_v0 = vld [vmem:[%s7111_s8] ss:$8 sps:$4 sm:$0xff]  }
 0x233   :  { %3594 = vmatprep.subr.bf16.mxu1 %v5510_v41  ;;  %v5667_v41 = vld [vmem:[%s7111_s8 + $0x10] ss:$8 sps:$4 sm:$0xff]  }
 0x234   :  { %5258 = vmatpush3.bf16.msra.mxu0 %v5257_v17  ;;  %v5675_v17 = vld [vmem:[%s7111_s8 + $0x24] ss:$8 sps:$4 sm:$0xff]  }
 0x235   :  { %5259 = vmatprep.subr.bf16.mxu0 %v5923_v21 }
 0x236   :  { %3595 = vmatpush1.bf16.msra.mxu1 %v5508_v33  ;;  %v5571_v33 = vld [vmem:[#allocation2 + $0x268] ss:$16 sps:$4 sm:$0xff]  }
 0x237   :  { %3596 = vmatprep.subr.bf16.mxu1 %v5513_v50  ;;  %v5681_v50 = vld [vmem:[%s7111_s8 + $0x34] ss:$8 sps:$4 sm:$0xff]  }
 0x238   :  { %5261 = vmatpush3.bf16.msra.mxu0 %v5260_v51  ;;  %v5574_v51 = vld [vmem:[#allocation2 + $0x288] ss:$16 sps:$4 sm:$0xff]  }
 0x239   :  { %5262 = vmatprep.subr.bf16.mxu0 %v5923_v21 }
 0x23a   :  { %3597 = vmatpush1.bf16.msra.mxu1 %v5511_v52  ;;  %v5679_v52 = vld [vmem:[%s7111_s8 + $0x30] ss:$8 sps:$4 sm:$0xff]  }
 0x23b   :  { %4261 = vmatprep.subr.bf16.mxu1 %v5663_v30  ;;  %v5612_v30 = vld [vmem:[#allocation2 + $0x40c] ss:$16 sps:$4 sm:$0xff]  }
 0x23c   :  { %5264 = vmatpush3.bf16.msra.mxu0 %v5263_v54  ;;  %v5577_v54 = vld [vmem:[#allocation2 + $0x2a8] ss:$16 sps:$4 sm:$0xff]  }
 0x23d   :  { %3599 = vmatmul.mubr.bf16.vlgmr.msra.gmra.mrb[128].mxu1 %v6766_v55  ;;  %5265 = vmatprep.subr.bf16.mxu0 %v5923_v21 }
 0x23e   :  { %4262 = vmatpush1.bf16.msra.mxu1 %v5661_v0  ;;  %v5610_v0 = vld [vmem:[#allocation2 + $0x408] ss:$16 sps:$4 sm:$0xff]  }
 0x240   :  { %5267 = vmatpush3.bf16.msra.mxu0 %v5266_v29  ;;  %v5693_v29 = vld [vmem:[%s7111_s8 + $0x54] ss:$8 sps:$4 sm:$0xff]  }
 0x241   :  { %5268 = vmatprep.subr.bf16.mxu0 %v5923_v21  ;;  %v5528_v21 = vld [vmem:[#allocation2 + $0x8c] ss:$16 sps:$4 sm:$0xff]  }
 0x244   :  { %5270 = vmatpush3.bf16.msra.mxu0 %v5269_v60  ;;  %v5585_v60 = vld [vmem:[#allocation2 + $0x2ec] ss:$16 sps:$4 sm:$0xff]  }
 0x245   :  { %3607 = vmatprep.subr.bf16.mxu0 %v5516_v61  ;;  %v5699_v61 = vld [vmem:[%s7111_s8 + $0x64] ss:$8 sps:$4 sm:$0xff]  }
 0x247   :  { %5221 = vmatmul.mubr.f32.vlgmr.msra.gmra.mrb[132].mxu0 %v1608_v28  ;;  %v5567_v28 = vld [vmem:[#allocation2 + $0x22c] ss:$16 sps:$4 sm:$0xff]  }
 0x248   :  { %3608 = vmatpush1.bf16.msra.mxu0 %v5514_v62  ;;  %3639 = vmatprep.mubr.bf16.mxu0 %v6648_v6  ;;  %v5532_v6 = vld [vmem:[#allocation2 + $0xc8] ss:$16 sps:$4 sm:$0xff]  }
 0x249   :  { %3609 = vmatprep.subr.bf16.mxu0 %v5519_v63  ;;  %v5583_v62 = vld [vmem:[#allocation2 + $0x2e8] ss:$16 sps:$4 sm:$0xff]  }
 0x24a   :  { %v5697_v63 = vld [vmem:[%s7111_s8 + $0x60] ss:$8 sps:$4 sm:$0xff]  }
 0x24c   :  { %3610 = vmatpush1.bf16.msra.mxu0 %v5517_v57  ;;  %v5588_v57 = vld [vmem:[#allocation2 + $0x30c] ss:$16 sps:$4 sm:$0xff]  }
 0x24d   :  { %3611 = vmatprep.subr.bf16.mxu0 %v5522_v1  ;;  %v5705_v1 = vld [vmem:[%s7111_s8 + $0x74] ss:$8 sps:$4 sm:$0xff]  }
 0x250   :  { %3612 = vmatpush1.bf16.msra.mxu0 %v5520_v37  ;;  %v5586_v37 = vld [vmem:[#allocation2 + $0x308] ss:$16 sps:$4 sm:$0xff]  }
 0x251   :  { %3613 = vmatprep.subr.bf16.mxu0 %v5525_v3  ;;  %v5703_v3 = vld [vmem:[%s7111_s8 + $0x70] ss:$8 sps:$4 sm:$0xff]  }
 0x254   :  { %3614 = vmatpush1.bf16.msra.mxu0 %v5523_v44  ;;  %v5591_v44 = vld [vmem:[#allocation2 + $0x32c] ss:$16 sps:$4 sm:$0xff]  }
 0x255   :  { %3615 = vmatprep.subr.bf16.mxu0 %v5528_v21  ;;  %v5711_v21 = vld [vmem:[%s7111_s8 + $0x84] ss:$8 sps:$4 sm:$0xff]  }
 0x258   :  { %3616 = vmatpush1.bf16.msra.mxu0 %v5526_v43  ;;  %v5589_v43 = vld [vmem:[#allocation2 + $0x328] ss:$16 sps:$4 sm:$0xff]  }
 0x259   :  { %3617 = vmatprep.subr.bf16.mxu0 %v5531_v4  ;;  %v5709_v4 = vld [vmem:[%s7111_s8 + $0x80] ss:$8 sps:$4 sm:$0xff]  }
 0x25c   :  { %3618 = vmatpush1.bf16.msra.mxu0 %v5529_v5  ;;  %v5594_v5 = vld [vmem:[#allocation2 + $0x34c] ss:$16 sps:$4 sm:$0xff]  }
 0x25d   :  { %3619 = vmatprep.subr.bf16.mxu0 %v5534_v7  ;;  %v5717_v7 = vld [vmem:[%s7111_s8 + $0x94] ss:$8 sps:$4 sm:$0xff]  }
 0x260   :  { %3620 = vmatpush1.bf16.msra.mxu0 %v5532_v6  ;;  %v5592_v6 = vld [vmem:[#allocation2 + $0x348] ss:$16 sps:$4 sm:$0xff]  }
 0x261   :  { %3621 = vmatprep.subr.bf16.mxu0 %v5537_v8  ;;  %v5715_v8 = vld [vmem:[%s7111_s8 + $0x90] ss:$8 sps:$4 sm:$0xff]  }
 0x264   :  { %3622 = vmatpush1.bf16.msra.mxu0 %v5535_v9  ;;  %v5597_v9 = vld [vmem:[#allocation2 + $0x36c] ss:$16 sps:$4 sm:$0xff]  }
 0x265   :  { %3623 = vmatprep.subr.bf16.mxu0 %v5540_v11  ;;  %v5723_v11 = vld [vmem:[%s7111_s8 + $0xa4] ss:$8 sps:$4 sm:$0xff]  }
 0x268   :  { %3624 = vmatpush1.bf16.msra.mxu0 %v5538_v12  ;;  %v5595_v12 = vld [vmem:[#allocation2 + $0x368] ss:$16 sps:$4 sm:$0xff]  }
 0x269   :  { %3625 = vmatprep.subr.bf16.mxu0 %v5543_v13  ;;  %v5721_v13 = vld [vmem:[%s7111_s8 + $0xa0] ss:$8 sps:$4 sm:$0xff]  }
 0x26c   :  { %3626 = vmatpush1.bf16.msra.mxu0 %v5541_v14  ;;  %v5600_v14 = vld [vmem:[#allocation2 + $0x38c] ss:$16 sps:$4 sm:$0xff]  }
 0x26d   :  { %3627 = vmatprep.subr.bf16.mxu0 %v5546_v47  ;;  %v5729_v47 = vld [vmem:[%s7111_s8 + $0xb4] ss:$8 sps:$4 sm:$0xff]  }
 0x270   :  { %3628 = vmatpush1.bf16.msra.mxu0 %v5544_v45  ;;  %v5598_v45 = vld [vmem:[#allocation2 + $0x388] ss:$16 sps:$4 sm:$0xff]  }
 0x271   :  { %3629 = vmatprep.subr.bf16.mxu0 %v5549_v15  ;;  %v5727_v15 = vld [vmem:[%s7111_s8 + $0xb0] ss:$8 sps:$4 sm:$0xff]  }
 0x274   :  { %3630 = vmatpush1.bf16.msra.mxu0 %v5547_v16  ;;  %v5603_v16 = vld [vmem:[#allocation2 + $0x3ac] ss:$16 sps:$4 sm:$0xff]  }
 0x275   :  { %3631 = vmatprep.subr.bf16.mxu0 %v5552_v35  ;;  %v5735_v35 = vld [vmem:[%s7111_s8 + $0xc4] ss:$8 sps:$4 sm:$0xff]  }
 0x278   :  { %3632 = vmatpush1.bf16.msra.mxu0 %v5550_v39  ;;  %v5601_v39 = vld [vmem:[#allocation2 + $0x3a8] ss:$16 sps:$4 sm:$0xff]  }
 0x279   :  { %3633 = vmatprep.subr.bf16.mxu0 %v5555_v19  ;;  %v5733_v19 = vld [vmem:[%s7111_s8 + $0xc0] ss:$8 sps:$4 sm:$0xff]  }
 0x27c   :  { %3634 = vmatpush1.bf16.msra.mxu0 %v5553_v20  ;;  %v5606_v20 = vld [vmem:[#allocation2 + $0x3cc] ss:$16 sps:$4 sm:$0xff]  }
 0x27d   :  { %3635 = vmatprep.subr.bf16.mxu0 %v5558_v23  ;;  %v5741_v23 = vld [vmem:[%s7111_s8 + $0xd4] ss:$8 sps:$4 sm:$0xff]  }
 0x280   :  { %3636 = vmatpush1.bf16.msra.mxu0 %v5556_v26  ;;  %v5604_v26 = vld [vmem:[#allocation2 + $0x3c8] ss:$16 sps:$4 sm:$0xff]  }
 0x281   :  { %3637 = vmatprep.subr.bf16.mxu0 %v5561_v24  ;;  %v5739_v24 = vld [vmem:[%s7111_s8 + $0xd0] ss:$8 sps:$4 sm:$0xff]  }
 0x284   :  { %3638 = vmatpush1.bf16.msra.mxu0 %v5559_v10  ;;  %v5609_v10 = vld [vmem:[#allocation2 + $0x3ec] ss:$16 sps:$4 sm:$0xff]  }
 0x285   :  { %3648 = vmatprep.subr.bf16.mxu0 %v5564_v25  ;;  %v5747_v25 = vld [vmem:[%s7111_s8 + $0xe4] ss:$8 sps:$4 sm:$0xff]  }
 0x287   :  { %3640 = vmatmul.mubr.bf16.vlgmr.msra.gmra.mrb[136].mxu0 %v6645_v2  ;;  %v5669_v2 = vld [vmem:[%s7111_s8 + $0x14] ss:$8 sps:$4 sm:$0xff]  }
 0x288   :  { %3649 = vmatpush1.bf16.msra.mxu0 %v5562_v40  ;;  %3680 = vmatprep.mubr.bf16.mxu0 %v6659_v34  ;;  %v5573_v34 = vld [vmem:[#allocation2 + $0x26c] ss:$16 sps:$4 sm:$0xff]   ;;  %v5607_v40 = vld [vmem:[#allocation2 + $0x3e8] ss:$16 sps:$4 sm:$0xff]  }
 0x289   :  { %3650 = vmatprep.subr.bf16.mxu0 %v5567_v28  ;;  %4263 = vmatprep.subr.bf16.mxu1 %v5669_v2  ;;  %v5745_v28 = vld [vmem:[%s7111_s8 + $0xe0] ss:$8 sps:$4 sm:$0xff]   ;;  %v5615_v2 = vld [vmem:[#allocation2 + $0x42c] ss:$16 sps:$4 sm:$0xff]  }
 0x28a   :  { %4264 = vmatpush1.bf16.msra.mxu1 %v5667_v41  ;;  %v5618_v41 = vld [vmem:[#allocation2 + $0x44c] ss:$16 sps:$4 sm:$0xff]  }
 0x28b   :  { %4265 = vmatprep.subr.bf16.mxu1 %v5675_v17  ;;  %v5616_v17 = vld [vmem:[#allocation2 + $0x448] ss:$16 sps:$4 sm:$0xff]  }
 0x28c   :  { %3651 = vmatpush1.bf16.msra.mxu0 %v5565_v31  ;;  %v5753_v31 = vld [vmem:[%s7111_s8 + $0xf4] ss:$8 sps:$4 sm:$0xff]  }
 0x28d   :  { %3652 = vmatprep.subr.bf16.mxu0 %v5570_v32  ;;  %v5751_v32 = vld [vmem:[%s7111_s8 + $0xf0] ss:$8 sps:$4 sm:$0xff]  }
 0x28e   :  { %4266 = vmatpush1.bf16.msra.mxu1 %v5673_v49  ;;  %v5619_v49 = vld [vmem:[#allocation2 + $0x468] ss:$16 sps:$4 sm:$0xff]  }
 0x28f   :  { %4267 = vmatprep.subr.bf16.mxu1 %v5681_v50  ;;  %v5625_v50 = vld [vmem:[#allocation2 + $0x4a8] ss:$16 sps:$4 sm:$0xff]  }
 0x290   :  { %3653 = vmatpush1.bf16.msra.mxu0 %v5568_v46  ;;  %v5613_v46 = vld [vmem:[#allocation2 + $0x428] ss:$16 sps:$4 sm:$0xff]  }
 0x291   :  { %3654 = vmatprep.subr.bf16.mxu0 %v5573_v34  ;;  %v5756_v34 = vld [vmem:[%s7111_s8 + $0x104] ss:$8 sps:$4 sm:$0xff]  }
 0x292   :  { %4268 = vmatpush1.bf16.msra.mxu1 %v5679_v52  ;;  %v5628_v52 = vld [vmem:[#allocation2 + $0x4c8] ss:$16 sps:$4 sm:$0xff]  }
 0x293   :  { %4269 = vmatprep.subr.bf16.mxu1 %v5687_v53  ;;  %v5631_v53 = vld [vmem:[#allocation2 + $0x4e8] ss:$16 sps:$4 sm:$0xff]  }
 0x294   :  { %3655 = vmatpush1.bf16.msra.mxu0 %v5571_v33  ;;  %v5621_v33 = vld [vmem:[#allocation2 + $0x46c] ss:$16 sps:$4 sm:$0xff]  }
 0x295   :  { %3656 = vmatprep.subr.bf16.mxu0 %v5576_v42  ;;  %v5624_v42 = vld [vmem:[#allocation2 + $0x48c] ss:$16 sps:$4 sm:$0xff]  }
 0x296   :  { %4270 = vmatpush1.bf16.msra.mxu1 %v5685_v56  ;;  %v5634_v56 = vld [vmem:[#allocation2 + $0x508] ss:$16 sps:$4 sm:$0xff]  }
 0x297   :  { %4271 = vmatprep.subr.bf16.mxu1 %v5693_v29  ;;  %v5637_v29 = vld [vmem:[#allocation2 + $0x528] ss:$16 sps:$4 sm:$0xff]  }
 0x298   :  { %3657 = vmatpush1.bf16.msra.mxu0 %v5574_v51  ;;  %v5630_v51 = vld [vmem:[#allocation2 + $0x4cc] ss:$16 sps:$4 sm:$0xff]  }
 0x299   :  { %3658 = vmatprep.subr.bf16.mxu0 %v5579_v22  ;;  %v5633_v22 = vld [vmem:[#allocation2 + $0x4ec] ss:$16 sps:$4 sm:$0xff]  }
 0x29a   :  { %4272 = vmatpush1.bf16.msra.mxu1 %v5691_v59  ;;  %v5640_v59 = vld [vmem:[#allocation2 + $0x548] ss:$16 sps:$4 sm:$0xff]  }
 0x29b   :  { %4273 = vmatprep.subr.bf16.mxu1 %v5699_v61  ;;  %v5643_v61 = vld [vmem:[#allocation2 + $0x568] ss:$16 sps:$4 sm:$0xff]  }
 0x29c   :  { %3659 = vmatpush1.bf16.msra.mxu0 %v5577_v54  ;;  %v5636_v54 = vld [vmem:[#allocation2 + $0x50c] ss:$16 sps:$4 sm:$0xff]  }
 0x29d   :  { %3660 = vmatprep.subr.bf16.mxu0 %v5582_v27  ;;  %v5639_v27 = vld [vmem:[#allocation2 + $0x52c] ss:$16 sps:$4 sm:$0xff]  }
 0x29e   :  { %4274 = vmatpush1.bf16.msra.mxu1 %v5697_v63  ;;  %v5646_v63 = vld [vmem:[#allocation2 + $0x588] ss:$16 sps:$4 sm:$0xff]  }
 0x29f   :  { %4275 = vmatprep.subr.bf16.mxu1 %v5705_v1  ;;  %v5649_v1 = vld [vmem:[#allocation2 + $0x5a8] ss:$16 sps:$4 sm:$0xff]  }
 0x2a0   :  { %3661 = vmatpush1.bf16.msra.mxu0 %v5580_v36  ;;  %v5642_v36 = vld [vmem:[#allocation2 + $0x54c] ss:$16 sps:$4 sm:$0xff]  }
 0x2a1   :  { %3662 = vmatprep.subr.bf16.mxu0 %v5585_v60  ;;  %v5645_v60 = vld [vmem:[#allocation2 + $0x56c] ss:$16 sps:$4 sm:$0xff]  }
 0x2a2   :  { %4276 = vmatpush1.bf16.msra.mxu1 %v5703_v3 }
 0x2a3   :  { %4277 = vmatprep.subr.bf16.mxu1 %v5711_v21  ;;  %v5652_v21 = vld [vmem:[#allocation2 + $0x5c8] ss:$16 sps:$4 sm:$0xff]  }
 0x2a4   :  { %3663 = vmatpush1.bf16.msra.mxu0 %v5583_v62  ;;  %v5648_v62 = vld [vmem:[#allocation2 + $0x58c] ss:$16 sps:$4 sm:$0xff]  }
 0x2a5   :  { %3664 = vmatprep.subr.bf16.mxu0 %v5588_v57  ;;  %v5651_v57 = vld [vmem:[#allocation2 + $0x5ac] ss:$16 sps:$4 sm:$0xff]  }
 0x2a6   :  { %4278 = vmatpush1.bf16.msra.mxu1 %v5709_v4  ;;  %v5655_v4 = vld [vmem:[#allocation2 + $0x5e8] ss:$16 sps:$4 sm:$0xff]  }
 0x2a7   :  { %4279 = vmatprep.subr.bf16.mxu1 %v5717_v7  ;;  %v5660_v7 = vld [vmem:[#allocation2 + $0x60c] ss:$16 sps:$4 sm:$0xff]  }
 0x2a8   :  { %3665 = vmatpush1.bf16.msra.mxu0 %v5586_v37  ;;  %v5654_v37 = vld [vmem:[#allocation2 + $0x5cc] ss:$16 sps:$4 sm:$0xff]  }
 0x2a9   :  { %3666 = vmatprep.subr.bf16.mxu0 %v5591_v44 }
 0x2aa   :  { %4280 = vmatpush1.bf16.msra.mxu1 %v5715_v8 }
 0x2ab   :  { %4281 = vmatprep.subr.bf16.mxu1 %v5723_v11  ;;  %v5664_v11 = vld [vmem:[#allocation2 + $0x628] ss:$16 sps:$4 sm:$0xff]  }
 0x2ac   :  { %3667 = vmatpush1.bf16.msra.mxu0 %v5589_v43  ;;  %v5657_v43 = vld [vmem:[#allocation2 + $0x5ec] ss:$16 sps:$4 sm:$0xff]  }
 0x2ad   :  { %3668 = vmatprep.subr.bf16.mxu0 %v5594_v5  ;;  %v2143_v5 = vlaneseq }
 0x2ae   :  { %4282 = vmatpush1.bf16.msra.mxu1 %v5721_v13  ;;  %v6899_v13 = vld [vmem:[%s7110_s7] sm:$0xf] }
 0x2af   :  { %4283 = vmatprep.subr.bf16.mxu1 %v5729_v47  ;;  %v6891_v8 = vshrl.u32 %v2143_v5, 7 }
 0x2b0   :  { %3669 = vmatpush1.bf16.msra.mxu0 %v5592_v6  ;;  %v5658_v6 = vld [vmem:[#allocation2 + $0x608] ss:$16 sps:$4 sm:$0xff]  }
 0x2b1   :  { %3670 = vmatprep.subr.bf16.mxu0 %v5597_v9  ;;  %v5666_v9 = vld [vmem:[#allocation2 + $0x62c] ss:$16 sps:$4 sm:$0xff]   ;;  %v2149_v47 = vsub.s32 1, %v6891_v8 }
 0x2b2   :  { %4284 = vmatpush1.bf16.msra.mxu1 %v5727_v15  ;;  %v5678_v15 = vld [vmem:[#allocation2 + $0x66c] ss:$16 sps:$4 sm:$0xff]  }
 0x2b3   :  { %4285 = vmatprep.subr.bf16.mxu1 %v5735_v35 }
 0x2b4   :  { %3671 = vmatpush1.bf16.msra.mxu0 %v5595_v12  ;;  %v2145_v12 = vsub.s32 0, %v6891_v8 }
 0x2b5   :  { %3672 = vmatprep.subr.bf16.mxu0 %v5600_v14  ;;  %v5672_v14 = vld [vmem:[#allocation2 + $0x64c] ss:$16 sps:$4 sm:$0xff]  }
 0x2b6   :  { %4286 = vmatpush1.bf16.msra.mxu1 %v5733_v19  ;;  %v5676_v19 = vld [vmem:[#allocation2 + $0x668] ss:$16 sps:$4 sm:$0xff]  }
 0x2b7   :  { %4287 = vmatprep.subr.bf16.mxu1 %v5741_v23 }
 0x2b8   :  { %3673 = vmatpush1.bf16.msra.mxu0 %v5598_v45  ;;  %v5670_v45 = vld [vmem:[#allocation2 + $0x648] ss:$16 sps:$4 sm:$0xff]  }
 0x2b9   :  { %3674 = vmatprep.subr.bf16.mxu0 %v5603_v16 }
 0x2ba   :  { %4288 = vmatpush1.bf16.msra.mxu1 %v5739_v24 }
 0x2bb   :  { %4289 = vmatprep.subr.bf16.mxu1 %v5747_v25 }
 0x2bc   :  { %3675 = vmatpush1.bf16.msra.mxu0 %v5601_v39 }
 0x2bd   :  { %3676 = vmatprep.subr.bf16.mxu0 %v5606_v20 }
 0x2be   :  { %4290 = vmatpush1.bf16.msra.mxu1 %v5745_v28 }
 0x2bf   :  { %4291 = vmatprep.subr.bf16.mxu1 %v5753_v31 }
 0x2c0   :  { %3677 = vmatpush1.bf16.msra.mxu0 %v5604_v26  ;;  %v5684_v26 = vld [vmem:[#allocation2 + $0x68c] ss:$16 sps:$4 sm:$0xff]  }
 0x2c1   :  { %3678 = vmatprep.subr.bf16.mxu0 %v5609_v10 }
 0x2c2   :  { %4292 = vmatpush1.bf16.msra.mxu1 %v5751_v32 }
 0x2c3   :  { %4302 = vmatprep.subr.bf16.mxu1 %v5756_v34 }
 0x2c4   :  { %3679 = vmatpush1.bf16.msra.mxu0 %v5607_v40 }
 0x2c5   :  { %3689 = vmatprep.subr.bf16.mxu0 %v5612_v30  ;;  %v5682_v30 = vld [vmem:[#allocation2 + $0x688] ss:$16 sps:$4 sm:$0xff]  }
 0x2c7   :  { %3681 = vmatmul.mubr.bf16.vlgmr.msra.gmra.mrb[136].mxu0 %v6694_v38  ;;  %v5622_v38 = vld [vmem:[#allocation2 + $0x488] ss:$16 sps:$4 sm:$0xff]  }
 0x2c8   :  { %3690 = vmatpush1.bf16.msra.mxu0 %v5610_v0  ;;  %3721 = vmatprep.mubr.bf16.mxu0 %v6709_v48  ;;  %v5627_v48 = vld [vmem:[#allocation2 + $0x4ac] ss:$16 sps:$4 sm:$0xff]  }
 0x2c9   :  { %3691 = vmatprep.subr.bf16.mxu0 %v5615_v2  ;;  %v5690_v0 = vld [vmem:[#allocation2 + $0x6ac] ss:$16 sps:$4 sm:$0xff]  }
 0x2cc   :  { %3692 = vmatpush1.bf16.msra.mxu0 %v5613_v46 }
 0x2cd   :  { %3693 = vmatprep.subr.bf16.mxu0 %v5618_v41  ;;  %v5688_v41 = vld [vmem:[#allocation2 + $0x6a8] ss:$16 sps:$4 sm:$0xff]  }
 0x2d0   :  { %3694 = vmatpush1.bf16.msra.mxu0 %v5616_v17  ;;  %v5696_v17 = vld [vmem:[#allocation2 + $0x6cc] ss:$16 sps:$4 sm:$0xff]  }
 0x2d1   :  { %3695 = vmatprep.subr.bf16.mxu0 %v5621_v33 }
 0x2d4   :  { %3696 = vmatpush1.bf16.msra.mxu0 %v5619_v49 }
 0x2d5   :  { %3697 = vmatprep.subr.bf16.mxu0 %v5624_v42 }
 0x2d8   :  { %3698 = vmatpush1.bf16.msra.mxu0 %v5622_v38 }
 0x2d9   :  { %3699 = vmatprep.subr.bf16.mxu0 %v5627_v48 }
 0x2dc   :  { %3700 = vmatpush1.bf16.msra.mxu0 %v5625_v50  ;;  %v5694_v50 = vld [vmem:[#allocation2 + $0x6c8] ss:$16 sps:$4 sm:$0xff]  }
 0x2dd   :  { %3701 = vmatprep.subr.bf16.mxu0 %v5630_v51 }
 0x2e0   :  { %3702 = vmatpush1.bf16.msra.mxu0 %v5628_v52  ;;  %v5702_v52 = vld [vmem:[#allocation2 + $0x6ec] ss:$16 sps:$4 sm:$0xff]  }
 0x2e1   :  { %3703 = vmatprep.subr.bf16.mxu0 %v5633_v22 }
 0x2e4   :  { %3704 = vmatpush1.bf16.msra.mxu0 %v5631_v53 }
 0x2e5   :  { %3705 = vmatprep.subr.bf16.mxu0 %v5636_v54 }
 0x2e8   :  { %3706 = vmatpush1.bf16.msra.mxu0 %v5634_v56  ;;  %v5700_v56 = vld [vmem:[#allocation2 + $0x6e8] ss:$16 sps:$4 sm:$0xff]  }
 0x2e9   :  { %3707 = vmatprep.subr.bf16.mxu0 %v5639_v27 }
 0x2ec   :  { %3708 = vmatpush1.bf16.msra.mxu0 %v5637_v29  ;;  %v5708_v29 = vld [vmem:[#allocation2 + $0x70c] ss:$16 sps:$4 sm:$0xff]  }
 0x2ed   :  { %3709 = vmatprep.subr.bf16.mxu0 %v5642_v36 }
 0x2f0   :  { %3710 = vmatpush1.bf16.msra.mxu0 %v5640_v59 }
 0x2f1   :  { %3711 = vmatprep.subr.bf16.mxu0 %v5645_v60 }
 0x2f4   :  { %3712 = vmatpush1.bf16.msra.mxu0 %v5643_v61  ;;  %v5706_v61 = vld [vmem:[#allocation2 + $0x708] ss:$16 sps:$4 sm:$0xff]  }
 0x2f5   :  { %3713 = vmatprep.subr.bf16.mxu0 %v5648_v62 }
 0x2f8   :  { %3714 = vmatpush1.bf16.msra.mxu0 %v5646_v63  ;;  %v5714_v63 = vld [vmem:[#allocation2 + $0x72c] ss:$16 sps:$4 sm:$0xff]  }
 0x2f9   :  { %3715 = vmatprep.subr.bf16.mxu0 %v5651_v57 }
 0x2fa   :  { %v1427_v3 = vpop.f32.mrb[130].mxu0 }
 0x2fb   :  { %1431 = vst [vmem:[%s7116_s13] sm:$0xff] %v1427_v3  ;;  %v5187_v44 = vpop.f32.mrb[131].mxu0 }
 0x2fc   :  { %3716 = vmatpush1.bf16.msra.mxu0 %v5649_v1  ;;  %v5712_v44 = vld [vmem:[#allocation2 + $0x728] ss:$16 sps:$4 sm:$0xff]  }
 0x2fd   :  { %3717 = vmatprep.subr.bf16.mxu0 %v5654_v37 }
 0x300   :  { %3718 = vmatpush1.bf16.msra.mxu0 %v5652_v21 }
 0x301   :  { %3719 = vmatprep.subr.bf16.mxu0 %v5657_v43  ;;  %v5720_v43 = vld [vmem:[#allocation2 + $0x74c] ss:$16 sps:$4 sm:$0xff]  }
 0x304   :  { %3720 = vmatpush1.bf16.msra.mxu0 %v5655_v4 }
 0x305   :  { %3730 = vmatprep.subr.bf16.mxu0 %v5660_v7 }
 0x307   :  { %3722 = vmatmul.mubr.bf16.vlgmr.msra.gmra.mrb[136].mxu0 %v6707_v18  ;;  %v2146_v18 = vrot.slane %v6899_v13, %v2145_v12 }
 0x308   :  { %3731 = vmatpush1.bf16.msra.mxu0 %v5658_v6  ;;  %3762 = vmatprep.mubr.bf16.mxu0 %v6717_v58  ;;  %v2150_v58 = vrot.slane %v6899_v13, %v2149_v47  ;;  %v5718_v6 = vld [vmem:[#allocation2 + $0x748] ss:$16 sps:$4 sm:$0xff]  }
 0x309   :  { %3732 = vmatprep.subr.bf16.mxu0 %v5666_v9 }
 0x30c   :  { %3733 = vmatpush1.bf16.msra.mxu0 %v5664_v11  ;;  %v5726_v11 = vld [vmem:[#allocation2 + $0x76c] ss:$16 sps:$4 sm:$0xff]  }
 0x30d   :  { %3734 = vmatprep.subr.bf16.mxu0 %v5672_v14 }
 0x310   :  { %v3600_v16 = vpop.f32.mrb[128].mxu1  ;;  %3735 = vmatpush1.bf16.msra.mxu0 %v5670_v45 }
 0x311   :  { %v5271_v35 = vadd.f32 %v3600_v16, %v2146_v18  ;;  %v3602_v39 = vpop.f32.mrb[129].mxu1  ;;  %3736 = vmatprep.subr.bf16.mxu0 %v5678_v15  ;;  %v5732_v16 = vld [vmem:[#allocation2 + $0x78c] ss:$16 sps:$4 sm:$0xff]  }
 0x312   :  { %v5272_v20 = vadd.f32 %v3602_v39, %v2150_v58  ;;  %v3604_v23 = vpop.f32.mrb[130].mxu1  ;;  %v5724_v58 = vld [vmem:[#allocation2 + $0x768] ss:$16 sps:$4 sm:$0xff]  }
 0x313   :  { %v3772_v24 = vsel %vm3771_vm4, %v5271_v35, 0.0  ;;  %v3605_v10 = vpop.f32.mrb[131].mxu1 }
 0x314   :  { %v3773_v25 = vrot.slane %v3772_v24, 4  ;;  %v3779_v40 = vsel %vm3771_vm4, %v5272_v20, 0.0  ;;  %3737 = vmatpush1.bf16.msra.mxu0 %v5676_v19  ;;  %v5744_v10 = vld [vmem:[#allocation2 + $0x7cc] ss:$16 sps:$4 sm:$0xff]  }
 0x315   :  { %v3780_v28 = vrot.slane %v3779_v40, 4  ;;  %3738 = vmatprep.subr.bf16.mxu0 %v5684_v26  ;;  %v5738_v26 = vld [vmem:[#allocation2 + $0x7ac] ss:$16 sps:$4 sm:$0xff]  }
 0x316   :  { %v3774_v31 = vadd.f32 %v3773_v25, %v3772_v24  ;;  %v5736_v24 = vld [vmem:[#allocation2 + $0x7a8] ss:$16 sps:$4 sm:$0xff]  }
 0x317   :  { %v3781_v32 = vadd.f32 %v3780_v28, %v3779_v40  ;;  %v5742_v25 = vld [vmem:[#allocation2 + $0x7c8] ss:$16 sps:$4 sm:$0xff]   ;;  %v5750_v40 = vld [vmem:[#allocation2 + $0x7ec] ss:$16 sps:$4 sm:$0xff]  }
 0x318   :  { %v3775_v2 = vrot.slane %v3774_v31, 2  ;;  %3739 = vmatpush1.bf16.msra.mxu0 %v5682_v30  ;;  %v5748_v30 = vld [vmem:[#allocation2 + $0x7e8] ss:$16 sps:$4 sm:$0xff]  }
 0x319   :  { %v3782_v46 = vrot.slane %v3781_v32, 2  ;;  %3740 = vmatprep.subr.bf16.mxu0 %v5690_v0 }
 0x31a   :  { %v3776_v34 = vadd.f32 %v3775_v2, %v3774_v31  ;;  %v1694_v49 = vpop.f32.mrb[132].mxu0 }
 0x31b   :  { %v3783_v33 = vadd.f32 %v3782_v46, %v3781_v32  ;;  %4759 = vst [vmem:[%s7116_s13 + $0x8] sm:$0xff] %v1694_v49  ;;  %v5222_v38 = vpop.f32.mrb[133].mxu0  ;;  %v5757_v49 = vld [vmem:[%s7111_s8 + $0x110] ss:$8 sps:$4 sm:$0xff]  }
 0x31c   :  { %v3777_v42 = vrot.slane %v3776_v34, 1  ;;  %3741 = vmatpush1.bf16.msra.mxu0 %v5688_v41  ;;  %v5765_v38 = vld [vmem:[%s7111_s8 + $0x134] ss:$8 sps:$4 sm:$0xff]  }
 0x31d   :  { %v3784_v48 = vrot.slane %v3783_v33, 1  ;;  %3742 = vmatprep.subr.bf16.mxu0 %v5696_v17 }
 0x31e   :  { %v3778_v51 = vadd.f32 %v3777_v42, %v3776_v34  ;;  %v5754_v34 = vld [vmem:[%s7111_s8 + $0x100] ss:$8 sps:$4 sm:$0xff]   ;;  %v5762_v42 = vld [vmem:[%s7111_s8 + $0x124] ss:$8 sps:$4 sm:$0xff]  }
 0x31f   :  { %v3785_v22 = vadd.f32 %v3784_v48, %v3783_v33  ;;  %v5759_v33 = vld [vmem:[%s7111_s8 + $0x114] ss:$8 sps:$4 sm:$0xff]   ;;  %v5763_v48 = vld [vmem:[%s7111_s8 + $0x130] ss:$8 sps:$4 sm:$0xff]  }
 0x320   :  { %v3801_v53 = vmul.f32 0.5, %v3778_v51  ;;  %3743 = vmatpush1.bf16.msra.mxu0 %v5694_v50  ;;  %v5768_v50 = vld [vmem:[%s7111_s8 + $0x144] ss:$8 sps:$4 sm:$0xff]   ;;  %v5766_v51 = vld [vmem:[%s7111_s8 + $0x140] ss:$8 sps:$4 sm:$0xff]  }
 0x321   :  { %v3802_v54 = vmul.f32 0.5, %v3785_v22  ;;  %3744 = vmatprep.subr.bf16.mxu0 %v5702_v52  ;;  %v5771_v52 = vld [vmem:[%s7111_s8 + $0x154] ss:$8 sps:$4 sm:$0xff]   ;;  %v5769_v22 = vld [vmem:[%s7111_s8 + $0x150] ss:$8 sps:$4 sm:$0xff]  }
 0x322   :  { %v3805_v27 = vsub.f32 %v5271_v35, %v3801_v53  ;;  %v5774_v53 = vld [vmem:[%s7111_s8 + $0x164] ss:$8 sps:$4 sm:$0xff]  }
 0x323   :  { %v3806_v36 = vsub.f32 %v5272_v20, %v3802_v54  ;;  %v5730_v20 = vld [vmem:[#allocation2 + $0x788] ss:$16 sps:$4 sm:$0xff]  }
 0x324   :  { %v3809_v59 = vmul.f32 %v3805_v27, %v3805_v27  ;;  %3745 = vmatpush1.bf16.msra.mxu0 %v5700_v56  ;;  %v5772_v54 = vld [vmem:[%s7111_s8 + $0x160] ss:$8 sps:$4 sm:$0xff]   ;;  %v5777_v56 = vld [vmem:[%s7111_s8 + $0x174] ss:$8 sps:$4 sm:$0xff]  }
 0x325   :  { %v3810_v60 = vmul.f32 %v3806_v36, %v3806_v36  ;;  %3746 = vmatprep.subr.bf16.mxu0 %v5708_v29  ;;  %v5780_v29 = vld [vmem:[%s7111_s8 + $0x184] ss:$8 sps:$4 sm:$0xff]  }
 0x326   :  { %v3813_v62 = vsel %vm3771_vm4, %v3809_v59, 0.0  ;;  %v5783_v59 = vld [vmem:[%s7111_s8 + $0x194] ss:$8 sps:$4 sm:$0xff]  }
 0x327   :  { %v3814_v57 = vrot.slane %v3813_v62, 4  ;;  %v3820_v1 = vsel %vm3771_vm4, %v3810_v60, 0.0  ;;  %v5781_v60 = vld [vmem:[%s7111_s8 + $0x190] ss:$8 sps:$4 sm:$0xff]  }
 0x328   :  { %v3821_v37 = vrot.slane %v3820_v1, 4  ;;  %3747 = vmatpush1.bf16.msra.mxu0 %v5706_v61  ;;  %v5786_v61 = vld [vmem:[%s7111_s8 + $0x1a4] ss:$8 sps:$4 sm:$0xff]  }
 0x329   :  { %v3815_v3 = vadd.f32 %v3814_v57, %v3813_v62  ;;  %3748 = vmatprep.subr.bf16.mxu0 %v5714_v63  ;;  %v5784_v62 = vld [vmem:[%s7111_s8 + $0x1a0] ss:$8 sps:$4 sm:$0xff]   ;;  %v5789_v63 = vld [vmem:[%s7111_s8 + $0x1b4] ss:$8 sps:$4 sm:$0xff]   ;;  %v5787_v57 = vld [vmem:[%s7111_s8 + $0x1b0] ss:$8 sps:$4 sm:$0xff]  }
 0x32a   :  { %v3822_v21 = vadd.f32 %v3821_v37, %v3820_v1  ;;  %v5792_v1 = vld [vmem:[%s7111_s8 + $0x1c4] ss:$8 sps:$4 sm:$0xff]   ;;  %v5790_v37 = vld [vmem:[%s7111_s8 + $0x1c0] ss:$8 sps:$4 sm:$0xff]  }
 0x32b   :  { %v3816_v4 = vrot.slane %v3815_v3, 2 }
 0x32c   :  { %v3823_v5 = vrot.slane %v3822_v21, 2  ;;  %3749 = vmatpush1.bf16.msra.mxu0 %v5712_v44  ;;  %v5793_v44 = vld [vmem:[%s7111_s8 + $0x1d0] ss:$8 sps:$4 sm:$0xff]  }
 0x32d   :  { %v3817_v7 = vadd.f32 %v3816_v4, %v3815_v3  ;;  %3750 = vmatprep.subr.bf16.mxu0 %v5720_v43  ;;  %v5795_v3 = vld [vmem:[%s7111_s8 + $0x1d4] ss:$8 sps:$4 sm:$0xff]   ;;  %v5796_v43 = vld [vmem:[%s7111_s8 + $0x1e0] ss:$8 sps:$4 sm:$0xff]  }
 0x32e   :  { %v3824_v9 = vadd.f32 %v3823_v5, %v3822_v21  ;;  %v5798_v21 = vld [vmem:[%s7111_s8 + $0x1e4] ss:$8 sps:$4 sm:$0xff]   ;;  %v5801_v4 = vld [vmem:[%s7111_s8 + $0x1f4] ss:$8 sps:$4 sm:$0xff]   ;;  %v5799_v5 = vld [vmem:[%s7111_s8 + $0x1f0] ss:$8 sps:$4 sm:$0xff]  }
 0x32f   :  { %v3818_v14 = vrot.slane %v3817_v7, 1 }
 0x330   :  { %v3825_v18 = vrot.slane %v3824_v9, 1  ;;  %3751 = vmatpush1.bf16.msra.mxu0 %v5718_v6  ;;  %v2157_v6 = vsub.s32 3, %v6891_v8 }
 0x331   :  { %v3819_v45 = vadd.f32 %v3818_v14, %v3817_v7  ;;  %3752 = vmatprep.subr.bf16.mxu0 %v5726_v11  ;;  %v2153_v7 = vsub.s32 2, %v6891_v8 }
 0x332   :  { %v3826_v15 = vadd.f32 %v3825_v18, %v3824_v9  ;;  %v2158_v11 = vrot.slane %v6899_v13, %v2157_v6  ;;  %v5808_v6 = vld [vmem:[%s7113_s10 + $0x58] sm:$0xff]  }
 0x333   :  { %v3841_v35 = vmul.f32 0.5, %v3819_v45  ;;  %v2154_v9 = vrot.slane %v6899_v13, %v2153_v7  ;;  %v5807_v7 = vld [vmem:[%s7113_s10 + $0x10] sm:$0xff]  }
 0x334   :  { %v3842_v39 = vmul.f32 0.5, %v3826_v15  ;;  %3753 = vmatpush1.bf16.msra.mxu0 %v5724_v58 }
 0x335   :  { %v3845_v19 = vadd.f32 1e-05, %v3841_v35  ;;  %3754 = vmatprep.subr.bf16.mxu0 %v5732_v16 }
 0x336   :  { %v3846_v23 = vadd.f32 1e-05, %v3842_v39 }
 0x337   :  { %5826 = vrsqrt.f32 %v3845_v19 }
 0x338   :  { %5828 = vrsqrt.f32 %v3846_v23  ;;  %3755 = vmatpush1.bf16.msra.mxu0 %v5730_v20 }
 0x339   :  { %3756 = vmatprep.subr.bf16.mxu0 %v5738_v26 }
 0x33c   :  { %3757 = vmatpush1.bf16.msra.mxu0 %v5736_v24 }
 0x33d   :  { %3758 = vmatprep.subr.bf16.mxu0 %v5744_v10 }
 0x340   :  { %3759 = vmatpush1.bf16.msra.mxu0 %v5742_v25 }
 0x341   :  { %v5827_v28 = vpop.eup %5826  ;;  %3760 = vmatprep.subr.bf16.mxu0 %v5750_v40 }
 0x342   :  { %v5829_v31 = vpop.eup %5828  ;;  %v3853_v0 = vmul.f32 %v5827_v28, %v3805_v27  ;;  %v5775_v27 = vld [vmem:[%s7111_s8 + $0x170] ss:$8 sps:$4 sm:$0xff]  }
 0x343   :  { %v3854_v32 = vmul.f32 %v5829_v31, %v3806_v36  ;;  %v5778_v36 = vld [vmem:[%s7111_s8 + $0x180] ss:$8 sps:$4 sm:$0xff]  }
 0x344   :  { %v3857_v2 = vmax.f32 %v3853_v0, 0.0  ;;  %3761 = vmatpush1.bf16.msra.mxu0 %v5748_v30 }
 0x345   :  { %v3858_v46 = vmax.f32 %v3854_v32, 0.0 }
 0x346   :  { %v3861_v17 = vpack.c.bf16 %v3857_v2, %v3857_v2 }
 0x347   :  { %v3862_v41 = vpack.c.bf16 %v3858_v46, %v3858_v46  ;;  %3763 = vmatmul.mubr.bf16.vlgmr.msra.gmra.mrb[136].mxu0 %v6766_v55  ;;  %v5760_v55 = vld [vmem:[%s7111_s8 + $0x120] ss:$8 sps:$4 sm:$0xff]  }
 0x349   :  { %4293 = vmatprep.mubr.bf16.mxu1 %v3862_v41 }
 0x34a   :  { %4294 = vmatmul.mubr.bf16.vlgmr.msra.gmra.mrb[132].mxu1 %v3861_v17 }
 0x34b   :  { %4303 = vmatpush1.bf16.msra.mxu1 %v5754_v34 }
 0x34c   :  { %4304 = vmatprep.subr.bf16.mxu1 %v5759_v33 }
 0x34f   :  { %4305 = vmatpush1.bf16.msra.mxu1 %v5757_v49 }
 0x350   :  { %4306 = vmatprep.subr.bf16.mxu1 %v5762_v42 }
 0x353   :  { %4307 = vmatpush1.bf16.msra.mxu1 %v5760_v55 }
 0x354   :  { %4308 = vmatprep.subr.bf16.mxu1 %v5765_v38 }
 0x357   :  { %4309 = vmatpush1.bf16.msra.mxu1 %v5763_v48 }
 0x358   :  { %4310 = vmatprep.subr.bf16.mxu1 %v5768_v50 }
 0x35b   :  { %4311 = vmatpush1.bf16.msra.mxu1 %v5766_v51 }
 0x35c   :  { %4312 = vmatprep.subr.bf16.mxu1 %v5771_v52 }
 0x35f   :  { %4313 = vmatpush1.bf16.msra.mxu1 %v5769_v22 }
 0x360   :  { %4314 = vmatprep.subr.bf16.mxu1 %v5774_v53 }
 0x363   :  { %4315 = vmatpush1.bf16.msra.mxu1 %v5772_v54 }
 0x364   :  { %4316 = vmatprep.subr.bf16.mxu1 %v5777_v56 }
 0x367   :  { %4317 = vmatpush1.bf16.msra.mxu1 %v5775_v27 }
 0x368   :  { %4318 = vmatprep.subr.bf16.mxu1 %v5780_v29 }
 0x36b   :  { %4319 = vmatpush1.bf16.msra.mxu1 %v5778_v36 }
 0x36c   :  { %4320 = vmatprep.subr.bf16.mxu1 %v5783_v59 }
 0x36f   :  { %4321 = vmatpush1.bf16.msra.mxu1 %v5781_v60 }
 0x370   :  { %4322 = vmatprep.subr.bf16.mxu1 %v5786_v61 }
 0x373   :  { %4323 = vmatpush1.bf16.msra.mxu1 %v5784_v62 }
 0x374   :  { %4324 = vmatprep.subr.bf16.mxu1 %v5789_v63 }
 0x377   :  { %4325 = vmatpush1.bf16.msra.mxu1 %v5787_v57 }
 0x378   :  { %4326 = vmatprep.subr.bf16.mxu1 %v5792_v1 }
 0x37b   :  { %4327 = vmatpush1.bf16.msra.mxu1 %v5790_v37 }
 0x37c   :  { %4328 = vmatprep.subr.bf16.mxu1 %v5795_v3 }
 0x37f   :  { %4329 = vmatpush1.bf16.msra.mxu1 %v5793_v44  ;;  %v5802_v44 = vld [vmem:[%s7113_s10 + $0x40] sm:$0xff]  }
 0x380   :  { %4330 = vmatprep.subr.bf16.mxu1 %v5798_v21  ;;  %v5803_v21 = vld [vmem:[%s7113_s10] sm:$0xff]   ;;  %5131 = vmatprep.subr.bf16.mxu0 %v5802_v44 }
 0x381   :  { %5132 = vmatpush3.bf16.msra.mxu0 %v5803_v21 }
 0x383   :  { %4331 = vmatpush1.bf16.msra.mxu1 %v5796_v43  ;;  %v5804_v43 = vld [vmem:[%s7113_s10 + $0x48] sm:$0xff]  }
 0x384   :  { %4332 = vmatprep.subr.bf16.mxu1 %v5801_v4  ;;  %v5805_v4 = vld [vmem:[%s7113_s10 + $0x8] sm:$0xff]   ;;  %5133 = vmatprep.subr.bf16.mxu0 %v5804_v43 }
 0x385   :  { %5134 = vmatpush3.bf16.msra.mxu0 %v5805_v4 }
 0x387   :  { %4333 = vmatpush1.bf16.msra.mxu1 %v5799_v5  ;;  %v5806_v5 = vld [vmem:[%s7113_s10 + $0x50] sm:$0xff]  }
 0x388   :  { %5135 = vmatprep.subr.bf16.mxu0 %v5806_v5 }
 0x389   :  { %5136 = vmatpush3.bf16.msra.mxu0 %v5807_v7 }
 0x38a   :  { %5137 = vmatprep.subr.bf16.mxu0 %v5808_v6 }
 0x41a   :  { %v3764_v14 = vpop.f32.mrb[136].mxu0 }
 0x41b   :  { %v5273_v18 = vadd.f32 %v3764_v14, %v2154_v9  ;;  %v3766_v45 = vpop.f32.mrb[137].mxu0  ;;  %v5809_v9 = vld [vmem:[%s7113_s10 + $0x18] sm:$0xff]   ;;  %v5811_v14 = vld [vmem:[%s7113_s10 + $0x20] sm:$0xff]  }
 0x41c   :  { %v5274_v58 = vadd.f32 %v3766_v45, %v2158_v11  ;;  %v3768_v15 = vpop.f32.mrb[138].mxu0  ;;  %5138 = vmatpush3.bf16.msra.mxu0 %v5809_v9  ;;  %v5810_v11 = vld [vmem:[%s7113_s10 + $0x60] sm:$0xff]   ;;  %v5813_v45 = vld [vmem:[%s7113_s10 + $0x28] sm:$0xff]  }
 0x41d   :  { %v3786_v16 = vsel %vm3771_vm4, %v5273_v18, 0.0  ;;  %v3769_v35 = vpop.f32.mrb[139].mxu0  ;;  %5139 = vmatprep.subr.bf16.mxu0 %v5810_v11  ;;  %v5815_v15 = vld [vmem:[%s7113_s10 + $0x30] sm:$0xff]  }
 0x41e   :  { %v3787_v39 = vrot.slane %v3786_v16, 4  ;;  %v3793_v19 = vsel %vm3771_vm4, %v5274_v58, 0.0  ;;  %v5817_v35 = vld [vmem:[%s7113_s10 + $0x38] sm:$0xff]  }
 0x41f   :  { %v3794_v20 = vrot.slane %v3793_v19, 4 }
 0x420   :  { %v3788_v23 = vadd.f32 %v3787_v39, %v3786_v16  ;;  %5140 = vmatpush3.bf16.msra.mxu0 %v5811_v14  ;;  %v5816_v16 = vld [vmem:[%s7113_s10 + $0x78] sm:$0xff]   ;;  %v3929_v39 = vld [vmem:[%s7112_s9] sm:$0x3]  ;;  %s5925_s9 = smov [#allocation5]  }
 0x421   :  { %v3795_v26 = vadd.f32 %v3794_v20, %v3793_v19  ;;  %v3934_v19 = vrot.slane %v3929_v39, %v2145_v12  ;;  %v3938_v20 = vrot.slane %v3929_v39, %v2149_v47 }
 0x422   :  { %v3789_v24 = vrot.slane %v3788_v23, 2 }
 0x423   :  { %v3796_v10 = vrot.slane %v3795_v26, 2 }
 0x424   :  { %v3790_v25 = vadd.f32 %v3789_v24, %v3788_v23 }
 0x425   :  { %v3797_v40 = vadd.f32 %v3796_v10, %v3795_v26 }
 0x426   :  { %v3791_v28 = vrot.slane %v3790_v25, 1 }
 0x427   :  { %v3798_v13 = vrot.slane %v3797_v40, 1 }
 0x428   :  { %v3792_v30 = vadd.f32 %v3791_v28, %v3790_v25 }
 0x429   :  { %v3799_v31 = vadd.f32 %v3798_v13, %v3797_v40 }
 0x42a   :  { %v3803_v0 = vmul.f32 0.5, %v3792_v30 }
 0x42b   :  { %v3804_v32 = vmul.f32 0.5, %v3799_v31 }
 0x42c   :  { %v3807_v2 = vsub.f32 %v5273_v18, %v3803_v0  ;;  %v5812_v18 = vld [vmem:[%s7113_s10 + $0x68] sm:$0xff]  }
 0x42d   :  { %v3808_v46 = vsub.f32 %v5274_v58, %v3804_v32  ;;  %5141 = vmatprep.subr.bf16.mxu0 %v5812_v18  ;;  %v5814_v58 = vld [vmem:[%s7113_s10 + $0x70] sm:$0xff]   ;;  %s4574_s10 = sshll.u32 %s5925_s9, 4  ;;  %s4575_s10 = int_to_ptr.vmem [resolvable:$true] %s4574_s10 }
 0x42e   :  { %v3811_v41 = vmul.f32 %v3807_v2, %v3807_v2  ;;  %5142 = vmatpush3.bf16.msra.mxu0 %v5813_v45  ;;  %s5868_s15 = scalar_lea.vmem %s4575_s10, 256  ;;  %p5873_p9 = scmp.lt.s32.totalorder %s4575_s10, %s4575_s10 }
 0x42f   :  { %v3812_v34 = vmul.f32 %v3808_v46, %v3808_v46  ;;  %5143 = vmatprep.subr.bf16.mxu0 %v5814_v58  ;;  %p5869_p8 = scmp.ne.s32.totalorder %s4575_s10, %s5868_s15  ;;  %p5874_p10 = scmp.lt.s32.totalorder %s5868_s15, %s5868_s15 }
 0x430   :  { %v3827_v17 = vsel %vm3771_vm4, %v3811_v41, 0.0 }
 0x431   :  { %v3828_v33 = vrot.slane %v3827_v17, 4  ;;  %v3834_v49 = vsel %vm3771_vm4, %v3812_v34, 0.0  ;;  %p5875_p11 = por %p5874_p10, %p5873_p9 }
 0x432   :  { %v3835_v42 = vrot.slane %v3834_v49, 4  ;;  %5144 = vmatpush3.bf16.msra.mxu0 %v5815_v15 }
 0x433   :  { %v3829_v55 = vadd.f32 %v3828_v33, %v3827_v17  ;;  %5145 = vmatprep.subr.bf16.mxu0 %v5816_v16  ;;  %p5876_p12 = pnand %p5875_p11, %p5869_p8 }
 0x434   :  { %v3836_v38 = vadd.f32 %v3835_v42, %v3834_v49 }
 0x435   :  { %v3830_v48 = vrot.slane %v3829_v55, 2 }
 0x436   :  { %v3837_v50 = vrot.slane %v3836_v38, 2  ;;  %5146 = vmatpush3.bf16.msra.mxu0 %v5817_v35 }
 0x437   :  { %v3831_v51 = vadd.f32 %v3830_v48, %v3829_v55 }
 0x438   :  { %v3838_v52 = vadd.f32 %v3837_v50, %v3836_v38 }
 0x439   :  { %v3832_v22 = vrot.slane %v3831_v51, 1 }
 0x43a   :  { %v3839_v53 = vrot.slane %v3838_v52, 1 }
 0x43b   :  { %v3833_v54 = vadd.f32 %v3832_v22, %v3831_v51 }
 0x43c   :  { %v3840_v56 = vadd.f32 %v3839_v53, %v3838_v52 }
 0x43d   :  { %v3843_v27 = vmul.f32 0.5, %v3833_v54 }
 0x43e   :  { %v3844_v29 = vmul.f32 0.5, %v3840_v56 }
 0x43f   :  { %v3847_v36 = vadd.f32 1e-05, %v3843_v27 }
 0x440   :  { %v3848_v59 = vadd.f32 1e-05, %v3844_v29 }
 0x441   :  { %5830 = vrsqrt.f32 %v3847_v36 }
 0x442   :  { %5832 = vrsqrt.f32 %v3848_v59 }
 0x44b   :  { %v5831_v60 = vpop.eup %5830 }
 0x44c   :  { %v5833_v61 = vpop.eup %5832  ;;  %v3855_v62 = vmul.f32 %v5831_v60, %v3807_v2 }
 0x44d   :  { %v3856_v63 = vmul.f32 %v5833_v61, %v3808_v46 }
 0x44e   :  { %v3859_v57 = vmax.f32 %v3855_v62, 0.0 }
 0x44f   :  { %v3860_v1 = vmax.f32 %v3856_v63, 0.0 }
 0x450   :  { %v3863_v3 = vpack.c.bf16 %v3859_v57, %v3859_v57 }
 0x451   :  { %v3864_v37 = vpack.c.bf16 %v3860_v1, %v3860_v1 }
 0x453   :  { %4334 = vmatprep.mubr.bf16.mxu1 %v3864_v37 }
 0x454   :  { %4335 = vmatmul.mubr.bf16.vlgmr.msra.gmra.mrb[132].mxu1 %v3863_v3 }
 0x527   :  { %v4336_v23 = vpop.f32.mrb[132].mxu1 }
 0x528   :  { %v5275_v26 = vadd.f32 %v4336_v23, %v3934_v19  ;;  %v4338_v24 = vpop.f32.mrb[133].mxu1 }
 0x529   :  { %v5276_v10 = vadd.f32 %v4338_v24, %v3938_v20  ;;  %v4340_v25 = vpop.f32.mrb[134].mxu1 }
 0x52a   :  { %v4343_v40 = vsel %vm3771_vm4, %v5275_v26, 0.0  ;;  %v4341_v28 = vpop.f32.mrb[135].mxu1 }
 0x52b   :  { %v4344_v13 = vrot.slane %v4343_v40, 4  ;;  %v4350_v30 = vsel %vm3771_vm4, %v5276_v10, 0.0 }
 0x52c   :  { %v4351_v31 = vrot.slane %v4350_v30, 4 }
 0x52d   :  { %v4345_v0 = vadd.f32 %v4344_v13, %v4343_v40 }
 0x52e   :  { %v4352_v32 = vadd.f32 %v4351_v31, %v4350_v30 }
 0x52f   :  { %v4346_v2 = vrot.slane %v4345_v0, 2 }
 0x530   :  { %v4353_v46 = vrot.slane %v4352_v32, 2 }
 0x531   :  { %v4347_v12 = vadd.f32 %v4346_v2, %v4345_v0 }
 0x532   :  { %v4354_v41 = vadd.f32 %v4353_v46, %v4352_v32 }
 0x533   :  { %v4348_v8 = vrot.slane %v4347_v12, 1 }
 0x534   :  { %v4355_v47 = vrot.slane %v4354_v41, 1 }
 0x535   :  { %v4349_v34 = vadd.f32 %v4348_v8, %v4347_v12 }
 0x536   :  { %v4356_v17 = vadd.f32 %v4355_v47, %v4354_v41 }
 0x537   :  { %v4357_v33 = vmul.f32 0.5, %v4349_v34 }
 0x538   :  { %v4358_v49 = vmul.f32 0.5, %v4356_v17 }
 0x539   :  { %v4359_v42 = vsub.f32 %v5275_v26, %v4357_v33 }
 0x53a   :  { %v4360_v55 = vsub.f32 %v5276_v10, %v4358_v49 }
 0x53b   :  { %v4361_v38 = vmul.f32 %v4359_v42, %v4359_v42 }
 0x53c   :  { %v4362_v48 = vmul.f32 %v4360_v55, %v4360_v55 }
 0x53d   :  { %v4363_v50 = vsel %vm3771_vm4, %v4361_v38, 0.0 }
 0x53e   :  { %v4364_v51 = vrot.slane %v4363_v50, 4  ;;  %v4370_v52 = vsel %vm3771_vm4, %v4362_v48, 0.0 }
 0x53f   :  { %v4371_v22 = vrot.slane %v4370_v52, 4 }
 0x540   :  { %v4365_v53 = vadd.f32 %v4364_v51, %v4363_v50 }
 0x541   :  { %v4372_v54 = vadd.f32 %v4371_v22, %v4370_v52 }
 0x542   :  { %v4366_v56 = vrot.slane %v4365_v53, 2 }
 0x543   :  { %v4373_v27 = vrot.slane %v4372_v54, 2 }
 0x544   :  { %v4367_v29 = vadd.f32 %v4366_v56, %v4365_v53 }
 0x545   :  { %v4374_v36 = vadd.f32 %v4373_v27, %v4372_v54 }
 0x546   :  { %v4368_v59 = vrot.slane %v4367_v29, 1 }
 0x547   :  { %v4375_v60 = vrot.slane %v4374_v36, 1 }
 0x548   :  { %v4369_v61 = vadd.f32 %v4368_v59, %v4367_v29 }
 0x549   :  { %v4376_v62 = vadd.f32 %v4375_v60, %v4374_v36 }
 0x54a   :  { %v4377_v63 = vmul.f32 0.5, %v4369_v61 }
 0x54b   :  { %v4378_v57 = vmul.f32 0.5, %v4376_v62 }
 0x54c   :  { %v4379_v1 = vadd.f32 1e-05, %v4377_v63 }
 0x54d   :  { %v4380_v37 = vadd.f32 1e-05, %v4378_v57 }
 0x54e   :  { %5834 = vrsqrt.f32 %v4379_v1 }
 0x54f   :  { %5836 = vrsqrt.f32 %v4380_v37 }
 0x558   :  { %v5835_v3 = vpop.eup %5834 }
 0x559   :  { %v5837_v44 = vpop.eup %5836  ;;  %v4383_v21 = vmul.f32 %v5835_v3, %v4359_v42 }
 0x55a   :  { %v4384_v43 = vmul.f32 %v5837_v44, %v4360_v55 }
 0x55b   :  { %v4385_v4 = vmax.f32 %v4383_v21, 0.0 }
 0x55c   :  { %v4386_v5 = vmax.f32 %v4384_v43, 0.0 }
 0x55d   :  { %v4387_v6 = vpack.c.bf16 %v4385_v4, %v4385_v4 }
 0x55e   :  { %v4388_v7 = vpack.c.bf16 %v4386_v5, %v4386_v5 }
 0x560   :  { %4556 = vmatprep.mubr.bf16.mxu0 %v4388_v7 }
 0x561   :  { %4557 = vmatmul.mubr.bf16.vlgmr.msra.gmra.mrb[140].mxu0 %v4387_v6 }
 0x562   :  { %5879 = shalt.err (!%p5876_p12)
}
 0x563   :  { %s5880_s2 = scalar_lea.hbm %s7115_s12, 256 }
 0x564   :  { %p5881_p13 = scmp.ne.s32.totalorder %s7115_s12, %s5880_s2  ;;  %p5884_p0 = scmp.lt.u32.totalorder %s5880_s2, %s7115_s12 }
 0x566   :  { %p5886_p1 = pnand %p5884_p0, %p5881_p13 }
 0x568   :  { %5889 = shalt.err (!%p5886_p1)
}
 0x569   :  { %s5926_s1 = smov 128   ;;  %s5927_s0 = smov 8   ;;  %v5080_v11 = vld [vmem:[%s7114_s11] ss:$0 sm:$0xff] }
 0x56a   :  { %4580 = dma.vmem_to_hbm [thread:$0]  %s4575_s10, 256, %s7115_s12, [#allocation4], %s5926_s1, %s5926_s1, %s5927_s0  }
 0x56b   :  { %s5928_s20 = smov [#allocation6]  }
 0x56c   :  { %s4589_s21 = sshll.u32 %s5928_s20, 4  ;;  %s4590_s21 = int_to_ptr.vmem [resolvable:$true] %s4589_s21 }
 0x56d   :  { %s5890_s12 = scalar_lea.vmem %s4590_s21, 32  ;;  %p5895_p3 = scmp.lt.s32.totalorder %s4590_s21, %s4590_s21 }
 0x56e   :  { %p5891_p2 = scmp.ne.s32.totalorder %s4590_s21, %s5890_s12  ;;  %p5896_p4 = scmp.lt.s32.totalorder %s5890_s12, %s5890_s12 }
 0x570   :  { %p5897_p5 = por %p5896_p4, %p5895_p3 }
 0x572   :  { %p5898_p6 = pnand %p5897_p5, %p5891_p2 }
 0x634   :  { %v5147_v9 = vpop.f32.mrb[140].mxu0 }
 0x635   :  { %v5148_v14 = vpop.f32.mrb[141].mxu0 }
 0x636   :  { %v5149_v18 = vadd.f32 %v5148_v14, %v5147_v9  ;;  %v5150_v45 = vpop.f32.mrb[142].mxu0 }
 0x637   :  { %v5151_v58 = vpop.f32.mrb[143].mxu0 }
 0x638   :  { %v4559_v15 = vadd.f32 %v5149_v18, %v5080_v11 }
 0x63a   :  { %v4564_v16 = vmul.f32 0.5, %v4559_v15 }
 0x63c   :  { %5838 = vtanh.f32 %v4564_v16 }
 0x646   :  { %v5839_v35 = vpop.eup %5838 }
 0x647   :  { %v4566_v39 = vadd.f32 1.0, %v5839_v35 }
 0x649   :  { %v4567_v19 = vmul.f32 0.5, %v4566_v39 }
 0x64b   :  { %4568 = vst [vmem:[#allocation6] sm:$0x3] %v4567_v19 }
 0x64c   :  { %5901 = shalt.err (!%p5898_p6)
}
 0x64d   :  { %s5902_s23 = scalar_lea.hbm %s7117_s14, 32 }
 0x64e   :  { %p5903_p7 = scmp.ne.s32.totalorder %s7117_s14, %s5902_s23  ;;  %p5906_p8 = scmp.lt.u32.totalorder %s5902_s23, %s7117_s14 }
 0x650   :  { %p5908_p9 = pnand %p5906_p8, %p5903_p7 }
 0x652   :  { %5911 = shalt.err (!%p5908_p9)
}
 0x653   :  { %4592 = dma.vmem_to_hbm [thread:$0]  %s4590_s21, 32, %s7117_s14, [#allocation7]  }
 0x654   :  { %5914 = dma.done.wait [#allocation4], 256  }
 0x655   :  { %5915 = vsyncadd [#allocation4], 4294967040 }
 0x656   :  { %5916 = dma.done.wait [#allocation7], 32  }
 0x657   :  { %5917 = vsyncadd [#allocation7], 4294967264 }
 0x658   :  { %4601 = vsyncpa [#allocation3], 1 }
 0x659   :  { %4602 = vsyncpa [#allocation4], 1 }
 0x65a   :  { %4603 = vsyncpa [#allocation7], 1 }

</bundles_post_ra>
